<compile_context>
chip_gen: v5e
topology: v5e:2x2
jax: 0.10.0
libtpu: 0.0.40
codegen_flags: <defaults>
</compile_context>

<pallas_src>
import jax
import jax.numpy as jnp
from jax import lax
from jax.experimental import pallas as pl
from jax.experimental.pallas import tpu as pltpu


# ----------------------------- Pallas kernel --------------------------------
def _gru_encoder_kernel(x_ref, wih_ref, whh_ref, bias_ref,
                        pro_ref, wpro_ref, bpro_ref,
                        whid_e_ref, whid_h_ref, bhid_ref,
                        out_ref, hid_ref,
                        h_scratch, pre_scratch):
    blk = pl.program_id(0)
    t_blk = x_ref.shape[0]
    in_dim = x_ref.shape[2] - 1            # last channel of x is the validity mask
    H = whh_ref.shape[0]
    H2 = 2 * H

    @pl.when(blk == 0)
    def _init():
        h_scratch[...] = jnp.zeros_like(h_scratch)
        hid_ref[...] = jnp.zeros_like(hid_ref)
        # Extra_MLP and the extra-feature half of fc_hid do not depend on the
        # recurrence -> hoist them off the serial tail.
        extra = jnp.tanh(
            jnp.dot(pro_ref[...], wpro_ref[...],
                    preferred_element_type=jnp.float32) + bpro_ref[...])
        pre_scratch[...] = (
            jnp.dot(extra, whid_e_ref[...], preferred_element_type=jnp.float32)
            + bhid_ref[...])

    # ---- loop-invariant loads, hoisted once per grid step.
    whh = whh_ref[...]                                     # (H, 3H) [r|z|n]
    wih_rows = [wih_ref[k:k + 1, :] for k in range(in_dim)]  # (1, 3H) each
    b_gi = bias_ref[0:1, :]                                # (1, 3H): b_ih+b_hh (r,z), b_in (n)
    b_hn = bias_ref[1:2, :]                                # (1, 3H): zeros | zeros | b_hn

    def step(i, h):
        xi = x_ref[i]                                      # (Bp, in_dim + 1)
        # input projection: 3 broadcast-FMAs on the VPU, hidden under MXU latency
        gi = xi[:, 0:1] * wih_rows[0] + b_gi
        for k in range(1, in_dim):
            gi = gi + xi[:, k:k + 1] * wih_rows[k]
        # single fused recurrent matmul covering all three gates (one MXU pass)
        gh = jnp.dot(h, whh, preferred_element_type=jnp.float32) + b_hn
        # one sigmoid over the 2H-wide r|z slice
        rz = jax.nn.sigmoid(gi[:, :H2] + gh[:, :H2])
        r = rz[:, :H]
        z = rz[:, H:]
        n = jnp.tanh(gi[:, H2:] + r * gh[:, H2:])
        h_new = n + z * (h - n)                            # == (1-z)*n + z*h
        m = xi[:, in_dim:]                                 # (Bp, 1) f32 mask {0,1}
        out_ref[i] = (m * h_new).astype(out_ref.dtype)     # zero padded positions
        return h + m * (h_new - h)                         # carry only while valid

    h = lax.fori_loop(0, t_blk, step, h_scratch[...],
                      unroll=True if t_blk <= 32 else 4)
    h_scratch[...] = h

    # ---- final hidden: tanh(fc_hid(cat([extra, h]))) — extra half precomputed.
    @pl.when(blk == pl.num_programs(0) - 1)
    def _finish():
        hid = jnp.tanh(
            pre_scratch[...]
            + jnp.dot(h, whid_h_ref[...], preferred_element_type=jnp.float32))
        hid_ref[...] = hid.astype(hid_ref.dtype)


# ------------------------------- wrapper -------------------------------------
def encoder_forward(src, src_len, pro_features, params, *, t_blk=None):
    """src: (T, B, 3) f32, src_len: (B,) i32 (sorted desc, max == T),
    pro_features: (B, P_in) f32. params in PyTorch layout (see __main__)."""
    T, B, in_dim = src.shape
    H = params["w_hh"].shape[1]
    P_out, P_in = params["w_pro"].shape

    # --- per-gate weight concatenation (PyTorch gate order: [r | z | n]).
    wih_cat = params["w_ih"].T                                    # (in_dim, 3H)
    whh_cat = params["w_hh"].T                                    # (H, 3H)
    b_ih, b_hh = params["b_ih"], params["b_hh"]
    b_gi = jnp.concatenate([b_ih[:H] + b_hh[:H],
                            b_ih[H:2 * H] + b_hh[H:2 * H],
                            b_ih[2 * H:]])                        # (3H,)
    b_hn_pad = jnp.concatenate([jnp.zeros((2 * H,), jnp.float32),
                                b_hh[2 * H:]])                    # (3H,)
    bias2 = jnp.stack([b_gi, b_hn_pad]).astype(jnp.float32)       # (2, 3H)

    wpro_t = params["w_pro"].T                                    # (P_in, P_out)
    bpro = params["b_pro"].reshape(1, P_out)
    whid_e_t = params["w_hid"][:, :P_out].T                       # (P_out, H)
    whid_h_t = params["w_hid"][:, P_out:].T                       # (H, H)
    bhid = params["b_hid"].reshape(1, H)

    # --- time blocking: cover the whole sequence in one grid step for short T
    # (no padded-tail steps, grid-step overhead paid once).
    if t_blk is None:
        t_blk = T if T <= 128 else 64
    Bp = pl.cdiv(B, 8) * 8
    T_pad = pl.cdiv(T, t_blk) * t_blk
    n_blk = T_pad // t_blk

    lens_p = jnp.zeros((Bp,), jnp.int32).at[:B].set(src_len.astype(jnp.int32))
    maskf = (jnp.arange(T_pad, dtype=jnp.int32)[:, None]
             < lens_p[None, :]).astype(jnp.float32)               # (T_pad, Bp)
    # fold the validity mask into src as an extra feature column
    x_p = jnp.zeros((T_pad, Bp, in_dim + 1), jnp.float32)
    x_p = x_p.at[:T, :B, :in_dim].set(src.astype(jnp.float32))
    x_p = x_p.at[:, :, in_dim].set(maskf)
    pro_p = jnp.zeros((Bp, P_in), jnp.float32).at[:B].set(
        pro_features.astype(jnp.float32))

    in_specs = [
        pl.BlockSpec((t_blk, Bp, in_dim + 1), lambda b: (b, 0, 0)),  # src + mask
        pl.BlockSpec((in_dim, 3 * H), lambda b: (0, 0)),             # W_ih^T cat
        pl.BlockSpec((H, 3 * H), lambda b: (0, 0)),                  # W_hh^T cat
        pl.BlockSpec((2, 3 * H), lambda b: (0, 0)),                  # packed biases
        pl.BlockSpec((Bp, P_in), lambda b: (0, 0)),                  # pro_features
        pl.BlockSpec((P_in, P_out), lambda b: (0, 0)),               # W_pro^T
        pl.BlockSpec((1, P_out), lambda b: (0, 0)),                  # b_pro
        pl.BlockSpec((P_out, H), lambda b: (0, 0)),                  # W_hid[:, :P_out]^T
        pl.BlockSpec((H, H), lambda b: (0, 0)),                      # W_hid[:, P_out:]^T
        pl.BlockSpec((1, H), lambda b: (0, 0)),                      # b_hid
    ]
    out_specs = [
        pl.BlockSpec((t_blk, Bp, H), lambda b: (b, 0, 0)),           # outputs
        pl.BlockSpec((Bp, H), lambda b: (0, 0)),                     # hidden (resident)
    ]
    out_shape = [
        jax.ShapeDtypeStruct((T_pad, Bp, H), jnp.float32),
        jax.ShapeDtypeStruct((Bp, H), jnp.float32),
    ]

    outputs_p, hidden_p = pl.pallas_call(
        _gru_encoder_kernel,
        out_shape=out_shape,
        grid_spec=pltpu.PrefetchScalarGridSpec(
            num_scalar_prefetch=0,
            grid=(n_blk,),
            in_specs=in_specs,
            out_specs=out_specs,
            scratch_shapes=[pltpu.VMEM((Bp, H), jnp.float32),   # carried hidden
                            pltpu.VMEM((Bp, H), jnp.float32)],  # extra@W_hid_e + b
        ),
        compiler_params=pltpu.CompilerParams(
            dimension_semantics=("arbitrary",)),   # time axis is sequential
    )(x_p, wih_cat, whh_cat, bias2,
      pro_p, wpro_t, bpro, whid_e_t, whid_h_t, bhid)

    # TODO(synk): pro_features_flag=False path (return raw GRU hidden) not exposed.
    return outputs_p[:T, :B], hidden_p[:B][None, :, :]


# ---------------- pure-JAX reference (mirrors the PyTorch module) -------------
def encoder_reference(src, src_len, pro_features, params):
    T, B, _ = src.shape
    H = params["w_hh"].shape[1]
    wih_t, whh_t = params["w_ih"].T, params["w_hh"].T
    bih, bhh = params["b_ih"], params["b_hh"]
    h = jnp.zeros((B, H), jnp.float32)
    outs = []
    for t in range(T):
        gi = src[t] @ wih_t + bih
        gh = h @ whh_t + bhh
        i_r, i_z, i_n = gi[:, :H], gi[:, H:2 * H], gi[:, 2 * H:]
        h_r, h_z, h_n = gh[:, :H], gh[:, H:2 * H], gh[:, 2 * H:]
        r = jax.nn.sigmoid(i_r + h_r)
        z = jax.nn.sigmoid(i_z + h_z)
        n = jnp.tanh(i_n + r * h_n)
        h_new = (1.0 - z) * n + z * h
        mask = (t < src_len)[:, None]
        h = jnp.where(mask, h_new, h)
        outs.append(jnp.where(mask, h_new, 0.0))
    outputs = jnp.stack(outs, axis=0)
    extra = jnp.tanh(pro_features @ params["w_pro"].T + params["b_pro"])
    hidden = jnp.tanh(jnp.concatenate([extra, h], axis=1) @ params["w_hid"].T
                      + params["b_hid"])
    return outputs, hidden[None, :, :]


if __name__ == "__main__":
    # Shapes consistent with the module: input_dim fixed to 3 by Encoder.
    T, B, IN_DIM = 20, 4, 3
    H = 32                # hid_dim
    P_IN, P_OUT = 8, 8    # pro_input_dim, pro_output_dim

    key = jax.random.PRNGKey(0)
    ks = jax.random.split(key, 10)

    def uni(k, shape, bound):
        return jax.random.uniform(k, shape, jnp.float32, -bound, bound)

    kb = 1.0 / (H ** 0.5)
    params = {
        # PyTorch nn.GRU layout: weight_ih (3H, I), weight_hh (3H, H), gate order [r|z|n]
        "w_ih": uni(ks[0], (3 * H, IN_DIM), kb),
        "w_hh": uni(ks[1], (3 * H, H), kb),
        "b_ih": uni(ks[2], (3 * H,), kb),
        "b_hh": uni(ks[3], (3 * H,), kb),
        # Extra_MLP: Linear(P_IN -> P_OUT)
        "w_pro": uni(ks[4], (P_OUT, P_IN), 1.0 / (P_IN ** 0.5)),
        "b_pro": uni(ks[5], (P_OUT,), 1.0 / (P_IN ** 0.5)),
        # fc_hid: Linear(P_OUT + H -> H), input is cat([extra, hidden])
        "w_hid": uni(ks[6], (H, P_OUT + H), 1.0 / ((P_OUT + H) ** 0.5)),
        "b_hid": uni(ks[7], (H,), 1.0 / ((P_OUT + H) ** 0.5)),
    }

    # lengths sorted descending (pack_padded_sequence enforce_sorted=True),
    # max length == T so pad_packed_sequence returns T rows.
    src_len = jnp.array([20, 17, 9, 5], dtype=jnp.int32)
    src = jax.random.normal(ks[8], (T, B, IN_DIM), jnp.float32)
    tmask = (jnp.arange(T)[:, None] < src_len[None, :])[:, :, None]
    src = src * tmask          # packed path never sees padded positions
    pro_features = jax.random.normal(ks[9], (B, P_IN), jnp.float32)

    outputs, hidden = encoder_forward(src, src_len, pro_features, params)
    jax.block_until_ready((outputs, hidden))

    ref_out, ref_hid = encoder_reference(src, src_len, pro_features, params)
    assert outputs.shape == (T, B, H) and hidden.shape == (1, B, H)
    assert jnp.allclose(outputs, ref_out, atol=1e-4, rtol=1e-4), "outputs mismatch"
    assert jnp.allclose(hidden, ref_hid, atol=1e-4, rtol=1e-4), "hidden mismatch"

    print("KERNEL_OK")
</pallas_src>

<mosaic_0001>
module attributes {stable_mosaic.version = 11 : i64} {
  func.func @_gru_encoder_kernel(%arg0: i32, %arg1: memref<20x8x4xf32, #tpu.memory_space<vmem>>, %arg2: memref<3x96xf32, #tpu.memory_space<vmem>>, %arg3: memref<32x96xf32, #tpu.memory_space<vmem>>, %arg4: memref<2x96xf32, #tpu.memory_space<vmem>>, %arg5: memref<8x8xf32, #tpu.memory_space<vmem>>, %arg6: memref<8x8xf32, #tpu.memory_space<vmem>>, %arg7: memref<1x8xf32, #tpu.memory_space<vmem>>, %arg8: memref<8x32xf32, #tpu.memory_space<vmem>>, %arg9: memref<32x32xf32, #tpu.memory_space<vmem>>, %arg10: memref<1x32xf32, #tpu.memory_space<vmem>>, %arg11: memref<20x8x32xf32, #tpu.memory_space<vmem>>, %arg12: memref<8x32xf32, #tpu.memory_space<vmem>>, %arg13: memref<8x32xf32, #tpu.memory_space<vmem>>, %arg14: memref<8x32xf32, #tpu.memory_space<vmem>>) attributes {dimension_semantics = [#tpu.dimension_semantics<arbitrary>], iteration_bounds = array<i64: 1>, scalar_prefetch = 0 : i64, scratch_operands = 2 : i64, tpu.core_type = #tpu.core_type<tc>, window_params = [{transform_indices = @transform_0, window_bounds = array<i64: 20, 8, 4>}, {pipeline_mode = #tpu.pipeline_mode<synchronous>, transform_indices = @transform_1, window_bounds = array<i64: 3, 96>}, {pipeline_mode = #tpu.pipeline_mode<synchronous>, transform_indices = @transform_2, window_bounds = array<i64: 32, 96>}, {pipeline_mode = #tpu.pipeline_mode<synchronous>, transform_indices = @transform_3, window_bounds = array<i64: 2, 96>}, {pipeline_mode = #tpu.pipeline_mode<synchronous>, transform_indices = @transform_4, window_bounds = array<i64: 8, 8>}, {pipeline_mode = #tpu.pipeline_mode<synchronous>, transform_indices = @transform_5, window_bounds = array<i64: 8, 8>}, {pipeline_mode = #tpu.pipeline_mode<synchronous>, transform_indices = @transform_6, window_bounds = array<i64: 1, 8>}, {pipeline_mode = #tpu.pipeline_mode<synchronous>, transform_indices = @transform_7, window_bounds = array<i64: 8, 32>}, {pipeline_mode = #tpu.pipeline_mode<synchronous>, transform_indices = @transform_8, window_bounds = array<i64: 32, 32>}, {pipeline_mode = #tpu.pipeline_mode<synchronous>, transform_indices = @transform_9, window_bounds = array<i64: 1, 32>}, {transform_indices = @transform_10, window_bounds = array<i64: 20, 8, 32>}, {pipeline_mode = #tpu.pipeline_mode<synchronous>, transform_indices = @transform_11, window_bounds = array<i64: 8, 32>}]} {
    %c0_i32 = arith.constant 0 : i32
    %0 = arith.cmpi eq, %arg0, %c0_i32 : i32
    %1 = arith.extui %0 : i1 to i32
    %c0_i32_0 = arith.constant 0 : i32
    %2 = arith.cmpi ne, %1, %c0_i32_0 : i32
    scf.if %2 {
      %cst_136 = arith.constant 0.000000e+00 : f32
      %1034 = vector.broadcast %cst_136 : f32 to vector<8x32xf32>
      %c0_137 = arith.constant 0 : index
      %c0_138 = arith.constant 0 : index
      %1035 = vector.load %arg13[%c0_137, %c0_138] : memref<8x32xf32, #tpu.memory_space<vmem>>, vector<8x32xf32>
      tpu.vector_store %arg13[%c0_137, %c0_138], %1034 {strides = array<i32>} : memref<8x32xf32, #tpu.memory_space<vmem>>, vector<8x32xf32>,
      %cst_139 = arith.constant 0.000000e+00 : f32
      %1036 = vector.broadcast %cst_139 : f32 to vector<8x32xf32>
      %c0_140 = arith.constant 0 : index
      %c0_141 = arith.constant 0 : index
      %1037 = vector.load %arg12[%c0_140, %c0_141] : memref<8x32xf32, #tpu.memory_space<vmem>>, vector<8x32xf32>
      tpu.vector_store %arg12[%c0_140, %c0_141], %1036 {strides = array<i32>} : memref<8x32xf32, #tpu.memory_space<vmem>>, vector<8x32xf32>,
      %c0_142 = arith.constant 0 : index
      %c0_143 = arith.constant 0 : index
      %1038 = vector.load %arg5[%c0_142, %c0_143] : memref<8x8xf32, #tpu.memory_space<vmem>>, vector<8x8xf32>
      %c0_144 = arith.constant 0 : index
      %c0_145 = arith.constant 0 : index
      %1039 = vector.load %arg6[%c0_144, %c0_145] : memref<8x8xf32, #tpu.memory_space<vmem>>, vector<8x8xf32>
      %cst_146 = arith.constant dense<0.000000e+00> : vector<8x8xf32>
      %1040 = tpu.matmul %1038, %1039, %cst_146 {dimension_numbers = #tpu.dot_dimension_numbers<[1], [0], [0], [1], [0, 0, 1, 1], [], []>} : vector<8x8xf32>, vector<8x8xf32>, vector<8x8xf32> -> vector<8x8xf32>
      %c0_147 = arith.constant 0 : index
      %c0_148 = arith.constant 0 : index
      %1041 = vector.load %arg7[%c0_147, %c0_148] : memref<1x8xf32, #tpu.memory_space<vmem>>, vector<1x8xf32>
      %1042 = vector.broadcast %1041 : vector<1x8xf32> to vector<8x8xf32>
      %1043 = arith.addf %1040, %1042 : vector<8x8xf32>
      %1044 = math.tanh %1043 : vector<8x8xf32>
      %c0_149 = arith.constant 0 : index
      %c0_150 = arith.constant 0 : index
      %1045 = vector.load %arg8[%c0_149, %c0_150] : memref<8x32xf32, #tpu.memory_space<vmem>>, vector<8x32xf32>
      %cst_151 = arith.constant dense<0.000000e+00> : vector<8x32xf32>
      %1046 = tpu.matmul %1044, %1045, %cst_151 {dimension_numbers = #tpu.dot_dimension_numbers<[1], [0], [0], [1], [0, 0, 1, 1], [], []>} : vector<8x8xf32>, vector<8x32xf32>, vector<8x32xf32> -> vector<8x32xf32>
      %c0_152 = arith.constant 0 : index
      %c0_153 = arith.constant 0 : index
      %1047 = vector.load %arg10[%c0_152, %c0_153] : memref<1x32xf32, #tpu.memory_space<vmem>>, vector<1x32xf32>
      %1048 = vector.broadcast %1047 : vector<1x32xf32> to vector<8x32xf32>
      %1049 = arith.addf %1046, %1048 : vector<8x32xf32>
      %c0_154 = arith.constant 0 : index
      %c0_155 = arith.constant 0 : index
      %1050 = vector.load %arg14[%c0_154, %c0_155] : memref<8x32xf32, #tpu.memory_space<vmem>>, vector<8x32xf32>
      tpu.vector_store %arg14[%c0_154, %c0_155], %1049 {strides = array<i32>} : memref<8x32xf32, #tpu.memory_space<vmem>>, vector<8x32xf32>,
    } else {
    }
    %c0 = arith.constant 0 : index
    %c0_1 = arith.constant 0 : index
    %3 = vector.load %arg3[%c0, %c0_1] : memref<32x96xf32, #tpu.memory_space<vmem>>, vector<32x96xf32>
    %c0_2 = arith.constant 0 : index
    %c0_3 = arith.constant 0 : index
    %4 = vector.load %arg2[%c0_2, %c0_3] : memref<3x96xf32, #tpu.memory_space<vmem>>, vector<1x96xf32>
    %c1 = arith.constant 1 : index
    %c0_4 = arith.constant 0 : index
    %5 = vector.load %arg2[%c1, %c0_4] : memref<3x96xf32, #tpu.memory_space<vmem>>, vector<1x96xf32>
    %c2 = arith.constant 2 : index
    %c0_5 = arith.constant 0 : index
    %6 = vector.load %arg2[%c2, %c0_5] : memref<3x96xf32, #tpu.memory_space<vmem>>, vector<1x96xf32>
    %c0_6 = arith.constant 0 : index
    %c0_7 = arith.constant 0 : index
    %7 = vector.load %arg4[%c0_6, %c0_7] : memref<2x96xf32, #tpu.memory_space<vmem>>, vector<1x96xf32>
    %c1_8 = arith.constant 1 : index
    %c0_9 = arith.constant 0 : index
    %8 = vector.load %arg4[%c1_8, %c0_9] : memref<2x96xf32, #tpu.memory_space<vmem>>, vector<1x96xf32>
    %c0_10 = arith.constant 0 : index
    %c0_11 = arith.constant 0 : index
    %9 = vector.load %arg13[%c0_10, %c0_11] : memref<8x32xf32, #tpu.memory_space<vmem>>, vector<8x32xf32>
    %c0_i32_12 = arith.constant 0 : i32
    %10 = arith.index_cast %c0_i32_12 : i32 to index
    %c0_13 = arith.constant 0 : index
    %c0_14 = arith.constant 0 : index
    %11 = vector.load %arg1[%10, %c0_13, %c0_14] : memref<20x8x4xf32, #tpu.memory_space<vmem>>, vector<1x8x4xf32>
    %12 = vector.shape_cast %11 : vector<1x8x4xf32> to vector<8x4xf32>
    %13 = vector.extract_strided_slice %12 {offsets = [0, 0], sizes = [8, 1], strides = [1, 1]} : vector<8x4xf32> to vector<8x1xf32>
    %14 = vector.broadcast %13 : vector<8x1xf32> to vector<8x96xf32>
    %15 = vector.broadcast %4 : vector<1x96xf32> to vector<8x96xf32>
    %16 = arith.mulf %14, %15 : vector<8x96xf32>
    %17 = vector.broadcast %7 : vector<1x96xf32> to vector<8x96xf32>
    %18 = arith.addf %16, %17 : vector<8x96xf32>
    %19 = vector.extract_strided_slice %12 {offsets = [0, 1], sizes = [8, 1], strides = [1, 1]} : vector<8x4xf32> to vector<8x1xf32>
    %20 = vector.broadcast %19 : vector<8x1xf32> to vector<8x96xf32>
    %21 = vector.broadcast %5 : vector<1x96xf32> to vector<8x96xf32>
    %22 = arith.mulf %20, %21 : vector<8x96xf32>
    %23 = arith.addf %18, %22 : vector<8x96xf32>
    %24 = vector.extract_strided_slice %12 {offsets = [0, 2], sizes = [8, 1], strides = [1, 1]} : vector<8x4xf32> to vector<8x1xf32>
    %25 = vector.broadcast %24 : vector<8x1xf32> to vector<8x96xf32>
    %26 = vector.broadcast %6 : vector<1x96xf32> to vector<8x96xf32>
    %27 = arith.mulf %25, %26 : vector<8x96xf32>
    %28 = arith.addf %23, %27 : vector<8x96xf32>
    %cst = arith.constant dense<0.000000e+00> : vector<8x96xf32>
    %29 = tpu.matmul %9, %3, %cst {dimension_numbers = #tpu.dot_dimension_numbers<[1], [0], [0], [1], [0, 0, 1, 1], [], []>} : vector<8x32xf32>, vector<32x96xf32>, vector<8x96xf32> -> vector<8x96xf32>
    %30 = vector.broadcast %8 : vector<1x96xf32> to vector<8x96xf32>
    %31 = arith.addf %29, %30 : vector<8x96xf32>
    %32 = vector.extract_strided_slice %28 {offsets = [0, 0], sizes = [8, 64], strides = [1, 1]} : vector<8x96xf32> to vector<8x64xf32>
    %33 = vector.extract_strided_slice %31 {offsets = [0, 0], sizes = [8, 64], strides = [1, 1]} : vector<8x96xf32> to vector<8x64xf32>
    %34 = arith.addf %32, %33 : vector<8x64xf32>
    %35 = arith.negf %34 : vector<8x64xf32>
    %36 = math.exp %35 : vector<8x64xf32>
    %cst_15 = arith.constant 1.000000e+00 : f32
    %37 = vector.broadcast %cst_15 : f32 to vector<8x64xf32>
    %38 = arith.addf %37, %36 : vector<8x64xf32>
    %39 = arith.divf %37, %38 : vector<8x64xf32>
    %40 = vector.extract_strided_slice %39 {offsets = [0, 0], sizes = [8, 32], strides = [1, 1]} : vector<8x64xf32> to vector<8x32xf32>
    %41 = vector.extract_strided_slice %39 {offsets = [0, 32], sizes = [8, 32], strides = [1, 1]} : vector<8x64xf32> to vector<8x32xf32>
    %42 = vector.extract_strided_slice %28 {offsets = [0, 64], sizes = [8, 32], strides = [1, 1]} : vector<8x96xf32> to vector<8x32xf32>
    %43 = vector.extract_strided_slice %31 {offsets = [0, 64], sizes = [8, 32], strides = [1, 1]} : vector<8x96xf32> to vector<8x32xf32>
    %44 = arith.mulf %40, %43 : vector<8x32xf32>
    %45 = arith.addf %42, %44 : vector<8x32xf32>
    %46 = math.tanh %45 : vector<8x32xf32>
    %47 = arith.subf %9, %46 : vector<8x32xf32>
    %48 = arith.mulf %41, %47 : vector<8x32xf32>
    %49 = arith.addf %46, %48 : vector<8x32xf32>
    %50 = vector.extract_strided_slice %12 {offsets = [0, 3], sizes = [8, 1], strides = [1, 1]} : vector<8x4xf32> to vector<8x1xf32>
    %51 = vector.broadcast %50 : vector<8x1xf32> to vector<8x32xf32>
    %52 = arith.mulf %51, %49 : vector<8x32xf32>
    %53 = arith.index_cast %c0_i32_12 : i32 to index
    %c0_16 = arith.constant 0 : index
    %c0_17 = arith.constant 0 : index
    %54 = vector.load %arg11[%53, %c0_16, %c0_17] : memref<20x8x32xf32, #tpu.memory_space<vmem>>, vector<1x8x32xf32>
    %55 = vector.shape_cast %54 : vector<1x8x32xf32> to vector<8x32xf32>
    %56 = vector.shape_cast %52 : vector<8x32xf32> to vector<1x8x32xf32>
    tpu.vector_store %arg11[%53, %c0_16, %c0_17], %56 {strides = array<i32>} : memref<20x8x32xf32, #tpu.memory_space<vmem>>, vector<1x8x32xf32>,
    %57 = arith.subf %49, %9 : vector<8x32xf32>
    %58 = vector.broadcast %50 : vector<8x1xf32> to vector<8x32xf32>
    %59 = arith.mulf %58, %57 : vector<8x32xf32>
    %60 = arith.addf %9, %59 : vector<8x32xf32>
    %c1_i32 = arith.constant 1 : i32
    %61 = arith.index_cast %c1_i32 : i32 to index
    %c0_18 = arith.constant 0 : index
    %c0_19 = arith.constant 0 : index
    %62 = vector.load %arg1[%61, %c0_18, %c0_19] : memref<20x8x4xf32, #tpu.memory_space<vmem>>, vector<1x8x4xf32>
    %63 = vector.shape_cast %62 : vector<1x8x4xf32> to vector<8x4xf32>
    %64 = vector.extract_strided_slice %63 {offsets = [0, 0], sizes = [8, 1], strides = [1, 1]} : vector<8x4xf32> to vector<8x1xf32>
    %65 = vector.broadcast %64 : vector<8x1xf32> to vector<8x96xf32>
    %66 = vector.broadcast %4 : vector<1x96xf32> to vector<8x96xf32>
    %67 = arith.mulf %65, %66 : vector<8x96xf32>
    %68 = vector.broadcast %7 : vector<1x96xf32> to vector<8x96xf32>
    %69 = arith.addf %67, %68 : vector<8x96xf32>
    %70 = vector.extract_strided_slice %63 {offsets = [0, 1], sizes = [8, 1], strides = [1, 1]} : vector<8x4xf32> to vector<8x1xf32>
    %71 = vector.broadcast %70 : vector<8x1xf32> to vector<8x96xf32>
    %72 = vector.broadcast %5 : vector<1x96xf32> to vector<8x96xf32>
    %73 = arith.mulf %71, %72 : vector<8x96xf32>
    %74 = arith.addf %69, %73 : vector<8x96xf32>
    %75 = vector.extract_strided_slice %63 {offsets = [0, 2], sizes = [8, 1], strides = [1, 1]} : vector<8x4xf32> to vector<8x1xf32>
    %76 = vector.broadcast %75 : vector<8x1xf32> to vector<8x96xf32>
    %77 = vector.broadcast %6 : vector<1x96xf32> to vector<8x96xf32>
    %78 = arith.mulf %76, %77 : vector<8x96xf32>
    %79 = arith.addf %74, %78 : vector<8x96xf32>
    %cst_20 = arith.constant dense<0.000000e+00> : vector<8x96xf32>
    %80 = tpu.matmul %60, %3, %cst_20 {dimension_numbers = #tpu.dot_dimension_numbers<[1], [0], [0], [1], [0, 0, 1, 1], [], []>} : vector<8x32xf32>, vector<32x96xf32>, vector<8x96xf32> -> vector<8x96xf32>
    %81 = vector.broadcast %8 : vector<1x96xf32> to vector<8x96xf32>
    %82 = arith.addf %80, %81 : vector<8x96xf32>
    %83 = vector.extract_strided_slice %79 {offsets = [0, 0], sizes = [8, 64], strides = [1, 1]} : vector<8x96xf32> to vector<8x64xf32>
    %84 = vector.extract_strided_slice %82 {offsets = [0, 0], sizes = [8, 64], strides = [1, 1]} : vector<8x96xf32> to vector<8x64xf32>
    %85 = arith.addf %83, %84 : vector<8x64xf32>
    %86 = arith.negf %85 : vector<8x64xf32>
    %87 = math.exp %86 : vector<8x64xf32>
    %cst_21 = arith.constant 1.000000e+00 : f32
    %88 = vector.broadcast %cst_21 : f32 to vector<8x64xf32>
    %89 = arith.addf %88, %87 : vector<8x64xf32>
    %90 = arith.divf %88, %89 : vector<8x64xf32>
    %91 = vector.extract_strided_slice %90 {offsets = [0, 0], sizes = [8, 32], strides = [1, 1]} : vector<8x64xf32> to vector<8x32xf32>
    %92 = vector.extract_strided_slice %90 {offsets = [0, 32], sizes = [8, 32], strides = [1, 1]} : vector<8x64xf32> to vector<8x32xf32>
    %93 = vector.extract_strided_slice %79 {offsets = [0, 64], sizes = [8, 32], strides = [1, 1]} : vector<8x96xf32> to vector<8x32xf32>
    %94 = vector.extract_strided_slice %82 {offsets = [0, 64], sizes = [8, 32], strides = [1, 1]} : vector<8x96xf32> to vector<8x32xf32>
    %95 = arith.mulf %91, %94 : vector<8x32xf32>
    %96 = arith.addf %93, %95 : vector<8x32xf32>
    %97 = math.tanh %96 : vector<8x32xf32>
    %98 = arith.subf %60, %97 : vector<8x32xf32>
    %99 = arith.mulf %92, %98 : vector<8x32xf32>
    %100 = arith.addf %97, %99 : vector<8x32xf32>
    %101 = vector.extract_strided_slice %63 {offsets = [0, 3], sizes = [8, 1], strides = [1, 1]} : vector<8x4xf32> to vector<8x1xf32>
    %102 = vector.broadcast %101 : vector<8x1xf32> to vector<8x32xf32>
    %103 = arith.mulf %102, %100 : vector<8x32xf32>
    %104 = arith.index_cast %c1_i32 : i32 to index
    %c0_22 = arith.constant 0 : index
    %c0_23 = arith.constant 0 : index
    %105 = vector.load %arg11[%104, %c0_22, %c0_23] : memref<20x8x32xf32, #tpu.memory_space<vmem>>, vector<1x8x32xf32>
    %106 = vector.shape_cast %105 : vector<1x8x32xf32> to vector<8x32xf32>
    %107 = vector.shape_cast %103 : vector<8x32xf32> to vector<1x8x32xf32>
    tpu.vector_store %arg11[%104, %c0_22, %c0_23], %107 {strides = array<i32>} : memref<20x8x32xf32, #tpu.memory_space<vmem>>, vector<1x8x32xf32>,
    %108 = arith.subf %100, %60 : vector<8x32xf32>
    %109 = vector.broadcast %101 : vector<8x1xf32> to vector<8x32xf32>
    %110 = arith.mulf %109, %108 : vector<8x32xf32>
    %111 = arith.addf %60, %110 : vector<8x32xf32>
    %c2_i32 = arith.constant 2 : i32
    %112 = arith.index_cast %c2_i32 : i32 to index
    %c0_24 = arith.constant 0 : index
    %c0_25 = arith.constant 0 : index
    %113 = vector.load %arg1[%112, %c0_24, %c0_25] : memref<20x8x4xf32, #tpu.memory_space<vmem>>, vector<1x8x4xf32>
    %114 = vector.shape_cast %113 : vector<1x8x4xf32> to vector<8x4xf32>
    %115 = vector.extract_strided_slice %114 {offsets = [0, 0], sizes = [8, 1], strides = [1, 1]} : vector<8x4xf32> to vector<8x1xf32>
    %116 = vector.broadcast %115 : vector<8x1xf32> to vector<8x96xf32>
    %117 = vector.broadcast %4 : vector<1x96xf32> to vector<8x96xf32>
    %118 = arith.mulf %116, %117 : vector<8x96xf32>
    %119 = vector.broadcast %7 : vector<1x96xf32> to vector<8x96xf32>
    %120 = arith.addf %118, %119 : vector<8x96xf32>
    %121 = vector.extract_strided_slice %114 {offsets = [0, 1], sizes = [8, 1], strides = [1, 1]} : vector<8x4xf32> to vector<8x1xf32>
    %122 = vector.broadcast %121 : vector<8x1xf32> to vector<8x96xf32>
    %123 = vector.broadcast %5 : vector<1x96xf32> to vector<8x96xf32>
    %124 = arith.mulf %122, %123 : vector<8x96xf32>
    %125 = arith.addf %120, %124 : vector<8x96xf32>
    %126 = vector.extract_strided_slice %114 {offsets = [0, 2], sizes = [8, 1], strides = [1, 1]} : vector<8x4xf32> to vector<8x1xf32>
    %127 = vector.broadcast %126 : vector<8x1xf32> to vector<8x96xf32>
    %128 = vector.broadcast %6 : vector<1x96xf32> to vector<8x96xf32>
    %129 = arith.mulf %127, %128 : vector<8x96xf32>
    %130 = arith.addf %125, %129 : vector<8x96xf32>
    %cst_26 = arith.constant dense<0.000000e+00> : vector<8x96xf32>
    %131 = tpu.matmul %111, %3, %cst_26 {dimension_numbers = #tpu.dot_dimension_numbers<[1], [0], [0], [1], [0, 0, 1, 1], [], []>} : vector<8x32xf32>, vector<32x96xf32>, vector<8x96xf32> -> vector<8x96xf32>
    %132 = vector.broadcast %8 : vector<1x96xf32> to vector<8x96xf32>
    %133 = arith.addf %131, %132 : vector<8x96xf32>
    %134 = vector.extract_strided_slice %130 {offsets = [0, 0], sizes = [8, 64], strides = [1, 1]} : vector<8x96xf32> to vector<8x64xf32>
    %135 = vector.extract_strided_slice %133 {offsets = [0, 0], sizes = [8, 64], strides = [1, 1]} : vector<8x96xf32> to vector<8x64xf32>
    %136 = arith.addf %134, %135 : vector<8x64xf32>
    %137 = arith.negf %136 : vector<8x64xf32>
    %138 = math.exp %137 : vector<8x64xf32>
    %cst_27 = arith.constant 1.000000e+00 : f32
    %139 = vector.broadcast %cst_27 : f32 to vector<8x64xf32>
    %140 = arith.addf %139, %138 : vector<8x64xf32>
    %141 = arith.divf %139, %140 : vector<8x64xf32>
    %142 = vector.extract_strided_slice %141 {offsets = [0, 0], sizes = [8, 32], strides = [1, 1]} : vector<8x64xf32> to vector<8x32xf32>
    %143 = vector.extract_strided_slice %141 {offsets = [0, 32], sizes = [8, 32], strides = [1, 1]} : vector<8x64xf32> to vector<8x32xf32>
    %144 = vector.extract_strided_slice %130 {offsets = [0, 64], sizes = [8, 32], strides = [1, 1]} : vector<8x96xf32> to vector<8x32xf32>
    %145 = vector.extract_strided_slice %133 {offsets = [0, 64], sizes = [8, 32], strides = [1, 1]} : vector<8x96xf32> to vector<8x32xf32>
    %146 = arith.mulf %142, %145 : vector<8x32xf32>
    %147 = arith.addf %144, %146 : vector<8x32xf32>
    %148 = math.tanh %147 : vector<8x32xf32>
    %149 = arith.subf %111, %148 : vector<8x32xf32>
    %150 = arith.mulf %143, %149 : vector<8x32xf32>
    %151 = arith.addf %148, %150 : vector<8x32xf32>
    %152 = vector.extract_strided_slice %114 {offsets = [0, 3], sizes = [8, 1], strides = [1, 1]} : vector<8x4xf32> to vector<8x1xf32>
    %153 = vector.broadcast %152 : vector<8x1xf32> to vector<8x32xf32>
    %154 = arith.mulf %153, %151 : vector<8x32xf32>
    %155 = arith.index_cast %c2_i32 : i32 to index
    %c0_28 = arith.constant 0 : index
    %c0_29 = arith.constant 0 : index
    %156 = vector.load %arg11[%155, %c0_28, %c0_29] : memref<20x8x32xf32, #tpu.memory_space<vmem>>, vector<1x8x32xf32>
    %157 = vector.shape_cast %156 : vector<1x8x32xf32> to vector<8x32xf32>
    %158 = vector.shape_cast %154 : vector<8x32xf32> to vector<1x8x32xf32>
    tpu.vector_store %arg11[%155, %c0_28, %c0_29], %158 {strides = array<i32>} : memref<20x8x32xf32, #tpu.memory_space<vmem>>, vector<1x8x32xf32>,
    %159 = arith.subf %151, %111 : vector<8x32xf32>
    %160 = vector.broadcast %152 : vector<8x1xf32> to vector<8x32xf32>
    %161 = arith.mulf %160, %159 : vector<8x32xf32>
    %162 = arith.addf %111, %161 : vector<8x32xf32>
    %c3_i32 = arith.constant 3 : i32
    %163 = arith.index_cast %c3_i32 : i32 to index
    %c0_30 = arith.constant 0 : index
    %c0_31 = arith.constant 0 : index
    %164 = vector.load %arg1[%163, %c0_30, %c0_31] : memref<20x8x4xf32, #tpu.memory_space<vmem>>, vector<1x8x4xf32>
    %165 = vector.shape_cast %164 : vector<1x8x4xf32> to vector<8x4xf32>
    %166 = vector.extract_strided_slice %165 {offsets = [0, 0], sizes = [8, 1], strides = [1, 1]} : vector<8x4xf32> to vector<8x1xf32>
    %167 = vector.broadcast %166 : vector<8x1xf32> to vector<8x96xf32>
    %168 = vector.broadcast %4 : vector<1x96xf32> to vector<8x96xf32>
    %169 = arith.mulf %167, %168 : vector<8x96xf32>
    %170 = vector.broadcast %7 : vector<1x96xf32> to vector<8x96xf32>
    %171 = arith.addf %169, %170 : vector<8x96xf32>
    %172 = vector.extract_strided_slice %165 {offsets = [0, 1], sizes = [8, 1], strides = [1, 1]} : vector<8x4xf32> to vector<8x1xf32>
    %173 = vector.broadcast %172 : vector<8x1xf32> to vector<8x96xf32>
    %174 = vector.broadcast %5 : vector<1x96xf32> to vector<8x96xf32>
    %175 = arith.mulf %173, %174 : vector<8x96xf32>
    %176 = arith.addf %171, %175 : vector<8x96xf32>
    %177 = vector.extract_strided_slice %165 {offsets = [0, 2], sizes = [8, 1], strides = [1, 1]} : vector<8x4xf32> to vector<8x1xf32>
    %178 = vector.broadcast %177 : vector<8x1xf32> to vector<8x96xf32>
    %179 = vector.broadcast %6 : vector<1x96xf32> to vector<8x96xf32>
    %180 = arith.mulf %178, %179 : vector<8x96xf32>
    %181 = arith.addf %176, %180 : vector<8x96xf32>
    %cst_32 = arith.constant dense<0.000000e+00> : vector<8x96xf32>
    %182 = tpu.matmul %162, %3, %cst_32 {dimension_numbers = #tpu.dot_dimension_numbers<[1], [0], [0], [1], [0, 0, 1, 1], [], []>} : vector<8x32xf32>, vector<32x96xf32>, vector<8x96xf32> -> vector<8x96xf32>
    %183 = vector.broadcast %8 : vector<1x96xf32> to vector<8x96xf32>
    %184 = arith.addf %182, %183 : vector<8x96xf32>
    %185 = vector.extract_strided_slice %181 {offsets = [0, 0], sizes = [8, 64], strides = [1, 1]} : vector<8x96xf32> to vector<8x64xf32>
    %186 = vector.extract_strided_slice %184 {offsets = [0, 0], sizes = [8, 64], strides = [1, 1]} : vector<8x96xf32> to vector<8x64xf32>
    %187 = arith.addf %185, %186 : vector<8x64xf32>
    %188 = arith.negf %187 : vector<8x64xf32>
    %189 = math.exp %188 : vector<8x64xf32>
    %cst_33 = arith.constant 1.000000e+00 : f32
    %190 = vector.broadcast %cst_33 : f32 to vector<8x64xf32>
    %191 = arith.addf %190, %189 : vector<8x64xf32>
    %192 = arith.divf %190, %191 : vector<8x64xf32>
    %193 = vector.extract_strided_slice %192 {offsets = [0, 0], sizes = [8, 32], strides = [1, 1]} : vector<8x64xf32> to vector<8x32xf32>
    %194 = vector.extract_strided_slice %192 {offsets = [0, 32], sizes = [8, 32], strides = [1, 1]} : vector<8x64xf32> to vector<8x32xf32>
    %195 = vector.extract_strided_slice %181 {offsets = [0, 64], sizes = [8, 32], strides = [1, 1]} : vector<8x96xf32> to vector<8x32xf32>
    %196 = vector.extract_strided_slice %184 {offsets = [0, 64], sizes = [8, 32], strides = [1, 1]} : vector<8x96xf32> to vector<8x32xf32>
    %197 = arith.mulf %193, %196 : vector<8x32xf32>
    %198 = arith.addf %195, %197 : vector<8x32xf32>
    %199 = math.tanh %198 : vector<8x32xf32>
    %200 = arith.subf %162, %199 : vector<8x32xf32>
    %201 = arith.mulf %194, %200 : vector<8x32xf32>
    %202 = arith.addf %199, %201 : vector<8x32xf32>
    %203 = vector.extract_strided_slice %165 {offsets = [0, 3], sizes = [8, 1], strides = [1, 1]} : vector<8x4xf32> to vector<8x1xf32>
    %204 = vector.broadcast %203 : vector<8x1xf32> to vector<8x32xf32>
    %205 = arith.mulf %204, %202 : vector<8x32xf32>
    %206 = arith.index_cast %c3_i32 : i32 to index
    %c0_34 = arith.constant 0 : index
    %c0_35 = arith.constant 0 : index
    %207 = vector.load %arg11[%206, %c0_34, %c0_35] : memref<20x8x32xf32, #tpu.memory_space<vmem>>, vector<1x8x32xf32>
    %208 = vector.shape_cast %207 : vector<1x8x32xf32> to vector<8x32xf32>
    %209 = vector.shape_cast %205 : vector<8x32xf32> to vector<1x8x32xf32>
    tpu.vector_store %arg11[%206, %c0_34, %c0_35], %209 {strides = array<i32>} : memref<20x8x32xf32, #tpu.memory_space<vmem>>, vector<1x8x32xf32>,
    %210 = arith.subf %202, %162 : vector<8x32xf32>
    %211 = vector.broadcast %203 : vector<8x1xf32> to vector<8x32xf32>
    %212 = arith.mulf %211, %210 : vector<8x32xf32>
    %213 = arith.addf %162, %212 : vector<8x32xf32>
    %c4_i32 = arith.constant 4 : i32
    %214 = arith.index_cast %c4_i32 : i32 to index
    %c0_36 = arith.constant 0 : index
    %c0_37 = arith.constant 0 : index
    %215 = vector.load %arg1[%214, %c0_36, %c0_37] : memref<20x8x4xf32, #tpu.memory_space<vmem>>, vector<1x8x4xf32>
    %216 = vector.shape_cast %215 : vector<1x8x4xf32> to vector<8x4xf32>
    %217 = vector.extract_strided_slice %216 {offsets = [0, 0], sizes = [8, 1], strides = [1, 1]} : vector<8x4xf32> to vector<8x1xf32>
    %218 = vector.broadcast %217 : vector<8x1xf32> to vector<8x96xf32>
    %219 = vector.broadcast %4 : vector<1x96xf32> to vector<8x96xf32>
    %220 = arith.mulf %218, %219 : vector<8x96xf32>
    %221 = vector.broadcast %7 : vector<1x96xf32> to vector<8x96xf32>
    %222 = arith.addf %220, %221 : vector<8x96xf32>
    %223 = vector.extract_strided_slice %216 {offsets = [0, 1], sizes = [8, 1], strides = [1, 1]} : vector<8x4xf32> to vector<8x1xf32>
    %224 = vector.broadcast %223 : vector<8x1xf32> to vector<8x96xf32>
    %225 = vector.broadcast %5 : vector<1x96xf32> to vector<8x96xf32>
    %226 = arith.mulf %224, %225 : vector<8x96xf32>
    %227 = arith.addf %222, %226 : vector<8x96xf32>
    %228 = vector.extract_strided_slice %216 {offsets = [0, 2], sizes = [8, 1], strides = [1, 1]} : vector<8x4xf32> to vector<8x1xf32>
    %229 = vector.broadcast %228 : vector<8x1xf32> to vector<8x96xf32>
    %230 = vector.broadcast %6 : vector<1x96xf32> to vector<8x96xf32>
    %231 = arith.mulf %229, %230 : vector<8x96xf32>
    %232 = arith.addf %227, %231 : vector<8x96xf32>
    %cst_38 = arith.constant dense<0.000000e+00> : vector<8x96xf32>
    %233 = tpu.matmul %213, %3, %cst_38 {dimension_numbers = #tpu.dot_dimension_numbers<[1], [0], [0], [1], [0, 0, 1, 1], [], []>} : vector<8x32xf32>, vector<32x96xf32>, vector<8x96xf32> -> vector<8x96xf32>
    %234 = vector.broadcast %8 : vector<1x96xf32> to vector<8x96xf32>
    %235 = arith.addf %233, %234 : vector<8x96xf32>
    %236 = vector.extract_strided_slice %232 {offsets = [0, 0], sizes = [8, 64], strides = [1, 1]} : vector<8x96xf32> to vector<8x64xf32>
    %237 = vector.extract_strided_slice %235 {offsets = [0, 0], sizes = [8, 64], strides = [1, 1]} : vector<8x96xf32> to vector<8x64xf32>
    %238 = arith.addf %236, %237 : vector<8x64xf32>
    %239 = arith.negf %238 : vector<8x64xf32>
    %240 = math.exp %239 : vector<8x64xf32>
    %cst_39 = arith.constant 1.000000e+00 : f32
    %241 = vector.broadcast %cst_39 : f32 to vector<8x64xf32>
    %242 = arith.addf %241, %240 : vector<8x64xf32>
    %243 = arith.divf %241, %242 : vector<8x64xf32>
    %244 = vector.extract_strided_slice %243 {offsets = [0, 0], sizes = [8, 32], strides = [1, 1]} : vector<8x64xf32> to vector<8x32xf32>
    %245 = vector.extract_strided_slice %243 {offsets = [0, 32], sizes = [8, 32], strides = [1, 1]} : vector<8x64xf32> to vector<8x32xf32>
    %246 = vector.extract_strided_slice %232 {offsets = [0, 64], sizes = [8, 32], strides = [1, 1]} : vector<8x96xf32> to vector<8x32xf32>
    %247 = vector.extract_strided_slice %235 {offsets = [0, 64], sizes = [8, 32], strides = [1, 1]} : vector<8x96xf32> to vector<8x32xf32>
    %248 = arith.mulf %244, %247 : vector<8x32xf32>
    %249 = arith.addf %246, %248 : vector<8x32xf32>
    %250 = math.tanh %249 : vector<8x32xf32>
    %251 = arith.subf %213, %250 : vector<8x32xf32>
    %252 = arith.mulf %245, %251 : vector<8x32xf32>
    %253 = arith.addf %250, %252 : vector<8x32xf32>
    %254 = vector.extract_strided_slice %216 {offsets = [0, 3], sizes = [8, 1], strides = [1, 1]} : vector<8x4xf32> to vector<8x1xf32>
    %255 = vector.broadcast %254 : vector<8x1xf32> to vector<8x32xf32>
    %256 = arith.mulf %255, %253 : vector<8x32xf32>
    %257 = arith.index_cast %c4_i32 : i32 to index
    %c0_40 = arith.constant 0 : index
    %c0_41 = arith.constant 0 : index
    %258 = vector.load %arg11[%257, %c0_40, %c0_41] : memref<20x8x32xf32, #tpu.memory_space<vmem>>, vector<1x8x32xf32>
    %259 = vector.shape_cast %258 : vector<1x8x32xf32> to vector<8x32xf32>
    %260 = vector.shape_cast %256 : vector<8x32xf32> to vector<1x8x32xf32>
    tpu.vector_store %arg11[%257, %c0_40, %c0_41], %260 {strides = array<i32>} : memref<20x8x32xf32, #tpu.memory_space<vmem>>, vector<1x8x32xf32>,
    %261 = arith.subf %253, %213 : vector<8x32xf32>
    %262 = vector.broadcast %254 : vector<8x1xf32> to vector<8x32xf32>
    %263 = arith.mulf %262, %261 : vector<8x32xf32>
    %264 = arith.addf %213, %263 : vector<8x32xf32>
    %c5_i32 = arith.constant 5 : i32
    %265 = arith.index_cast %c5_i32 : i32 to index
    %c0_42 = arith.constant 0 : index
    %c0_43 = arith.constant 0 : index
    %266 = vector.load %arg1[%265, %c0_42, %c0_43] : memref<20x8x4xf32, #tpu.memory_space<vmem>>, vector<1x8x4xf32>
    %267 = vector.shape_cast %266 : vector<1x8x4xf32> to vector<8x4xf32>
    %268 = vector.extract_strided_slice %267 {offsets = [0, 0], sizes = [8, 1], strides = [1, 1]} : vector<8x4xf32> to vector<8x1xf32>
    %269 = vector.broadcast %268 : vector<8x1xf32> to vector<8x96xf32>
    %270 = vector.broadcast %4 : vector<1x96xf32> to vector<8x96xf32>
    %271 = arith.mulf %269, %270 : vector<8x96xf32>
    %272 = vector.broadcast %7 : vector<1x96xf32> to vector<8x96xf32>
    %273 = arith.addf %271, %272 : vector<8x96xf32>
    %274 = vector.extract_strided_slice %267 {offsets = [0, 1], sizes = [8, 1], strides = [1, 1]} : vector<8x4xf32> to vector<8x1xf32>
    %275 = vector.broadcast %274 : vector<8x1xf32> to vector<8x96xf32>
    %276 = vector.broadcast %5 : vector<1x96xf32> to vector<8x96xf32>
    %277 = arith.mulf %275, %276 : vector<8x96xf32>
    %278 = arith.addf %273, %277 : vector<8x96xf32>
    %279 = vector.extract_strided_slice %267 {offsets = [0, 2], sizes = [8, 1], strides = [1, 1]} : vector<8x4xf32> to vector<8x1xf32>
    %280 = vector.broadcast %279 : vector<8x1xf32> to vector<8x96xf32>
    %281 = vector.broadcast %6 : vector<1x96xf32> to vector<8x96xf32>
    %282 = arith.mulf %280, %281 : vector<8x96xf32>
    %283 = arith.addf %278, %282 : vector<8x96xf32>
    %cst_44 = arith.constant dense<0.000000e+00> : vector<8x96xf32>
    %284 = tpu.matmul %264, %3, %cst_44 {dimension_numbers = #tpu.dot_dimension_numbers<[1], [0], [0], [1], [0, 0, 1, 1], [], []>} : vector<8x32xf32>, vector<32x96xf32>, vector<8x96xf32> -> vector<8x96xf32>
    %285 = vector.broadcast %8 : vector<1x96xf32> to vector<8x96xf32>
    %286 = arith.addf %284, %285 : vector<8x96xf32>
    %287 = vector.extract_strided_slice %283 {offsets = [0, 0], sizes = [8, 64], strides = [1, 1]} : vector<8x96xf32> to vector<8x64xf32>
    %288 = vector.extract_strided_slice %286 {offsets = [0, 0], sizes = [8, 64], strides = [1, 1]} : vector<8x96xf32> to vector<8x64xf32>
    %289 = arith.addf %287, %288 : vector<8x64xf32>
    %290 = arith.negf %289 : vector<8x64xf32>
    %291 = math.exp %290 : vector<8x64xf32>
    %cst_45 = arith.constant 1.000000e+00 : f32
    %292 = vector.broadcast %cst_45 : f32 to vector<8x64xf32>
    %293 = arith.addf %292, %291 : vector<8x64xf32>
    %294 = arith.divf %292, %293 : vector<8x64xf32>
    %295 = vector.extract_strided_slice %294 {offsets = [0, 0], sizes = [8, 32], strides = [1, 1]} : vector<8x64xf32> to vector<8x32xf32>
    %296 = vector.extract_strided_slice %294 {offsets = [0, 32], sizes = [8, 32], strides = [1, 1]} : vector<8x64xf32> to vector<8x32xf32>
    %297 = vector.extract_strided_slice %283 {offsets = [0, 64], sizes = [8, 32], strides = [1, 1]} : vector<8x96xf32> to vector<8x32xf32>
    %298 = vector.extract_strided_slice %286 {offsets = [0, 64], sizes = [8, 32], strides = [1, 1]} : vector<8x96xf32> to vector<8x32xf32>
    %299 = arith.mulf %295, %298 : vector<8x32xf32>
    %300 = arith.addf %297, %299 : vector<8x32xf32>
    %301 = math.tanh %300 : vector<8x32xf32>
    %302 = arith.subf %264, %301 : vector<8x32xf32>
    %303 = arith.mulf %296, %302 : vector<8x32xf32>
    %304 = arith.addf %301, %303 : vector<8x32xf32>
    %305 = vector.extract_strided_slice %267 {offsets = [0, 3], sizes = [8, 1], strides = [1, 1]} : vector<8x4xf32> to vector<8x1xf32>
    %306 = vector.broadcast %305 : vector<8x1xf32> to vector<8x32xf32>
    %307 = arith.mulf %306, %304 : vector<8x32xf32>
    %308 = arith.index_cast %c5_i32 : i32 to index
    %c0_46 = arith.constant 0 : index
    %c0_47 = arith.constant 0 : index
    %309 = vector.load %arg11[%308, %c0_46, %c0_47] : memref<20x8x32xf32, #tpu.memory_space<vmem>>, vector<1x8x32xf32>
    %310 = vector.shape_cast %309 : vector<1x8x32xf32> to vector<8x32xf32>
    %311 = vector.shape_cast %307 : vector<8x32xf32> to vector<1x8x32xf32>
    tpu.vector_store %arg11[%308, %c0_46, %c0_47], %311 {strides = array<i32>} : memref<20x8x32xf32, #tpu.memory_space<vmem>>, vector<1x8x32xf32>,
    %312 = arith.subf %304, %264 : vector<8x32xf32>
    %313 = vector.broadcast %305 : vector<8x1xf32> to vector<8x32xf32>
    %314 = arith.mulf %313, %312 : vector<8x32xf32>
    %315 = arith.addf %264, %314 : vector<8x32xf32>
    %c6_i32 = arith.constant 6 : i32
    %316 = arith.index_cast %c6_i32 : i32 to index
    %c0_48 = arith.constant 0 : index
    %c0_49 = arith.constant 0 : index
    %317 = vector.load %arg1[%316, %c0_48, %c0_49] : memref<20x8x4xf32, #tpu.memory_space<vmem>>, vector<1x8x4xf32>
    %318 = vector.shape_cast %317 : vector<1x8x4xf32> to vector<8x4xf32>
    %319 = vector.extract_strided_slice %318 {offsets = [0, 0], sizes = [8, 1], strides = [1, 1]} : vector<8x4xf32> to vector<8x1xf32>
    %320 = vector.broadcast %319 : vector<8x1xf32> to vector<8x96xf32>
    %321 = vector.broadcast %4 : vector<1x96xf32> to vector<8x96xf32>
    %322 = arith.mulf %320, %321 : vector<8x96xf32>
    %323 = vector.broadcast %7 : vector<1x96xf32> to vector<8x96xf32>
    %324 = arith.addf %322, %323 : vector<8x96xf32>
    %325 = vector.extract_strided_slice %318 {offsets = [0, 1], sizes = [8, 1], strides = [1, 1]} : vector<8x4xf32> to vector<8x1xf32>
    %326 = vector.broadcast %325 : vector<8x1xf32> to vector<8x96xf32>
    %327 = vector.broadcast %5 : vector<1x96xf32> to vector<8x96xf32>
    %328 = arith.mulf %326, %327 : vector<8x96xf32>
    %329 = arith.addf %324, %328 : vector<8x96xf32>
    %330 = vector.extract_strided_slice %318 {offsets = [0, 2], sizes = [8, 1], strides = [1, 1]} : vector<8x4xf32> to vector<8x1xf32>
    %331 = vector.broadcast %330 : vector<8x1xf32> to vector<8x96xf32>
    %332 = vector.broadcast %6 : vector<1x96xf32> to vector<8x96xf32>
    %333 = arith.mulf %331, %332 : vector<8x96xf32>
    %334 = arith.addf %329, %333 : vector<8x96xf32>
    %cst_50 = arith.constant dense<0.000000e+00> : vector<8x96xf32>
    %335 = tpu.matmul %315, %3, %cst_50 {dimension_numbers = #tpu.dot_dimension_numbers<[1], [0], [0], [1], [0, 0, 1, 1], [], []>} : vector<8x32xf32>, vector<32x96xf32>, vector<8x96xf32> -> vector<8x96xf32>
    %336 = vector.broadcast %8 : vector<1x96xf32> to vector<8x96xf32>
    %337 = arith.addf %335, %336 : vector<8x96xf32>
    %338 = vector.extract_strided_slice %334 {offsets = [0, 0], sizes = [8, 64], strides = [1, 1]} : vector<8x96xf32> to vector<8x64xf32>
    %339 = vector.extract_strided_slice %337 {offsets = [0, 0], sizes = [8, 64], strides = [1, 1]} : vector<8x96xf32> to vector<8x64xf32>
    %340 = arith.addf %338, %339 : vector<8x64xf32>
    %341 = arith.negf %340 : vector<8x64xf32>
    %342 = math.exp %341 : vector<8x64xf32>
    %cst_51 = arith.constant 1.000000e+00 : f32
    %343 = vector.broadcast %cst_51 : f32 to vector<8x64xf32>
    %344 = arith.addf %343, %342 : vector<8x64xf32>
    %345 = arith.divf %343, %344 : vector<8x64xf32>
    %346 = vector.extract_strided_slice %345 {offsets = [0, 0], sizes = [8, 32], strides = [1, 1]} : vector<8x64xf32> to vector<8x32xf32>
    %347 = vector.extract_strided_slice %345 {offsets = [0, 32], sizes = [8, 32], strides = [1, 1]} : vector<8x64xf32> to vector<8x32xf32>
    %348 = vector.extract_strided_slice %334 {offsets = [0, 64], sizes = [8, 32], strides = [1, 1]} : vector<8x96xf32> to vector<8x32xf32>
    %349 = vector.extract_strided_slice %337 {offsets = [0, 64], sizes = [8, 32], strides = [1, 1]} : vector<8x96xf32> to vector<8x32xf32>
    %350 = arith.mulf %346, %349 : vector<8x32xf32>
    %351 = arith.addf %348, %350 : vector<8x32xf32>
    %352 = math.tanh %351 : vector<8x32xf32>
    %353 = arith.subf %315, %352 : vector<8x32xf32>
    %354 = arith.mulf %347, %353 : vector<8x32xf32>
    %355 = arith.addf %352, %354 : vector<8x32xf32>
    %356 = vector.extract_strided_slice %318 {offsets = [0, 3], sizes = [8, 1], strides = [1, 1]} : vector<8x4xf32> to vector<8x1xf32>
    %357 = vector.broadcast %356 : vector<8x1xf32> to vector<8x32xf32>
    %358 = arith.mulf %357, %355 : vector<8x32xf32>
    %359 = arith.index_cast %c6_i32 : i32 to index
    %c0_52 = arith.constant 0 : index
    %c0_53 = arith.constant 0 : index
    %360 = vector.load %arg11[%359, %c0_52, %c0_53] : memref<20x8x32xf32, #tpu.memory_space<vmem>>, vector<1x8x32xf32>
    %361 = vector.shape_cast %360 : vector<1x8x32xf32> to vector<8x32xf32>
    %362 = vector.shape_cast %358 : vector<8x32xf32> to vector<1x8x32xf32>
    tpu.vector_store %arg11[%359, %c0_52, %c0_53], %362 {strides = array<i32>} : memref<20x8x32xf32, #tpu.memory_space<vmem>>, vector<1x8x32xf32>,
    %363 = arith.subf %355, %315 : vector<8x32xf32>
    %364 = vector.broadcast %356 : vector<8x1xf32> to vector<8x32xf32>
    %365 = arith.mulf %364, %363 : vector<8x32xf32>
    %366 = arith.addf %315, %365 : vector<8x32xf32>
    %c7_i32 = arith.constant 7 : i32
    %367 = arith.index_cast %c7_i32 : i32 to index
    %c0_54 = arith.constant 0 : index
    %c0_55 = arith.constant 0 : index
    %368 = vector.load %arg1[%367, %c0_54, %c0_55] : memref<20x8x4xf32, #tpu.memory_space<vmem>>, vector<1x8x4xf32>
    %369 = vector.shape_cast %368 : vector<1x8x4xf32> to vector<8x4xf32>
    %370 = vector.extract_strided_slice %369 {offsets = [0, 0], sizes = [8, 1], strides = [1, 1]} : vector<8x4xf32> to vector<8x1xf32>
    %371 = vector.broadcast %370 : vector<8x1xf32> to vector<8x96xf32>
    %372 = vector.broadcast %4 : vector<1x96xf32> to vector<8x96xf32>
    %373 = arith.mulf %371, %372 : vector<8x96xf32>
    %374 = vector.broadcast %7 : vector<1x96xf32> to vector<8x96xf32>
    %375 = arith.addf %373, %374 : vector<8x96xf32>
    %376 = vector.extract_strided_slice %369 {offsets = [0, 1], sizes = [8, 1], strides = [1, 1]} : vector<8x4xf32> to vector<8x1xf32>
    %377 = vector.broadcast %376 : vector<8x1xf32> to vector<8x96xf32>
    %378 = vector.broadcast %5 : vector<1x96xf32> to vector<8x96xf32>
    %379 = arith.mulf %377, %378 : vector<8x96xf32>
    %380 = arith.addf %375, %379 : vector<8x96xf32>
    %381 = vector.extract_strided_slice %369 {offsets = [0, 2], sizes = [8, 1], strides = [1, 1]} : vector<8x4xf32> to vector<8x1xf32>
    %382 = vector.broadcast %381 : vector<8x1xf32> to vector<8x96xf32>
    %383 = vector.broadcast %6 : vector<1x96xf32> to vector<8x96xf32>
    %384 = arith.mulf %382, %383 : vector<8x96xf32>
    %385 = arith.addf %380, %384 : vector<8x96xf32>
    %cst_56 = arith.constant dense<0.000000e+00> : vector<8x96xf32>
    %386 = tpu.matmul %366, %3, %cst_56 {dimension_numbers = #tpu.dot_dimension_numbers<[1], [0], [0], [1], [0, 0, 1, 1], [], []>} : vector<8x32xf32>, vector<32x96xf32>, vector<8x96xf32> -> vector<8x96xf32>
    %387 = vector.broadcast %8 : vector<1x96xf32> to vector<8x96xf32>
    %388 = arith.addf %386, %387 : vector<8x96xf32>
    %389 = vector.extract_strided_slice %385 {offsets = [0, 0], sizes = [8, 64], strides = [1, 1]} : vector<8x96xf32> to vector<8x64xf32>
    %390 = vector.extract_strided_slice %388 {offsets = [0, 0], sizes = [8, 64], strides = [1, 1]} : vector<8x96xf32> to vector<8x64xf32>
    %391 = arith.addf %389, %390 : vector<8x64xf32>
    %392 = arith.negf %391 : vector<8x64xf32>
    %393 = math.exp %392 : vector<8x64xf32>
    %cst_57 = arith.constant 1.000000e+00 : f32
    %394 = vector.broadcast %cst_57 : f32 to vector<8x64xf32>
    %395 = arith.addf %394, %393 : vector<8x64xf32>
    %396 = arith.divf %394, %395 : vector<8x64xf32>
    %397 = vector.extract_strided_slice %396 {offsets = [0, 0], sizes = [8, 32], strides = [1, 1]} : vector<8x64xf32> to vector<8x32xf32>
    %398 = vector.extract_strided_slice %396 {offsets = [0, 32], sizes = [8, 32], strides = [1, 1]} : vector<8x64xf32> to vector<8x32xf32>
    %399 = vector.extract_strided_slice %385 {offsets = [0, 64], sizes = [8, 32], strides = [1, 1]} : vector<8x96xf32> to vector<8x32xf32>
    %400 = vector.extract_strided_slice %388 {offsets = [0, 64], sizes = [8, 32], strides = [1, 1]} : vector<8x96xf32> to vector<8x32xf32>
    %401 = arith.mulf %397, %400 : vector<8x32xf32>
    %402 = arith.addf %399, %401 : vector<8x32xf32>
    %403 = math.tanh %402 : vector<8x32xf32>
    %404 = arith.subf %366, %403 : vector<8x32xf32>
    %405 = arith.mulf %398, %404 : vector<8x32xf32>
    %406 = arith.addf %403, %405 : vector<8x32xf32>
    %407 = vector.extract_strided_slice %369 {offsets = [0, 3], sizes = [8, 1], strides = [1, 1]} : vector<8x4xf32> to vector<8x1xf32>
    %408 = vector.broadcast %407 : vector<8x1xf32> to vector<8x32xf32>
    %409 = arith.mulf %408, %406 : vector<8x32xf32>
    %410 = arith.index_cast %c7_i32 : i32 to index
    %c0_58 = arith.constant 0 : index
    %c0_59 = arith.constant 0 : index
    %411 = vector.load %arg11[%410, %c0_58, %c0_59] : memref<20x8x32xf32, #tpu.memory_space<vmem>>, vector<1x8x32xf32>
    %412 = vector.shape_cast %411 : vector<1x8x32xf32> to vector<8x32xf32>
    %413 = vector.shape_cast %409 : vector<8x32xf32> to vector<1x8x32xf32>
    tpu.vector_store %arg11[%410, %c0_58, %c0_59], %413 {strides = array<i32>} : memref<20x8x32xf32, #tpu.memory_space<vmem>>, vector<1x8x32xf32>,
    %414 = arith.subf %406, %366 : vector<8x32xf32>
    %415 = vector.broadcast %407 : vector<8x1xf32> to vector<8x32xf32>
    %416 = arith.mulf %415, %414 : vector<8x32xf32>
    %417 = arith.addf %366, %416 : vector<8x32xf32>
    %c8_i32 = arith.constant 8 : i32
    %418 = arith.index_cast %c8_i32 : i32 to index
    %c0_60 = arith.constant 0 : index
    %c0_61 = arith.constant 0 : index
    %419 = vector.load %arg1[%418, %c0_60, %c0_61] : memref<20x8x4xf32, #tpu.memory_space<vmem>>, vector<1x8x4xf32>
    %420 = vector.shape_cast %419 : vector<1x8x4xf32> to vector<8x4xf32>
    %421 = vector.extract_strided_slice %420 {offsets = [0, 0], sizes = [8, 1], strides = [1, 1]} : vector<8x4xf32> to vector<8x1xf32>
    %422 = vector.broadcast %421 : vector<8x1xf32> to vector<8x96xf32>
    %423 = vector.broadcast %4 : vector<1x96xf32> to vector<8x96xf32>
    %424 = arith.mulf %422, %423 : vector<8x96xf32>
    %425 = vector.broadcast %7 : vector<1x96xf32> to vector<8x96xf32>
    %426 = arith.addf %424, %425 : vector<8x96xf32>
    %427 = vector.extract_strided_slice %420 {offsets = [0, 1], sizes = [8, 1], strides = [1, 1]} : vector<8x4xf32> to vector<8x1xf32>
    %428 = vector.broadcast %427 : vector<8x1xf32> to vector<8x96xf32>
    %429 = vector.broadcast %5 : vector<1x96xf32> to vector<8x96xf32>
    %430 = arith.mulf %428, %429 : vector<8x96xf32>
    %431 = arith.addf %426, %430 : vector<8x96xf32>
    %432 = vector.extract_strided_slice %420 {offsets = [0, 2], sizes = [8, 1], strides = [1, 1]} : vector<8x4xf32> to vector<8x1xf32>
    %433 = vector.broadcast %432 : vector<8x1xf32> to vector<8x96xf32>
    %434 = vector.broadcast %6 : vector<1x96xf32> to vector<8x96xf32>
    %435 = arith.mulf %433, %434 : vector<8x96xf32>
    %436 = arith.addf %431, %435 : vector<8x96xf32>
    %cst_62 = arith.constant dense<0.000000e+00> : vector<8x96xf32>
    %437 = tpu.matmul %417, %3, %cst_62 {dimension_numbers = #tpu.dot_dimension_numbers<[1], [0], [0], [1], [0, 0, 1, 1], [], []>} : vector<8x32xf32>, vector<32x96xf32>, vector<8x96xf32> -> vector<8x96xf32>
    %438 = vector.broadcast %8 : vector<1x96xf32> to vector<8x96xf32>
    %439 = arith.addf %437, %438 : vector<8x96xf32>
    %440 = vector.extract_strided_slice %436 {offsets = [0, 0], sizes = [8, 64], strides = [1, 1]} : vector<8x96xf32> to vector<8x64xf32>
    %441 = vector.extract_strided_slice %439 {offsets = [0, 0], sizes = [8, 64], strides = [1, 1]} : vector<8x96xf32> to vector<8x64xf32>
    %442 = arith.addf %440, %441 : vector<8x64xf32>
    %443 = arith.negf %442 : vector<8x64xf32>
    %444 = math.exp %443 : vector<8x64xf32>
    %cst_63 = arith.constant 1.000000e+00 : f32
    %445 = vector.broadcast %cst_63 : f32 to vector<8x64xf32>
    %446 = arith.addf %445, %444 : vector<8x64xf32>
    %447 = arith.divf %445, %446 : vector<8x64xf32>
    %448 = vector.extract_strided_slice %447 {offsets = [0, 0], sizes = [8, 32], strides = [1, 1]} : vector<8x64xf32> to vector<8x32xf32>
    %449 = vector.extract_strided_slice %447 {offsets = [0, 32], sizes = [8, 32], strides = [1, 1]} : vector<8x64xf32> to vector<8x32xf32>
    %450 = vector.extract_strided_slice %436 {offsets = [0, 64], sizes = [8, 32], strides = [1, 1]} : vector<8x96xf32> to vector<8x32xf32>
    %451 = vector.extract_strided_slice %439 {offsets = [0, 64], sizes = [8, 32], strides = [1, 1]} : vector<8x96xf32> to vector<8x32xf32>
    %452 = arith.mulf %448, %451 : vector<8x32xf32>
    %453 = arith.addf %450, %452 : vector<8x32xf32>
    %454 = math.tanh %453 : vector<8x32xf32>
    %455 = arith.subf %417, %454 : vector<8x32xf32>
    %456 = arith.mulf %449, %455 : vector<8x32xf32>
    %457 = arith.addf %454, %456 : vector<8x32xf32>
    %458 = vector.extract_strided_slice %420 {offsets = [0, 3], sizes = [8, 1], strides = [1, 1]} : vector<8x4xf32> to vector<8x1xf32>
    %459 = vector.broadcast %458 : vector<8x1xf32> to vector<8x32xf32>
    %460 = arith.mulf %459, %457 : vector<8x32xf32>
    %461 = arith.index_cast %c8_i32 : i32 to index
    %c0_64 = arith.constant 0 : index
    %c0_65 = arith.constant 0 : index
    %462 = vector.load %arg11[%461, %c0_64, %c0_65] : memref<20x8x32xf32, #tpu.memory_space<vmem>>, vector<1x8x32xf32>
    %463 = vector.shape_cast %462 : vector<1x8x32xf32> to vector<8x32xf32>
    %464 = vector.shape_cast %460 : vector<8x32xf32> to vector<1x8x32xf32>
    tpu.vector_store %arg11[%461, %c0_64, %c0_65], %464 {strides = array<i32>} : memref<20x8x32xf32, #tpu.memory_space<vmem>>, vector<1x8x32xf32>,
    %465 = arith.subf %457, %417 : vector<8x32xf32>
    %466 = vector.broadcast %458 : vector<8x1xf32> to vector<8x32xf32>
    %467 = arith.mulf %466, %465 : vector<8x32xf32>
    %468 = arith.addf %417, %467 : vector<8x32xf32>
    %c9_i32 = arith.constant 9 : i32
    %469 = arith.index_cast %c9_i32 : i32 to index
    %c0_66 = arith.constant 0 : index
    %c0_67 = arith.constant 0 : index
    %470 = vector.load %arg1[%469, %c0_66, %c0_67] : memref<20x8x4xf32, #tpu.memory_space<vmem>>, vector<1x8x4xf32>
    %471 = vector.shape_cast %470 : vector<1x8x4xf32> to vector<8x4xf32>
    %472 = vector.extract_strided_slice %471 {offsets = [0, 0], sizes = [8, 1], strides = [1, 1]} : vector<8x4xf32> to vector<8x1xf32>
    %473 = vector.broadcast %472 : vector<8x1xf32> to vector<8x96xf32>
    %474 = vector.broadcast %4 : vector<1x96xf32> to vector<8x96xf32>
    %475 = arith.mulf %473, %474 : vector<8x96xf32>
    %476 = vector.broadcast %7 : vector<1x96xf32> to vector<8x96xf32>
    %477 = arith.addf %475, %476 : vector<8x96xf32>
    %478 = vector.extract_strided_slice %471 {offsets = [0, 1], sizes = [8, 1], strides = [1, 1]} : vector<8x4xf32> to vector<8x1xf32>
    %479 = vector.broadcast %478 : vector<8x1xf32> to vector<8x96xf32>
    %480 = vector.broadcast %5 : vector<1x96xf32> to vector<8x96xf32>
    %481 = arith.mulf %479, %480 : vector<8x96xf32>
    %482 = arith.addf %477, %481 : vector<8x96xf32>
    %483 = vector.extract_strided_slice %471 {offsets = [0, 2], sizes = [8, 1], strides = [1, 1]} : vector<8x4xf32> to vector<8x1xf32>
    %484 = vector.broadcast %483 : vector<8x1xf32> to vector<8x96xf32>
    %485 = vector.broadcast %6 : vector<1x96xf32> to vector<8x96xf32>
    %486 = arith.mulf %484, %485 : vector<8x96xf32>
    %487 = arith.addf %482, %486 : vector<8x96xf32>
    %cst_68 = arith.constant dense<0.000000e+00> : vector<8x96xf32>
    %488 = tpu.matmul %468, %3, %cst_68 {dimension_numbers = #tpu.dot_dimension_numbers<[1], [0], [0], [1], [0, 0, 1, 1], [], []>} : vector<8x32xf32>, vector<32x96xf32>, vector<8x96xf32> -> vector<8x96xf32>
    %489 = vector.broadcast %8 : vector<1x96xf32> to vector<8x96xf32>
    %490 = arith.addf %488, %489 : vector<8x96xf32>
    %491 = vector.extract_strided_slice %487 {offsets = [0, 0], sizes = [8, 64], strides = [1, 1]} : vector<8x96xf32> to vector<8x64xf32>
    %492 = vector.extract_strided_slice %490 {offsets = [0, 0], sizes = [8, 64], strides = [1, 1]} : vector<8x96xf32> to vector<8x64xf32>
    %493 = arith.addf %491, %492 : vector<8x64xf32>
    %494 = arith.negf %493 : vector<8x64xf32>
    %495 = math.exp %494 : vector<8x64xf32>
    %cst_69 = arith.constant 1.000000e+00 : f32
    %496 = vector.broadcast %cst_69 : f32 to vector<8x64xf32>
    %497 = arith.addf %496, %495 : vector<8x64xf32>
    %498 = arith.divf %496, %497 : vector<8x64xf32>
    %499 = vector.extract_strided_slice %498 {offsets = [0, 0], sizes = [8, 32], strides = [1, 1]} : vector<8x64xf32> to vector<8x32xf32>
    %500 = vector.extract_strided_slice %498 {offsets = [0, 32], sizes = [8, 32], strides = [1, 1]} : vector<8x64xf32> to vector<8x32xf32>
    %501 = vector.extract_strided_slice %487 {offsets = [0, 64], sizes = [8, 32], strides = [1, 1]} : vector<8x96xf32> to vector<8x32xf32>
    %502 = vector.extract_strided_slice %490 {offsets = [0, 64], sizes = [8, 32], strides = [1, 1]} : vector<8x96xf32> to vector<8x32xf32>
    %503 = arith.mulf %499, %502 : vector<8x32xf32>
    %504 = arith.addf %501, %503 : vector<8x32xf32>
    %505 = math.tanh %504 : vector<8x32xf32>
    %506 = arith.subf %468, %505 : vector<8x32xf32>
    %507 = arith.mulf %500, %506 : vector<8x32xf32>
    %508 = arith.addf %505, %507 : vector<8x32xf32>
    %509 = vector.extract_strided_slice %471 {offsets = [0, 3], sizes = [8, 1], strides = [1, 1]} : vector<8x4xf32> to vector<8x1xf32>
    %510 = vector.broadcast %509 : vector<8x1xf32> to vector<8x32xf32>
    %511 = arith.mulf %510, %508 : vector<8x32xf32>
    %512 = arith.index_cast %c9_i32 : i32 to index
    %c0_70 = arith.constant 0 : index
    %c0_71 = arith.constant 0 : index
    %513 = vector.load %arg11[%512, %c0_70, %c0_71] : memref<20x8x32xf32, #tpu.memory_space<vmem>>, vector<1x8x32xf32>
    %514 = vector.shape_cast %513 : vector<1x8x32xf32> to vector<8x32xf32>
    %515 = vector.shape_cast %511 : vector<8x32xf32> to vector<1x8x32xf32>
    tpu.vector_store %arg11[%512, %c0_70, %c0_71], %515 {strides = array<i32>} : memref<20x8x32xf32, #tpu.memory_space<vmem>>, vector<1x8x32xf32>,
    %516 = arith.subf %508, %468 : vector<8x32xf32>
    %517 = vector.broadcast %509 : vector<8x1xf32> to vector<8x32xf32>
    %518 = arith.mulf %517, %516 : vector<8x32xf32>
    %519 = arith.addf %468, %518 : vector<8x32xf32>
    %c10_i32 = arith.constant 10 : i32
    %520 = arith.index_cast %c10_i32 : i32 to index
    %c0_72 = arith.constant 0 : index
    %c0_73 = arith.constant 0 : index
    %521 = vector.load %arg1[%520, %c0_72, %c0_73] : memref<20x8x4xf32, #tpu.memory_space<vmem>>, vector<1x8x4xf32>
    %522 = vector.shape_cast %521 : vector<1x8x4xf32> to vector<8x4xf32>
    %523 = vector.extract_strided_slice %522 {offsets = [0, 0], sizes = [8, 1], strides = [1, 1]} : vector<8x4xf32> to vector<8x1xf32>
    %524 = vector.broadcast %523 : vector<8x1xf32> to vector<8x96xf32>
    %525 = vector.broadcast %4 : vector<1x96xf32> to vector<8x96xf32>
    %526 = arith.mulf %524, %525 : vector<8x96xf32>
    %527 = vector.broadcast %7 : vector<1x96xf32> to vector<8x96xf32>
    %528 = arith.addf %526, %527 : vector<8x96xf32>
    %529 = vector.extract_strided_slice %522 {offsets = [0, 1], sizes = [8, 1], strides = [1, 1]} : vector<8x4xf32> to vector<8x1xf32>
    %530 = vector.broadcast %529 : vector<8x1xf32> to vector<8x96xf32>
    %531 = vector.broadcast %5 : vector<1x96xf32> to vector<8x96xf32>
    %532 = arith.mulf %530, %531 : vector<8x96xf32>
    %533 = arith.addf %528, %532 : vector<8x96xf32>
    %534 = vector.extract_strided_slice %522 {offsets = [0, 2], sizes = [8, 1], strides = [1, 1]} : vector<8x4xf32> to vector<8x1xf32>
    %535 = vector.broadcast %534 : vector<8x1xf32> to vector<8x96xf32>
    %536 = vector.broadcast %6 : vector<1x96xf32> to vector<8x96xf32>
    %537 = arith.mulf %535, %536 : vector<8x96xf32>
    %538 = arith.addf %533, %537 : vector<8x96xf32>
    %cst_74 = arith.constant dense<0.000000e+00> : vector<8x96xf32>
    %539 = tpu.matmul %519, %3, %cst_74 {dimension_numbers = #tpu.dot_dimension_numbers<[1], [0], [0], [1], [0, 0, 1, 1], [], []>} : vector<8x32xf32>, vector<32x96xf32>, vector<8x96xf32> -> vector<8x96xf32>
    %540 = vector.broadcast %8 : vector<1x96xf32> to vector<8x96xf32>
    %541 = arith.addf %539, %540 : vector<8x96xf32>
    %542 = vector.extract_strided_slice %538 {offsets = [0, 0], sizes = [8, 64], strides = [1, 1]} : vector<8x96xf32> to vector<8x64xf32>
    %543 = vector.extract_strided_slice %541 {offsets = [0, 0], sizes = [8, 64], strides = [1, 1]} : vector<8x96xf32> to vector<8x64xf32>
    %544 = arith.addf %542, %543 : vector<8x64xf32>
    %545 = arith.negf %544 : vector<8x64xf32>
    %546 = math.exp %545 : vector<8x64xf32>
    %cst_75 = arith.constant 1.000000e+00 : f32
    %547 = vector.broadcast %cst_75 : f32 to vector<8x64xf32>
    %548 = arith.addf %547, %546 : vector<8x64xf32>
    %549 = arith.divf %547, %548 : vector<8x64xf32>
    %550 = vector.extract_strided_slice %549 {offsets = [0, 0], sizes = [8, 32], strides = [1, 1]} : vector<8x64xf32> to vector<8x32xf32>
    %551 = vector.extract_strided_slice %549 {offsets = [0, 32], sizes = [8, 32], strides = [1, 1]} : vector<8x64xf32> to vector<8x32xf32>
    %552 = vector.extract_strided_slice %538 {offsets = [0, 64], sizes = [8, 32], strides = [1, 1]} : vector<8x96xf32> to vector<8x32xf32>
    %553 = vector.extract_strided_slice %541 {offsets = [0, 64], sizes = [8, 32], strides = [1, 1]} : vector<8x96xf32> to vector<8x32xf32>
    %554 = arith.mulf %550, %553 : vector<8x32xf32>
    %555 = arith.addf %552, %554 : vector<8x32xf32>
    %556 = math.tanh %555 : vector<8x32xf32>
    %557 = arith.subf %519, %556 : vector<8x32xf32>
    %558 = arith.mulf %551, %557 : vector<8x32xf32>
    %559 = arith.addf %556, %558 : vector<8x32xf32>
    %560 = vector.extract_strided_slice %522 {offsets = [0, 3], sizes = [8, 1], strides = [1, 1]} : vector<8x4xf32> to vector<8x1xf32>
    %561 = vector.broadcast %560 : vector<8x1xf32> to vector<8x32xf32>
    %562 = arith.mulf %561, %559 : vector<8x32xf32>
    %563 = arith.index_cast %c10_i32 : i32 to index
    %c0_76 = arith.constant 0 : index
    %c0_77 = arith.constant 0 : index
    %564 = vector.load %arg11[%563, %c0_76, %c0_77] : memref<20x8x32xf32, #tpu.memory_space<vmem>>, vector<1x8x32xf32>
    %565 = vector.shape_cast %564 : vector<1x8x32xf32> to vector<8x32xf32>
    %566 = vector.shape_cast %562 : vector<8x32xf32> to vector<1x8x32xf32>
    tpu.vector_store %arg11[%563, %c0_76, %c0_77], %566 {strides = array<i32>} : memref<20x8x32xf32, #tpu.memory_space<vmem>>, vector<1x8x32xf32>,
    %567 = arith.subf %559, %519 : vector<8x32xf32>
    %568 = vector.broadcast %560 : vector<8x1xf32> to vector<8x32xf32>
    %569 = arith.mulf %568, %567 : vector<8x32xf32>
    %570 = arith.addf %519, %569 : vector<8x32xf32>
    %c11_i32 = arith.constant 11 : i32
    %571 = arith.index_cast %c11_i32 : i32 to index
    %c0_78 = arith.constant 0 : index
    %c0_79 = arith.constant 0 : index
    %572 = vector.load %arg1[%571, %c0_78, %c0_79] : memref<20x8x4xf32, #tpu.memory_space<vmem>>, vector<1x8x4xf32>
    %573 = vector.shape_cast %572 : vector<1x8x4xf32> to vector<8x4xf32>
    %574 = vector.extract_strided_slice %573 {offsets = [0, 0], sizes = [8, 1], strides = [1, 1]} : vector<8x4xf32> to vector<8x1xf32>
    %575 = vector.broadcast %574 : vector<8x1xf32> to vector<8x96xf32>
    %576 = vector.broadcast %4 : vector<1x96xf32> to vector<8x96xf32>
    %577 = arith.mulf %575, %576 : vector<8x96xf32>
    %578 = vector.broadcast %7 : vector<1x96xf32> to vector<8x96xf32>
    %579 = arith.addf %577, %578 : vector<8x96xf32>
    %580 = vector.extract_strided_slice %573 {offsets = [0, 1], sizes = [8, 1], strides = [1, 1]} : vector<8x4xf32> to vector<8x1xf32>
    %581 = vector.broadcast %580 : vector<8x1xf32> to vector<8x96xf32>
    %582 = vector.broadcast %5 : vector<1x96xf32> to vector<8x96xf32>
    %583 = arith.mulf %581, %582 : vector<8x96xf32>
    %584 = arith.addf %579, %583 : vector<8x96xf32>
    %585 = vector.extract_strided_slice %573 {offsets = [0, 2], sizes = [8, 1], strides = [1, 1]} : vector<8x4xf32> to vector<8x1xf32>
    %586 = vector.broadcast %585 : vector<8x1xf32> to vector<8x96xf32>
    %587 = vector.broadcast %6 : vector<1x96xf32> to vector<8x96xf32>
    %588 = arith.mulf %586, %587 : vector<8x96xf32>
    %589 = arith.addf %584, %588 : vector<8x96xf32>
    %cst_80 = arith.constant dense<0.000000e+00> : vector<8x96xf32>
    %590 = tpu.matmul %570, %3, %cst_80 {dimension_numbers = #tpu.dot_dimension_numbers<[1], [0], [0], [1], [0, 0, 1, 1], [], []>} : vector<8x32xf32>, vector<32x96xf32>, vector<8x96xf32> -> vector<8x96xf32>
    %591 = vector.broadcast %8 : vector<1x96xf32> to vector<8x96xf32>
    %592 = arith.addf %590, %591 : vector<8x96xf32>
    %593 = vector.extract_strided_slice %589 {offsets = [0, 0], sizes = [8, 64], strides = [1, 1]} : vector<8x96xf32> to vector<8x64xf32>
    %594 = vector.extract_strided_slice %592 {offsets = [0, 0], sizes = [8, 64], strides = [1, 1]} : vector<8x96xf32> to vector<8x64xf32>
    %595 = arith.addf %593, %594 : vector<8x64xf32>
    %596 = arith.negf %595 : vector<8x64xf32>
    %597 = math.exp %596 : vector<8x64xf32>
    %cst_81 = arith.constant 1.000000e+00 : f32
    %598 = vector.broadcast %cst_81 : f32 to vector<8x64xf32>
    %599 = arith.addf %598, %597 : vector<8x64xf32>
    %600 = arith.divf %598, %599 : vector<8x64xf32>
    %601 = vector.extract_strided_slice %600 {offsets = [0, 0], sizes = [8, 32], strides = [1, 1]} : vector<8x64xf32> to vector<8x32xf32>
    %602 = vector.extract_strided_slice %600 {offsets = [0, 32], sizes = [8, 32], strides = [1, 1]} : vector<8x64xf32> to vector<8x32xf32>
    %603 = vector.extract_strided_slice %589 {offsets = [0, 64], sizes = [8, 32], strides = [1, 1]} : vector<8x96xf32> to vector<8x32xf32>
    %604 = vector.extract_strided_slice %592 {offsets = [0, 64], sizes = [8, 32], strides = [1, 1]} : vector<8x96xf32> to vector<8x32xf32>
    %605 = arith.mulf %601, %604 : vector<8x32xf32>
    %606 = arith.addf %603, %605 : vector<8x32xf32>
    %607 = math.tanh %606 : vector<8x32xf32>
    %608 = arith.subf %570, %607 : vector<8x32xf32>
    %609 = arith.mulf %602, %608 : vector<8x32xf32>
    %610 = arith.addf %607, %609 : vector<8x32xf32>
    %611 = vector.extract_strided_slice %573 {offsets = [0, 3], sizes = [8, 1], strides = [1, 1]} : vector<8x4xf32> to vector<8x1xf32>
    %612 = vector.broadcast %611 : vector<8x1xf32> to vector<8x32xf32>
    %613 = arith.mulf %612, %610 : vector<8x32xf32>
    %614 = arith.index_cast %c11_i32 : i32 to index
    %c0_82 = arith.constant 0 : index
    %c0_83 = arith.constant 0 : index
    %615 = vector.load %arg11[%614, %c0_82, %c0_83] : memref<20x8x32xf32, #tpu.memory_space<vmem>>, vector<1x8x32xf32>
    %616 = vector.shape_cast %615 : vector<1x8x32xf32> to vector<8x32xf32>
    %617 = vector.shape_cast %613 : vector<8x32xf32> to vector<1x8x32xf32>
    tpu.vector_store %arg11[%614, %c0_82, %c0_83], %617 {strides = array<i32>} : memref<20x8x32xf32, #tpu.memory_space<vmem>>, vector<1x8x32xf32>,
    %618 = arith.subf %610, %570 : vector<8x32xf32>
    %619 = vector.broadcast %611 : vector<8x1xf32> to vector<8x32xf32>
    %620 = arith.mulf %619, %618 : vector<8x32xf32>
    %621 = arith.addf %570, %620 : vector<8x32xf32>
    %c12_i32 = arith.constant 12 : i32
    %622 = arith.index_cast %c12_i32 : i32 to index
    %c0_84 = arith.constant 0 : index
    %c0_85 = arith.constant 0 : index
    %623 = vector.load %arg1[%622, %c0_84, %c0_85] : memref<20x8x4xf32, #tpu.memory_space<vmem>>, vector<1x8x4xf32>
    %624 = vector.shape_cast %623 : vector<1x8x4xf32> to vector<8x4xf32>
    %625 = vector.extract_strided_slice %624 {offsets = [0, 0], sizes = [8, 1], strides = [1, 1]} : vector<8x4xf32> to vector<8x1xf32>
    %626 = vector.broadcast %625 : vector<8x1xf32> to vector<8x96xf32>
    %627 = vector.broadcast %4 : vector<1x96xf32> to vector<8x96xf32>
    %628 = arith.mulf %626, %627 : vector<8x96xf32>
    %629 = vector.broadcast %7 : vector<1x96xf32> to vector<8x96xf32>
    %630 = arith.addf %628, %629 : vector<8x96xf32>
    %631 = vector.extract_strided_slice %624 {offsets = [0, 1], sizes = [8, 1], strides = [1, 1]} : vector<8x4xf32> to vector<8x1xf32>
    %632 = vector.broadcast %631 : vector<8x1xf32> to vector<8x96xf32>
    %633 = vector.broadcast %5 : vector<1x96xf32> to vector<8x96xf32>
    %634 = arith.mulf %632, %633 : vector<8x96xf32>
    %635 = arith.addf %630, %634 : vector<8x96xf32>
    %636 = vector.extract_strided_slice %624 {offsets = [0, 2], sizes = [8, 1], strides = [1, 1]} : vector<8x4xf32> to vector<8x1xf32>
    %637 = vector.broadcast %636 : vector<8x1xf32> to vector<8x96xf32>
    %638 = vector.broadcast %6 : vector<1x96xf32> to vector<8x96xf32>
    %639 = arith.mulf %637, %638 : vector<8x96xf32>
    %640 = arith.addf %635, %639 : vector<8x96xf32>
    %cst_86 = arith.constant dense<0.000000e+00> : vector<8x96xf32>
    %641 = tpu.matmul %621, %3, %cst_86 {dimension_numbers = #tpu.dot_dimension_numbers<[1], [0], [0], [1], [0, 0, 1, 1], [], []>} : vector<8x32xf32>, vector<32x96xf32>, vector<8x96xf32> -> vector<8x96xf32>
    %642 = vector.broadcast %8 : vector<1x96xf32> to vector<8x96xf32>
    %643 = arith.addf %641, %642 : vector<8x96xf32>
    %644 = vector.extract_strided_slice %640 {offsets = [0, 0], sizes = [8, 64], strides = [1, 1]} : vector<8x96xf32> to vector<8x64xf32>
    %645 = vector.extract_strided_slice %643 {offsets = [0, 0], sizes = [8, 64], strides = [1, 1]} : vector<8x96xf32> to vector<8x64xf32>
    %646 = arith.addf %644, %645 : vector<8x64xf32>
    %647 = arith.negf %646 : vector<8x64xf32>
    %648 = math.exp %647 : vector<8x64xf32>
    %cst_87 = arith.constant 1.000000e+00 : f32
    %649 = vector.broadcast %cst_87 : f32 to vector<8x64xf32>
    %650 = arith.addf %649, %648 : vector<8x64xf32>
    %651 = arith.divf %649, %650 : vector<8x64xf32>
    %652 = vector.extract_strided_slice %651 {offsets = [0, 0], sizes = [8, 32], strides = [1, 1]} : vector<8x64xf32> to vector<8x32xf32>
    %653 = vector.extract_strided_slice %651 {offsets = [0, 32], sizes = [8, 32], strides = [1, 1]} : vector<8x64xf32> to vector<8x32xf32>
    %654 = vector.extract_strided_slice %640 {offsets = [0, 64], sizes = [8, 32], strides = [1, 1]} : vector<8x96xf32> to vector<8x32xf32>
    %655 = vector.extract_strided_slice %643 {offsets = [0, 64], sizes = [8, 32], strides = [1, 1]} : vector<8x96xf32> to vector<8x32xf32>
    %656 = arith.mulf %652, %655 : vector<8x32xf32>
    %657 = arith.addf %654, %656 : vector<8x32xf32>
    %658 = math.tanh %657 : vector<8x32xf32>
    %659 = arith.subf %621, %658 : vector<8x32xf32>
    %660 = arith.mulf %653, %659 : vector<8x32xf32>
    %661 = arith.addf %658, %660 : vector<8x32xf32>
    %662 = vector.extract_strided_slice %624 {offsets = [0, 3], sizes = [8, 1], strides = [1, 1]} : vector<8x4xf32> to vector<8x1xf32>
    %663 = vector.broadcast %662 : vector<8x1xf32> to vector<8x32xf32>
    %664 = arith.mulf %663, %661 : vector<8x32xf32>
    %665 = arith.index_cast %c12_i32 : i32 to index
    %c0_88 = arith.constant 0 : index
    %c0_89 = arith.constant 0 : index
    %666 = vector.load %arg11[%665, %c0_88, %c0_89] : memref<20x8x32xf32, #tpu.memory_space<vmem>>, vector<1x8x32xf32>
    %667 = vector.shape_cast %666 : vector<1x8x32xf32> to vector<8x32xf32>
    %668 = vector.shape_cast %664 : vector<8x32xf32> to vector<1x8x32xf32>
    tpu.vector_store %arg11[%665, %c0_88, %c0_89], %668 {strides = array<i32>} : memref<20x8x32xf32, #tpu.memory_space<vmem>>, vector<1x8x32xf32>,
    %669 = arith.subf %661, %621 : vector<8x32xf32>
    %670 = vector.broadcast %662 : vector<8x1xf32> to vector<8x32xf32>
    %671 = arith.mulf %670, %669 : vector<8x32xf32>
    %672 = arith.addf %621, %671 : vector<8x32xf32>
    %c13_i32 = arith.constant 13 : i32
    %673 = arith.index_cast %c13_i32 : i32 to index
    %c0_90 = arith.constant 0 : index
    %c0_91 = arith.constant 0 : index
    %674 = vector.load %arg1[%673, %c0_90, %c0_91] : memref<20x8x4xf32, #tpu.memory_space<vmem>>, vector<1x8x4xf32>
    %675 = vector.shape_cast %674 : vector<1x8x4xf32> to vector<8x4xf32>
    %676 = vector.extract_strided_slice %675 {offsets = [0, 0], sizes = [8, 1], strides = [1, 1]} : vector<8x4xf32> to vector<8x1xf32>
    %677 = vector.broadcast %676 : vector<8x1xf32> to vector<8x96xf32>
    %678 = vector.broadcast %4 : vector<1x96xf32> to vector<8x96xf32>
    %679 = arith.mulf %677, %678 : vector<8x96xf32>
    %680 = vector.broadcast %7 : vector<1x96xf32> to vector<8x96xf32>
    %681 = arith.addf %679, %680 : vector<8x96xf32>
    %682 = vector.extract_strided_slice %675 {offsets = [0, 1], sizes = [8, 1], strides = [1, 1]} : vector<8x4xf32> to vector<8x1xf32>
    %683 = vector.broadcast %682 : vector<8x1xf32> to vector<8x96xf32>
    %684 = vector.broadcast %5 : vector<1x96xf32> to vector<8x96xf32>
    %685 = arith.mulf %683, %684 : vector<8x96xf32>
    %686 = arith.addf %681, %685 : vector<8x96xf32>
    %687 = vector.extract_strided_slice %675 {offsets = [0, 2], sizes = [8, 1], strides = [1, 1]} : vector<8x4xf32> to vector<8x1xf32>
    %688 = vector.broadcast %687 : vector<8x1xf32> to vector<8x96xf32>
    %689 = vector.broadcast %6 : vector<1x96xf32> to vector<8x96xf32>
    %690 = arith.mulf %688, %689 : vector<8x96xf32>
    %691 = arith.addf %686, %690 : vector<8x96xf32>
    %cst_92 = arith.constant dense<0.000000e+00> : vector<8x96xf32>
    %692 = tpu.matmul %672, %3, %cst_92 {dimension_numbers = #tpu.dot_dimension_numbers<[1], [0], [0], [1], [0, 0, 1, 1], [], []>} : vector<8x32xf32>, vector<32x96xf32>, vector<8x96xf32> -> vector<8x96xf32>
    %693 = vector.broadcast %8 : vector<1x96xf32> to vector<8x96xf32>
    %694 = arith.addf %692, %693 : vector<8x96xf32>
    %695 = vector.extract_strided_slice %691 {offsets = [0, 0], sizes = [8, 64], strides = [1, 1]} : vector<8x96xf32> to vector<8x64xf32>
    %696 = vector.extract_strided_slice %694 {offsets = [0, 0], sizes = [8, 64], strides = [1, 1]} : vector<8x96xf32> to vector<8x64xf32>
    %697 = arith.addf %695, %696 : vector<8x64xf32>
    %698 = arith.negf %697 : vector<8x64xf32>
    %699 = math.exp %698 : vector<8x64xf32>
    %cst_93 = arith.constant 1.000000e+00 : f32
    %700 = vector.broadcast %cst_93 : f32 to vector<8x64xf32>
    %701 = arith.addf %700, %699 : vector<8x64xf32>
    %702 = arith.divf %700, %701 : vector<8x64xf32>
    %703 = vector.extract_strided_slice %702 {offsets = [0, 0], sizes = [8, 32], strides = [1, 1]} : vector<8x64xf32> to vector<8x32xf32>
    %704 = vector.extract_strided_slice %702 {offsets = [0, 32], sizes = [8, 32], strides = [1, 1]} : vector<8x64xf32> to vector<8x32xf32>
    %705 = vector.extract_strided_slice %691 {offsets = [0, 64], sizes = [8, 32], strides = [1, 1]} : vector<8x96xf32> to vector<8x32xf32>
    %706 = vector.extract_strided_slice %694 {offsets = [0, 64], sizes = [8, 32], strides = [1, 1]} : vector<8x96xf32> to vector<8x32xf32>
    %707 = arith.mulf %703, %706 : vector<8x32xf32>
    %708 = arith.addf %705, %707 : vector<8x32xf32>
    %709 = math.tanh %708 : vector<8x32xf32>
    %710 = arith.subf %672, %709 : vector<8x32xf32>
    %711 = arith.mulf %704, %710 : vector<8x32xf32>
    %712 = arith.addf %709, %711 : vector<8x32xf32>
    %713 = vector.extract_strided_slice %675 {offsets = [0, 3], sizes = [8, 1], strides = [1, 1]} : vector<8x4xf32> to vector<8x1xf32>
    %714 = vector.broadcast %713 : vector<8x1xf32> to vector<8x32xf32>
    %715 = arith.mulf %714, %712 : vector<8x32xf32>
    %716 = arith.index_cast %c13_i32 : i32 to index
    %c0_94 = arith.constant 0 : index
    %c0_95 = arith.constant 0 : index
    %717 = vector.load %arg11[%716, %c0_94, %c0_95] : memref<20x8x32xf32, #tpu.memory_space<vmem>>, vector<1x8x32xf32>
    %718 = vector.shape_cast %717 : vector<1x8x32xf32> to vector<8x32xf32>
    %719 = vector.shape_cast %715 : vector<8x32xf32> to vector<1x8x32xf32>
    tpu.vector_store %arg11[%716, %c0_94, %c0_95], %719 {strides = array<i32>} : memref<20x8x32xf32, #tpu.memory_space<vmem>>, vector<1x8x32xf32>,
    %720 = arith.subf %712, %672 : vector<8x32xf32>
    %721 = vector.broadcast %713 : vector<8x1xf32> to vector<8x32xf32>
    %722 = arith.mulf %721, %720 : vector<8x32xf32>
    %723 = arith.addf %672, %722 : vector<8x32xf32>
    %c14_i32 = arith.constant 14 : i32
    %724 = arith.index_cast %c14_i32 : i32 to index
    %c0_96 = arith.constant 0 : index
    %c0_97 = arith.constant 0 : index
    %725 = vector.load %arg1[%724, %c0_96, %c0_97] : memref<20x8x4xf32, #tpu.memory_space<vmem>>, vector<1x8x4xf32>
    %726 = vector.shape_cast %725 : vector<1x8x4xf32> to vector<8x4xf32>
    %727 = vector.extract_strided_slice %726 {offsets = [0, 0], sizes = [8, 1], strides = [1, 1]} : vector<8x4xf32> to vector<8x1xf32>
    %728 = vector.broadcast %727 : vector<8x1xf32> to vector<8x96xf32>
    %729 = vector.broadcast %4 : vector<1x96xf32> to vector<8x96xf32>
    %730 = arith.mulf %728, %729 : vector<8x96xf32>
    %731 = vector.broadcast %7 : vector<1x96xf32> to vector<8x96xf32>
    %732 = arith.addf %730, %731 : vector<8x96xf32>
    %733 = vector.extract_strided_slice %726 {offsets = [0, 1], sizes = [8, 1], strides = [1, 1]} : vector<8x4xf32> to vector<8x1xf32>
    %734 = vector.broadcast %733 : vector<8x1xf32> to vector<8x96xf32>
    %735 = vector.broadcast %5 : vector<1x96xf32> to vector<8x96xf32>
    %736 = arith.mulf %734, %735 : vector<8x96xf32>
    %737 = arith.addf %732, %736 : vector<8x96xf32>
    %738 = vector.extract_strided_slice %726 {offsets = [0, 2], sizes = [8, 1], strides = [1, 1]} : vector<8x4xf32> to vector<8x1xf32>
    %739 = vector.broadcast %738 : vector<8x1xf32> to vector<8x96xf32>
    %740 = vector.broadcast %6 : vector<1x96xf32> to vector<8x96xf32>
    %741 = arith.mulf %739, %740 : vector<8x96xf32>
    %742 = arith.addf %737, %741 : vector<8x96xf32>
    %cst_98 = arith.constant dense<0.000000e+00> : vector<8x96xf32>
    %743 = tpu.matmul %723, %3, %cst_98 {dimension_numbers = #tpu.dot_dimension_numbers<[1], [0], [0], [1], [0, 0, 1, 1], [], []>} : vector<8x32xf32>, vector<32x96xf32>, vector<8x96xf32> -> vector<8x96xf32>
    %744 = vector.broadcast %8 : vector<1x96xf32> to vector<8x96xf32>
    %745 = arith.addf %743, %744 : vector<8x96xf32>
    %746 = vector.extract_strided_slice %742 {offsets = [0, 0], sizes = [8, 64], strides = [1, 1]} : vector<8x96xf32> to vector<8x64xf32>
    %747 = vector.extract_strided_slice %745 {offsets = [0, 0], sizes = [8, 64], strides = [1, 1]} : vector<8x96xf32> to vector<8x64xf32>
    %748 = arith.addf %746, %747 : vector<8x64xf32>
    %749 = arith.negf %748 : vector<8x64xf32>
    %750 = math.exp %749 : vector<8x64xf32>
    %cst_99 = arith.constant 1.000000e+00 : f32
    %751 = vector.broadcast %cst_99 : f32 to vector<8x64xf32>
    %752 = arith.addf %751, %750 : vector<8x64xf32>
    %753 = arith.divf %751, %752 : vector<8x64xf32>
    %754 = vector.extract_strided_slice %753 {offsets = [0, 0], sizes = [8, 32], strides = [1, 1]} : vector<8x64xf32> to vector<8x32xf32>
    %755 = vector.extract_strided_slice %753 {offsets = [0, 32], sizes = [8, 32], strides = [1, 1]} : vector<8x64xf32> to vector<8x32xf32>
    %756 = vector.extract_strided_slice %742 {offsets = [0, 64], sizes = [8, 32], strides = [1, 1]} : vector<8x96xf32> to vector<8x32xf32>
    %757 = vector.extract_strided_slice %745 {offsets = [0, 64], sizes = [8, 32], strides = [1, 1]} : vector<8x96xf32> to vector<8x32xf32>
    %758 = arith.mulf %754, %757 : vector<8x32xf32>
    %759 = arith.addf %756, %758 : vector<8x32xf32>
    %760 = math.tanh %759 : vector<8x32xf32>
    %761 = arith.subf %723, %760 : vector<8x32xf32>
    %762 = arith.mulf %755, %761 : vector<8x32xf32>
    %763 = arith.addf %760, %762 : vector<8x32xf32>
    %764 = vector.extract_strided_slice %726 {offsets = [0, 3], sizes = [8, 1], strides = [1, 1]} : vector<8x4xf32> to vector<8x1xf32>
    %765 = vector.broadcast %764 : vector<8x1xf32> to vector<8x32xf32>
    %766 = arith.mulf %765, %763 : vector<8x32xf32>
    %767 = arith.index_cast %c14_i32 : i32 to index
    %c0_100 = arith.constant 0 : index
    %c0_101 = arith.constant 0 : index
    %768 = vector.load %arg11[%767, %c0_100, %c0_101] : memref<20x8x32xf32, #tpu.memory_space<vmem>>, vector<1x8x32xf32>
    %769 = vector.shape_cast %768 : vector<1x8x32xf32> to vector<8x32xf32>
    %770 = vector.shape_cast %766 : vector<8x32xf32> to vector<1x8x32xf32>
    tpu.vector_store %arg11[%767, %c0_100, %c0_101], %770 {strides = array<i32>} : memref<20x8x32xf32, #tpu.memory_space<vmem>>, vector<1x8x32xf32>,
    %771 = arith.subf %763, %723 : vector<8x32xf32>
    %772 = vector.broadcast %764 : vector<8x1xf32> to vector<8x32xf32>
    %773 = arith.mulf %772, %771 : vector<8x32xf32>
    %774 = arith.addf %723, %773 : vector<8x32xf32>
    %c15_i32 = arith.constant 15 : i32
    %775 = arith.index_cast %c15_i32 : i32 to index
    %c0_102 = arith.constant 0 : index
    %c0_103 = arith.constant 0 : index
    %776 = vector.load %arg1[%775, %c0_102, %c0_103] : memref<20x8x4xf32, #tpu.memory_space<vmem>>, vector<1x8x4xf32>
    %777 = vector.shape_cast %776 : vector<1x8x4xf32> to vector<8x4xf32>
    %778 = vector.extract_strided_slice %777 {offsets = [0, 0], sizes = [8, 1], strides = [1, 1]} : vector<8x4xf32> to vector<8x1xf32>
    %779 = vector.broadcast %778 : vector<8x1xf32> to vector<8x96xf32>
    %780 = vector.broadcast %4 : vector<1x96xf32> to vector<8x96xf32>
    %781 = arith.mulf %779, %780 : vector<8x96xf32>
    %782 = vector.broadcast %7 : vector<1x96xf32> to vector<8x96xf32>
    %783 = arith.addf %781, %782 : vector<8x96xf32>
    %784 = vector.extract_strided_slice %777 {offsets = [0, 1], sizes = [8, 1], strides = [1, 1]} : vector<8x4xf32> to vector<8x1xf32>
    %785 = vector.broadcast %784 : vector<8x1xf32> to vector<8x96xf32>
    %786 = vector.broadcast %5 : vector<1x96xf32> to vector<8x96xf32>
    %787 = arith.mulf %785, %786 : vector<8x96xf32>
    %788 = arith.addf %783, %787 : vector<8x96xf32>
    %789 = vector.extract_strided_slice %777 {offsets = [0, 2], sizes = [8, 1], strides = [1, 1]} : vector<8x4xf32> to vector<8x1xf32>
    %790 = vector.broadcast %789 : vector<8x1xf32> to vector<8x96xf32>
    %791 = vector.broadcast %6 : vector<1x96xf32> to vector<8x96xf32>
    %792 = arith.mulf %790, %791 : vector<8x96xf32>
    %793 = arith.addf %788, %792 : vector<8x96xf32>
    %cst_104 = arith.constant dense<0.000000e+00> : vector<8x96xf32>
    %794 = tpu.matmul %774, %3, %cst_104 {dimension_numbers = #tpu.dot_dimension_numbers<[1], [0], [0], [1], [0, 0, 1, 1], [], []>} : vector<8x32xf32>, vector<32x96xf32>, vector<8x96xf32> -> vector<8x96xf32>
    %795 = vector.broadcast %8 : vector<1x96xf32> to vector<8x96xf32>
    %796 = arith.addf %794, %795 : vector<8x96xf32>
    %797 = vector.extract_strided_slice %793 {offsets = [0, 0], sizes = [8, 64], strides = [1, 1]} : vector<8x96xf32> to vector<8x64xf32>
    %798 = vector.extract_strided_slice %796 {offsets = [0, 0], sizes = [8, 64], strides = [1, 1]} : vector<8x96xf32> to vector<8x64xf32>
    %799 = arith.addf %797, %798 : vector<8x64xf32>
    %800 = arith.negf %799 : vector<8x64xf32>
    %801 = math.exp %800 : vector<8x64xf32>
    %cst_105 = arith.constant 1.000000e+00 : f32
    %802 = vector.broadcast %cst_105 : f32 to vector<8x64xf32>
    %803 = arith.addf %802, %801 : vector<8x64xf32>
    %804 = arith.divf %802, %803 : vector<8x64xf32>
    %805 = vector.extract_strided_slice %804 {offsets = [0, 0], sizes = [8, 32], strides = [1, 1]} : vector<8x64xf32> to vector<8x32xf32>
    %806 = vector.extract_strided_slice %804 {offsets = [0, 32], sizes = [8, 32], strides = [1, 1]} : vector<8x64xf32> to vector<8x32xf32>
    %807 = vector.extract_strided_slice %793 {offsets = [0, 64], sizes = [8, 32], strides = [1, 1]} : vector<8x96xf32> to vector<8x32xf32>
    %808 = vector.extract_strided_slice %796 {offsets = [0, 64], sizes = [8, 32], strides = [1, 1]} : vector<8x96xf32> to vector<8x32xf32>
    %809 = arith.mulf %805, %808 : vector<8x32xf32>
    %810 = arith.addf %807, %809 : vector<8x32xf32>
    %811 = math.tanh %810 : vector<8x32xf32>
    %812 = arith.subf %774, %811 : vector<8x32xf32>
    %813 = arith.mulf %806, %812 : vector<8x32xf32>
    %814 = arith.addf %811, %813 : vector<8x32xf32>
    %815 = vector.extract_strided_slice %777 {offsets = [0, 3], sizes = [8, 1], strides = [1, 1]} : vector<8x4xf32> to vector<8x1xf32>
    %816 = vector.broadcast %815 : vector<8x1xf32> to vector<8x32xf32>
    %817 = arith.mulf %816, %814 : vector<8x32xf32>
    %818 = arith.index_cast %c15_i32 : i32 to index
    %c0_106 = arith.constant 0 : index
    %c0_107 = arith.constant 0 : index
    %819 = vector.load %arg11[%818, %c0_106, %c0_107] : memref<20x8x32xf32, #tpu.memory_space<vmem>>, vector<1x8x32xf32>
    %820 = vector.shape_cast %819 : vector<1x8x32xf32> to vector<8x32xf32>
    %821 = vector.shape_cast %817 : vector<8x32xf32> to vector<1x8x32xf32>
    tpu.vector_store %arg11[%818, %c0_106, %c0_107], %821 {strides = array<i32>} : memref<20x8x32xf32, #tpu.memory_space<vmem>>, vector<1x8x32xf32>,
    %822 = arith.subf %814, %774 : vector<8x32xf32>
    %823 = vector.broadcast %815 : vector<8x1xf32> to vector<8x32xf32>
    %824 = arith.mulf %823, %822 : vector<8x32xf32>
    %825 = arith.addf %774, %824 : vector<8x32xf32>
    %c16_i32 = arith.constant 16 : i32
    %826 = arith.index_cast %c16_i32 : i32 to index
    %c0_108 = arith.constant 0 : index
    %c0_109 = arith.constant 0 : index
    %827 = vector.load %arg1[%826, %c0_108, %c0_109] : memref<20x8x4xf32, #tpu.memory_space<vmem>>, vector<1x8x4xf32>
    %828 = vector.shape_cast %827 : vector<1x8x4xf32> to vector<8x4xf32>
    %829 = vector.extract_strided_slice %828 {offsets = [0, 0], sizes = [8, 1], strides = [1, 1]} : vector<8x4xf32> to vector<8x1xf32>
    %830 = vector.broadcast %829 : vector<8x1xf32> to vector<8x96xf32>
    %831 = vector.broadcast %4 : vector<1x96xf32> to vector<8x96xf32>
    %832 = arith.mulf %830, %831 : vector<8x96xf32>
    %833 = vector.broadcast %7 : vector<1x96xf32> to vector<8x96xf32>
    %834 = arith.addf %832, %833 : vector<8x96xf32>
    %835 = vector.extract_strided_slice %828 {offsets = [0, 1], sizes = [8, 1], strides = [1, 1]} : vector<8x4xf32> to vector<8x1xf32>
    %836 = vector.broadcast %835 : vector<8x1xf32> to vector<8x96xf32>
    %837 = vector.broadcast %5 : vector<1x96xf32> to vector<8x96xf32>
    %838 = arith.mulf %836, %837 : vector<8x96xf32>
    %839 = arith.addf %834, %838 : vector<8x96xf32>
    %840 = vector.extract_strided_slice %828 {offsets = [0, 2], sizes = [8, 1], strides = [1, 1]} : vector<8x4xf32> to vector<8x1xf32>
    %841 = vector.broadcast %840 : vector<8x1xf32> to vector<8x96xf32>
    %842 = vector.broadcast %6 : vector<1x96xf32> to vector<8x96xf32>
    %843 = arith.mulf %841, %842 : vector<8x96xf32>
    %844 = arith.addf %839, %843 : vector<8x96xf32>
    %cst_110 = arith.constant dense<0.000000e+00> : vector<8x96xf32>
    %845 = tpu.matmul %825, %3, %cst_110 {dimension_numbers = #tpu.dot_dimension_numbers<[1], [0], [0], [1], [0, 0, 1, 1], [], []>} : vector<8x32xf32>, vector<32x96xf32>, vector<8x96xf32> -> vector<8x96xf32>
    %846 = vector.broadcast %8 : vector<1x96xf32> to vector<8x96xf32>
    %847 = arith.addf %845, %846 : vector<8x96xf32>
    %848 = vector.extract_strided_slice %844 {offsets = [0, 0], sizes = [8, 64], strides = [1, 1]} : vector<8x96xf32> to vector<8x64xf32>
    %849 = vector.extract_strided_slice %847 {offsets = [0, 0], sizes = [8, 64], strides = [1, 1]} : vector<8x96xf32> to vector<8x64xf32>
    %850 = arith.addf %848, %849 : vector<8x64xf32>
    %851 = arith.negf %850 : vector<8x64xf32>
    %852 = math.exp %851 : vector<8x64xf32>
    %cst_111 = arith.constant 1.000000e+00 : f32
    %853 = vector.broadcast %cst_111 : f32 to vector<8x64xf32>
    %854 = arith.addf %853, %852 : vector<8x64xf32>
    %855 = arith.divf %853, %854 : vector<8x64xf32>
    %856 = vector.extract_strided_slice %855 {offsets = [0, 0], sizes = [8, 32], strides = [1, 1]} : vector<8x64xf32> to vector<8x32xf32>
    %857 = vector.extract_strided_slice %855 {offsets = [0, 32], sizes = [8, 32], strides = [1, 1]} : vector<8x64xf32> to vector<8x32xf32>
    %858 = vector.extract_strided_slice %844 {offsets = [0, 64], sizes = [8, 32], strides = [1, 1]} : vector<8x96xf32> to vector<8x32xf32>
    %859 = vector.extract_strided_slice %847 {offsets = [0, 64], sizes = [8, 32], strides = [1, 1]} : vector<8x96xf32> to vector<8x32xf32>
    %860 = arith.mulf %856, %859 : vector<8x32xf32>
    %861 = arith.addf %858, %860 : vector<8x32xf32>
    %862 = math.tanh %861 : vector<8x32xf32>
    %863 = arith.subf %825, %862 : vector<8x32xf32>
    %864 = arith.mulf %857, %863 : vector<8x32xf32>
    %865 = arith.addf %862, %864 : vector<8x32xf32>
    %866 = vector.extract_strided_slice %828 {offsets = [0, 3], sizes = [8, 1], strides = [1, 1]} : vector<8x4xf32> to vector<8x1xf32>
    %867 = vector.broadcast %866 : vector<8x1xf32> to vector<8x32xf32>
    %868 = arith.mulf %867, %865 : vector<8x32xf32>
    %869 = arith.index_cast %c16_i32 : i32 to index
    %c0_112 = arith.constant 0 : index
    %c0_113 = arith.constant 0 : index
    %870 = vector.load %arg11[%869, %c0_112, %c0_113] : memref<20x8x32xf32, #tpu.memory_space<vmem>>, vector<1x8x32xf32>
    %871 = vector.shape_cast %870 : vector<1x8x32xf32> to vector<8x32xf32>
    %872 = vector.shape_cast %868 : vector<8x32xf32> to vector<1x8x32xf32>
    tpu.vector_store %arg11[%869, %c0_112, %c0_113], %872 {strides = array<i32>} : memref<20x8x32xf32, #tpu.memory_space<vmem>>, vector<1x8x32xf32>,
    %873 = arith.subf %865, %825 : vector<8x32xf32>
    %874 = vector.broadcast %866 : vector<8x1xf32> to vector<8x32xf32>
    %875 = arith.mulf %874, %873 : vector<8x32xf32>
    %876 = arith.addf %825, %875 : vector<8x32xf32>
    %c17_i32 = arith.constant 17 : i32
    %877 = arith.index_cast %c17_i32 : i32 to index
    %c0_114 = arith.constant 0 : index
    %c0_115 = arith.constant 0 : index
    %878 = vector.load %arg1[%877, %c0_114, %c0_115] : memref<20x8x4xf32, #tpu.memory_space<vmem>>, vector<1x8x4xf32>
    %879 = vector.shape_cast %878 : vector<1x8x4xf32> to vector<8x4xf32>
    %880 = vector.extract_strided_slice %879 {offsets = [0, 0], sizes = [8, 1], strides = [1, 1]} : vector<8x4xf32> to vector<8x1xf32>
    %881 = vector.broadcast %880 : vector<8x1xf32> to vector<8x96xf32>
    %882 = vector.broadcast %4 : vector<1x96xf32> to vector<8x96xf32>
    %883 = arith.mulf %881, %882 : vector<8x96xf32>
    %884 = vector.broadcast %7 : vector<1x96xf32> to vector<8x96xf32>
    %885 = arith.addf %883, %884 : vector<8x96xf32>
    %886 = vector.extract_strided_slice %879 {offsets = [0, 1], sizes = [8, 1], strides = [1, 1]} : vector<8x4xf32> to vector<8x1xf32>
    %887 = vector.broadcast %886 : vector<8x1xf32> to vector<8x96xf32>
    %888 = vector.broadcast %5 : vector<1x96xf32> to vector<8x96xf32>
    %889 = arith.mulf %887, %888 : vector<8x96xf32>
    %890 = arith.addf %885, %889 : vector<8x96xf32>
    %891 = vector.extract_strided_slice %879 {offsets = [0, 2], sizes = [8, 1], strides = [1, 1]} : vector<8x4xf32> to vector<8x1xf32>
    %892 = vector.broadcast %891 : vector<8x1xf32> to vector<8x96xf32>
    %893 = vector.broadcast %6 : vector<1x96xf32> to vector<8x96xf32>
    %894 = arith.mulf %892, %893 : vector<8x96xf32>
    %895 = arith.addf %890, %894 : vector<8x96xf32>
    %cst_116 = arith.constant dense<0.000000e+00> : vector<8x96xf32>
    %896 = tpu.matmul %876, %3, %cst_116 {dimension_numbers = #tpu.dot_dimension_numbers<[1], [0], [0], [1], [0, 0, 1, 1], [], []>} : vector<8x32xf32>, vector<32x96xf32>, vector<8x96xf32> -> vector<8x96xf32>
    %897 = vector.broadcast %8 : vector<1x96xf32> to vector<8x96xf32>
    %898 = arith.addf %896, %897 : vector<8x96xf32>
    %899 = vector.extract_strided_slice %895 {offsets = [0, 0], sizes = [8, 64], strides = [1, 1]} : vector<8x96xf32> to vector<8x64xf32>
    %900 = vector.extract_strided_slice %898 {offsets = [0, 0], sizes = [8, 64], strides = [1, 1]} : vector<8x96xf32> to vector<8x64xf32>
    %901 = arith.addf %899, %900 : vector<8x64xf32>
    %902 = arith.negf %901 : vector<8x64xf32>
    %903 = math.exp %902 : vector<8x64xf32>
    %cst_117 = arith.constant 1.000000e+00 : f32
    %904 = vector.broadcast %cst_117 : f32 to vector<8x64xf32>
    %905 = arith.addf %904, %903 : vector<8x64xf32>
    %906 = arith.divf %904, %905 : vector<8x64xf32>
    %907 = vector.extract_strided_slice %906 {offsets = [0, 0], sizes = [8, 32], strides = [1, 1]} : vector<8x64xf32> to vector<8x32xf32>
    %908 = vector.extract_strided_slice %906 {offsets = [0, 32], sizes = [8, 32], strides = [1, 1]} : vector<8x64xf32> to vector<8x32xf32>
    %909 = vector.extract_strided_slice %895 {offsets = [0, 64], sizes = [8, 32], strides = [1, 1]} : vector<8x96xf32> to vector<8x32xf32>
    %910 = vector.extract_strided_slice %898 {offsets = [0, 64], sizes = [8, 32], strides = [1, 1]} : vector<8x96xf32> to vector<8x32xf32>
    %911 = arith.mulf %907, %910 : vector<8x32xf32>
    %912 = arith.addf %909, %911 : vector<8x32xf32>
    %913 = math.tanh %912 : vector<8x32xf32>
    %914 = arith.subf %876, %913 : vector<8x32xf32>
    %915 = arith.mulf %908, %914 : vector<8x32xf32>
    %916 = arith.addf %913, %915 : vector<8x32xf32>
    %917 = vector.extract_strided_slice %879 {offsets = [0, 3], sizes = [8, 1], strides = [1, 1]} : vector<8x4xf32> to vector<8x1xf32>
    %918 = vector.broadcast %917 : vector<8x1xf32> to vector<8x32xf32>
    %919 = arith.mulf %918, %916 : vector<8x32xf32>
    %920 = arith.index_cast %c17_i32 : i32 to index
    %c0_118 = arith.constant 0 : index
    %c0_119 = arith.constant 0 : index
    %921 = vector.load %arg11[%920, %c0_118, %c0_119] : memref<20x8x32xf32, #tpu.memory_space<vmem>>, vector<1x8x32xf32>
    %922 = vector.shape_cast %921 : vector<1x8x32xf32> to vector<8x32xf32>
    %923 = vector.shape_cast %919 : vector<8x32xf32> to vector<1x8x32xf32>
    tpu.vector_store %arg11[%920, %c0_118, %c0_119], %923 {strides = array<i32>} : memref<20x8x32xf32, #tpu.memory_space<vmem>>, vector<1x8x32xf32>,
    %924 = arith.subf %916, %876 : vector<8x32xf32>
    %925 = vector.broadcast %917 : vector<8x1xf32> to vector<8x32xf32>
    %926 = arith.mulf %925, %924 : vector<8x32xf32>
    %927 = arith.addf %876, %926 : vector<8x32xf32>
    %c18_i32 = arith.constant 18 : i32
    %928 = arith.index_cast %c18_i32 : i32 to index
    %c0_120 = arith.constant 0 : index
    %c0_121 = arith.constant 0 : index
    %929 = vector.load %arg1[%928, %c0_120, %c0_121] : memref<20x8x4xf32, #tpu.memory_space<vmem>>, vector<1x8x4xf32>
    %930 = vector.shape_cast %929 : vector<1x8x4xf32> to vector<8x4xf32>
    %931 = vector.extract_strided_slice %930 {offsets = [0, 0], sizes = [8, 1], strides = [1, 1]} : vector<8x4xf32> to vector<8x1xf32>
    %932 = vector.broadcast %931 : vector<8x1xf32> to vector<8x96xf32>
    %933 = vector.broadcast %4 : vector<1x96xf32> to vector<8x96xf32>
    %934 = arith.mulf %932, %933 : vector<8x96xf32>
    %935 = vector.broadcast %7 : vector<1x96xf32> to vector<8x96xf32>
    %936 = arith.addf %934, %935 : vector<8x96xf32>
    %937 = vector.extract_strided_slice %930 {offsets = [0, 1], sizes = [8, 1], strides = [1, 1]} : vector<8x4xf32> to vector<8x1xf32>
    %938 = vector.broadcast %937 : vector<8x1xf32> to vector<8x96xf32>
    %939 = vector.broadcast %5 : vector<1x96xf32> to vector<8x96xf32>
    %940 = arith.mulf %938, %939 : vector<8x96xf32>
    %941 = arith.addf %936, %940 : vector<8x96xf32>
    %942 = vector.extract_strided_slice %930 {offsets = [0, 2], sizes = [8, 1], strides = [1, 1]} : vector<8x4xf32> to vector<8x1xf32>
    %943 = vector.broadcast %942 : vector<8x1xf32> to vector<8x96xf32>
    %944 = vector.broadcast %6 : vector<1x96xf32> to vector<8x96xf32>
    %945 = arith.mulf %943, %944 : vector<8x96xf32>
    %946 = arith.addf %941, %945 : vector<8x96xf32>
    %cst_122 = arith.constant dense<0.000000e+00> : vector<8x96xf32>
    %947 = tpu.matmul %927, %3, %cst_122 {dimension_numbers = #tpu.dot_dimension_numbers<[1], [0], [0], [1], [0, 0, 1, 1], [], []>} : vector<8x32xf32>, vector<32x96xf32>, vector<8x96xf32> -> vector<8x96xf32>
    %948 = vector.broadcast %8 : vector<1x96xf32> to vector<8x96xf32>
    %949 = arith.addf %947, %948 : vector<8x96xf32>
    %950 = vector.extract_strided_slice %946 {offsets = [0, 0], sizes = [8, 64], strides = [1, 1]} : vector<8x96xf32> to vector<8x64xf32>
    %951 = vector.extract_strided_slice %949 {offsets = [0, 0], sizes = [8, 64], strides = [1, 1]} : vector<8x96xf32> to vector<8x64xf32>
    %952 = arith.addf %950, %951 : vector<8x64xf32>
    %953 = arith.negf %952 : vector<8x64xf32>
    %954 = math.exp %953 : vector<8x64xf32>
    %cst_123 = arith.constant 1.000000e+00 : f32
    %955 = vector.broadcast %cst_123 : f32 to vector<8x64xf32>
    %956 = arith.addf %955, %954 : vector<8x64xf32>
    %957 = arith.divf %955, %956 : vector<8x64xf32>
    %958 = vector.extract_strided_slice %957 {offsets = [0, 0], sizes = [8, 32], strides = [1, 1]} : vector<8x64xf32> to vector<8x32xf32>
    %959 = vector.extract_strided_slice %957 {offsets = [0, 32], sizes = [8, 32], strides = [1, 1]} : vector<8x64xf32> to vector<8x32xf32>
    %960 = vector.extract_strided_slice %946 {offsets = [0, 64], sizes = [8, 32], strides = [1, 1]} : vector<8x96xf32> to vector<8x32xf32>
    %961 = vector.extract_strided_slice %949 {offsets = [0, 64], sizes = [8, 32], strides = [1, 1]} : vector<8x96xf32> to vector<8x32xf32>
    %962 = arith.mulf %958, %961 : vector<8x32xf32>
    %963 = arith.addf %960, %962 : vector<8x32xf32>
    %964 = math.tanh %963 : vector<8x32xf32>
    %965 = arith.subf %927, %964 : vector<8x32xf32>
    %966 = arith.mulf %959, %965 : vector<8x32xf32>
    %967 = arith.addf %964, %966 : vector<8x32xf32>
    %968 = vector.extract_strided_slice %930 {offsets = [0, 3], sizes = [8, 1], strides = [1, 1]} : vector<8x4xf32> to vector<8x1xf32>
    %969 = vector.broadcast %968 : vector<8x1xf32> to vector<8x32xf32>
    %970 = arith.mulf %969, %967 : vector<8x32xf32>
    %971 = arith.index_cast %c18_i32 : i32 to index
    %c0_124 = arith.constant 0 : index
    %c0_125 = arith.constant 0 : index
    %972 = vector.load %arg11[%971, %c0_124, %c0_125] : memref<20x8x32xf32, #tpu.memory_space<vmem>>, vector<1x8x32xf32>
    %973 = vector.shape_cast %972 : vector<1x8x32xf32> to vector<8x32xf32>
    %974 = vector.shape_cast %970 : vector<8x32xf32> to vector<1x8x32xf32>
    tpu.vector_store %arg11[%971, %c0_124, %c0_125], %974 {strides = array<i32>} : memref<20x8x32xf32, #tpu.memory_space<vmem>>, vector<1x8x32xf32>,
    %975 = arith.subf %967, %927 : vector<8x32xf32>
    %976 = vector.broadcast %968 : vector<8x1xf32> to vector<8x32xf32>
    %977 = arith.mulf %976, %975 : vector<8x32xf32>
    %978 = arith.addf %927, %977 : vector<8x32xf32>
    %c19_i32 = arith.constant 19 : i32
    %979 = arith.index_cast %c19_i32 : i32 to index
    %c0_126 = arith.constant 0 : index
    %c0_127 = arith.constant 0 : index
    %980 = vector.load %arg1[%979, %c0_126, %c0_127] : memref<20x8x4xf32, #tpu.memory_space<vmem>>, vector<1x8x4xf32>
    %981 = vector.shape_cast %980 : vector<1x8x4xf32> to vector<8x4xf32>
    %982 = vector.extract_strided_slice %981 {offsets = [0, 0], sizes = [8, 1], strides = [1, 1]} : vector<8x4xf32> to vector<8x1xf32>
    %983 = vector.broadcast %982 : vector<8x1xf32> to vector<8x96xf32>
    %984 = vector.broadcast %4 : vector<1x96xf32> to vector<8x96xf32>
    %985 = arith.mulf %983, %984 : vector<8x96xf32>
    %986 = vector.broadcast %7 : vector<1x96xf32> to vector<8x96xf32>
    %987 = arith.addf %985, %986 : vector<8x96xf32>
    %988 = vector.extract_strided_slice %981 {offsets = [0, 1], sizes = [8, 1], strides = [1, 1]} : vector<8x4xf32> to vector<8x1xf32>
    %989 = vector.broadcast %988 : vector<8x1xf32> to vector<8x96xf32>
    %990 = vector.broadcast %5 : vector<1x96xf32> to vector<8x96xf32>
    %991 = arith.mulf %989, %990 : vector<8x96xf32>
    %992 = arith.addf %987, %991 : vector<8x96xf32>
    %993 = vector.extract_strided_slice %981 {offsets = [0, 2], sizes = [8, 1], strides = [1, 1]} : vector<8x4xf32> to vector<8x1xf32>
    %994 = vector.broadcast %993 : vector<8x1xf32> to vector<8x96xf32>
    %995 = vector.broadcast %6 : vector<1x96xf32> to vector<8x96xf32>
    %996 = arith.mulf %994, %995 : vector<8x96xf32>
    %997 = arith.addf %992, %996 : vector<8x96xf32>
    %cst_128 = arith.constant dense<0.000000e+00> : vector<8x96xf32>
    %998 = tpu.matmul %978, %3, %cst_128 {dimension_numbers = #tpu.dot_dimension_numbers<[1], [0], [0], [1], [0, 0, 1, 1], [], []>} : vector<8x32xf32>, vector<32x96xf32>, vector<8x96xf32> -> vector<8x96xf32>
    %999 = vector.broadcast %8 : vector<1x96xf32> to vector<8x96xf32>
    %1000 = arith.addf %998, %999 : vector<8x96xf32>
    %1001 = vector.extract_strided_slice %997 {offsets = [0, 0], sizes = [8, 64], strides = [1, 1]} : vector<8x96xf32> to vector<8x64xf32>
    %1002 = vector.extract_strided_slice %1000 {offsets = [0, 0], sizes = [8, 64], strides = [1, 1]} : vector<8x96xf32> to vector<8x64xf32>
    %1003 = arith.addf %1001, %1002 : vector<8x64xf32>
    %1004 = arith.negf %1003 : vector<8x64xf32>
    %1005 = math.exp %1004 : vector<8x64xf32>
    %cst_129 = arith.constant 1.000000e+00 : f32
    %1006 = vector.broadcast %cst_129 : f32 to vector<8x64xf32>
    %1007 = arith.addf %1006, %1005 : vector<8x64xf32>
    %1008 = arith.divf %1006, %1007 : vector<8x64xf32>
    %1009 = vector.extract_strided_slice %1008 {offsets = [0, 0], sizes = [8, 32], strides = [1, 1]} : vector<8x64xf32> to vector<8x32xf32>
    %1010 = vector.extract_strided_slice %1008 {offsets = [0, 32], sizes = [8, 32], strides = [1, 1]} : vector<8x64xf32> to vector<8x32xf32>
    %1011 = vector.extract_strided_slice %997 {offsets = [0, 64], sizes = [8, 32], strides = [1, 1]} : vector<8x96xf32> to vector<8x32xf32>
    %1012 = vector.extract_strided_slice %1000 {offsets = [0, 64], sizes = [8, 32], strides = [1, 1]} : vector<8x96xf32> to vector<8x32xf32>
    %1013 = arith.mulf %1009, %1012 : vector<8x32xf32>
    %1014 = arith.addf %1011, %1013 : vector<8x32xf32>
    %1015 = math.tanh %1014 : vector<8x32xf32>
    %1016 = arith.subf %978, %1015 : vector<8x32xf32>
    %1017 = arith.mulf %1010, %1016 : vector<8x32xf32>
    %1018 = arith.addf %1015, %1017 : vector<8x32xf32>
    %1019 = vector.extract_strided_slice %981 {offsets = [0, 3], sizes = [8, 1], strides = [1, 1]} : vector<8x4xf32> to vector<8x1xf32>
    %1020 = vector.broadcast %1019 : vector<8x1xf32> to vector<8x32xf32>
    %1021 = arith.mulf %1020, %1018 : vector<8x32xf32>
    %1022 = arith.index_cast %c19_i32 : i32 to index
    %c0_130 = arith.constant 0 : index
    %c0_131 = arith.constant 0 : index
    %1023 = vector.load %arg11[%1022, %c0_130, %c0_131] : memref<20x8x32xf32, #tpu.memory_space<vmem>>, vector<1x8x32xf32>
    %1024 = vector.shape_cast %1023 : vector<1x8x32xf32> to vector<8x32xf32>
    %1025 = vector.shape_cast %1021 : vector<8x32xf32> to vector<1x8x32xf32>
    tpu.vector_store %arg11[%1022, %c0_130, %c0_131], %1025 {strides = array<i32>} : memref<20x8x32xf32, #tpu.memory_space<vmem>>, vector<1x8x32xf32>,
    %1026 = arith.subf %1018, %978 : vector<8x32xf32>
    %1027 = vector.broadcast %1019 : vector<8x1xf32> to vector<8x32xf32>
    %1028 = arith.mulf %1027, %1026 : vector<8x32xf32>
    %1029 = arith.addf %978, %1028 : vector<8x32xf32>
    %c20_i32 = arith.constant 20 : i32
    %c0_132 = arith.constant 0 : index
    %c0_133 = arith.constant 0 : index
    %1030 = vector.load %arg13[%c0_132, %c0_133] : memref<8x32xf32, #tpu.memory_space<vmem>>, vector<8x32xf32>
    tpu.vector_store %arg13[%c0_132, %c0_133], %1029 {strides = array<i32>} : memref<8x32xf32, #tpu.memory_space<vmem>>, vector<8x32xf32>,
    %c0_i32_134 = arith.constant 0 : i32
    %1031 = arith.cmpi eq, %arg0, %c0_i32_134 : i32
    %1032 = arith.extui %1031 : i1 to i32
    %c0_i32_135 = arith.constant 0 : i32
    %1033 = arith.cmpi ne, %1032, %c0_i32_135 : i32
    scf.if %1033 {
      %c0_136 = arith.constant 0 : index
      %c0_137 = arith.constant 0 : index
      %1034 = vector.load %arg14[%c0_136, %c0_137] : memref<8x32xf32, #tpu.memory_space<vmem>>, vector<8x32xf32>
      %c0_138 = arith.constant 0 : index
      %c0_139 = arith.constant 0 : index
      %1035 = vector.load %arg9[%c0_138, %c0_139] : memref<32x32xf32, #tpu.memory_space<vmem>>, vector<32x32xf32>
      %cst_140 = arith.constant dense<0.000000e+00> : vector<8x32xf32>
      %1036 = tpu.matmul %1029, %1035, %cst_140 {dimension_numbers = #tpu.dot_dimension_numbers<[1], [0], [0], [1], [0, 0, 1, 1], [], []>} : vector<8x32xf32>, vector<32x32xf32>, vector<8x32xf32> -> vector<8x32xf32>
      %1037 = arith.addf %1034, %1036 : vector<8x32xf32>
      %1038 = math.tanh %1037 : vector<8x32xf32>
      %c0_141 = arith.constant 0 : index
      %c0_142 = arith.constant 0 : index
      %1039 = vector.load %arg12[%c0_141, %c0_142] : memref<8x32xf32, #tpu.memory_space<vmem>>, vector<8x32xf32>
      tpu.vector_store %arg12[%c0_141, %c0_142], %1038 {strides = array<i32>} : memref<8x32xf32, #tpu.memory_space<vmem>>, vector<8x32xf32>,
    } else {
    }
    return
  }
  func.func @transform_0(%arg0: i32) -> (i32, i32, i32) {
    %c0_i32 = arith.constant 0 : i32
    %c0_i32_0 = arith.constant 0 : i32
    %c0_i32_1 = arith.constant 0 : i32
    return %arg0, %c0_i32, %c0_i32_0 : i32, i32, i32
  }
  func.func @transform_1(%arg0: i32) -> (i32, i32) {
    %c0_i32 = arith.constant 0 : i32
    %c0_i32_0 = arith.constant 0 : i32
    %c0_i32_1 = arith.constant 0 : i32
    return %c0_i32, %c0_i32_0 : i32, i32
  }
  func.func @transform_2(%arg0: i32) -> (i32, i32) {
    %c0_i32 = arith.constant 0 : i32
    %c0_i32_0 = arith.constant 0 : i32
    %c0_i32_1 = arith.constant 0 : i32
    return %c0_i32, %c0_i32_0 : i32, i32
  }
  func.func @transform_3(%arg0: i32) -> (i32, i32) {
    %c0_i32 = arith.constant 0 : i32
    %c0_i32_0 = arith.constant 0 : i32
    %c0_i32_1 = arith.constant 0 : i32
    return %c0_i32, %c0_i32_0 : i32, i32
  }
  func.func @transform_4(%arg0: i32) -> (i32, i32) {
    %c0_i32 = arith.constant 0 : i32
    %c0_i32_0 = arith.constant 0 : i32
    %c0_i32_1 = arith.constant 0 : i32
    return %c0_i32, %c0_i32_0 : i32, i32
  }
  func.func @transform_5(%arg0: i32) -> (i32, i32) {
    %c0_i32 = arith.constant 0 : i32
    %c0_i32_0 = arith.constant 0 : i32
    %c0_i32_1 = arith.constant 0 : i32
    return %c0_i32, %c0_i32_0 : i32, i32
  }
  func.func @transform_6(%arg0: i32) -> (i32, i32) {
    %c0_i32 = arith.constant 0 : i32
    %c0_i32_0 = arith.constant 0 : i32
    %c0_i32_1 = arith.constant 0 : i32
    return %c0_i32, %c0_i32_0 : i32, i32
  }
  func.func @transform_7(%arg0: i32) -> (i32, i32) {
    %c0_i32 = arith.constant 0 : i32
    %c0_i32_0 = arith.constant 0 : i32
    %c0_i32_1 = arith.constant 0 : i32
    return %c0_i32, %c0_i32_0 : i32, i32
  }
  func.func @transform_8(%arg0: i32) -> (i32, i32) {
    %c0_i32 = arith.constant 0 : i32
    %c0_i32_0 = arith.constant 0 : i32
    %c0_i32_1 = arith.constant 0 : i32
    return %c0_i32, %c0_i32_0 : i32, i32
  }
  func.func @transform_9(%arg0: i32) -> (i32, i32) {
    %c0_i32 = arith.constant 0 : i32
    %c0_i32_0 = arith.constant 0 : i32
    %c0_i32_1 = arith.constant 0 : i32
    return %c0_i32, %c0_i32_0 : i32, i32
  }
  func.func @transform_10(%arg0: i32) -> (i32, i32, i32) {
    %c0_i32 = arith.constant 0 : i32
    %c0_i32_0 = arith.constant 0 : i32
    %c0_i32_1 = arith.constant 0 : i32
    return %arg0, %c0_i32, %c0_i32_0 : i32, i32, i32
  }
  func.func @transform_11(%arg0: i32) -> (i32, i32) {
    %c0_i32 = arith.constant 0 : i32
    %c0_i32_0 = arith.constant 0 : i32
    %c0_i32_1 = arith.constant 0 : i32
    return %c0_i32, %c0_i32_0 : i32, i32
  }
}

</mosaic_0001>

<bundles_post_ra>
// kernel: tpu_custom_call.1
= control target key start
LH: loop header
LB: loop body
LE: loop exit
PB: predicated region body
PF: predicated region fallthrough
CT: control target
= control target key end

     0   :  { %17 = vsyncpa [#allocation5], 0  ;;  %vm43_vm0 = vcmask 261120   ;;  %v2739_v3 = vmov 0.0   ;;  %v2740_v4 = vmov 0   ;;  %v2741_v7 = vmov 2   ;;  %s3804_s0 = inlined_call_operand.vmem [shape: f32[20,8,4], index: 0, kind: input, shape index: {}]   ;;  %s3805_s1 = inlined_call_operand.vmem [shape: f32[3,96], index: 1, kind: input, shape index: {}]   ;;  %s3806_s2 = inlined_call_operand.vmem [shape: f32[32,96], index: 2, kind: input, shape index: {}]   ;;  %s3807_s3 = inlined_call_operand.vmem [shape: f32[2,96], index: 3, kind: input, shape index: {}]   ;;  %s3808_s4 = inlined_call_operand.vmem [shape: f32[8,8], index: 4, kind: input, shape index: {}]   ;;  %s3809_s5 = inlined_call_operand.vmem [shape: f32[8,8], index: 5, kind: input, shape index: {}]   ;;  %s3810_s6 = inlined_call_operand.vmem [shape: f32[1,8], index: 6, kind: input, shape index: {}]   ;;  %s3811_s7 = inlined_call_operand.vmem [shape: f32[8,32], index: 7, kind: input, shape index: {}]   ;;  %s3812_s8 = inlined_call_operand.vmem [shape: f32[32,32], index: 8, kind: input, shape index: {}]   ;;  %s3813_s9 = inlined_call_operand.vmem [shape: f32[1,32], index: 9, kind: input, shape index: {}]   ;;  %s3814_s10 = inlined_call_operand.hbm [shape: f32[20,8,32], index: 10, kind: output, shape index: {0}]   ;;  %s3815_s11 = inlined_call_operand.hbm [shape: f32[8,32], index: 11, kind: output, shape index: {1}]  }
   0x1   :  { %v2813_v0 = vld [vmem:[%s3806_s2 + $0x18] sm:$0xff]  ;;  %v2818_v1 = vld [vmem:[%s3806_s2 + $0x10] sm:$0xff]  ;;  %v2824_v2 = vld [vmem:[%s3806_s2 + $0x8] sm:$0xff]  ;;  %44 = vst.msk [vmem:[#allocation2] sm:$0xff] %vm43_vm0, %v2739_v3  ;;  %2482 = vset.pattern.permute.xlu0 %v2740_v4  ;;  %2484 = vset.pattern.permute.xlu1 %v2741_v7 }
   0x2   :  { %157 = vmatpush.msra.mxu2 %v2813_v0  ;;  %v2831_v5 = vld [vmem:[%s3804_s0] sm:$0xff]  ;;  %45 = vst.msk [vmem:[#allocation6] sm:$0xff] %vm43_vm0, %v2739_v3  ;;  %267 = vmatpush.msra.mxu3 %v2813_v0 }
   0x3   :  { %v2836_v6 = vld [vmem:[%s3806_s2] sm:$0xff]  ;;  %119 = vperm.xlu0 %2482, %v2831_v5   ;;  %134 = vperm.xlu1 %2484, %v2831_v5  }
   0x4   :  { %158 = vmatpush.msra.mxu2 %v2818_v1  ;;  %2488 = vset.pattern.permute.xlu2 %v2741_v7 }
   0x5   :  { %18 = vsyncpa [#allocation7], 0  ;;  %268 = vmatpush.msra.mxu3 %v2818_v1  ;;  %v2742_v9 = vmov 1   ;;  %s2743_s27 = smov 64   ;;  %v2874_v10 = vld [vmem:[%s3807_s3 + $0x1] ss:$0 sm:$0xff] }
   0x6   :  { %159 = vmatpush.msra.mxu2 %v2824_v2  ;;  %v2881_v14 = vld [vmem:[%s3805_s1] ss:$0 sm:$0xff]  ;;  %v2892_v17 = vld [vmem:[%s3805_s1 + $0x1] ss:$0 sm:$0xff]  ;;  %v2899_v21 = vld [vmem:[%s3805_s1 + $0x2] ss:$0 sm:$0xff] }
   0x7   :  { %269 = vmatpush.msra.mxu3 %v2824_v2  ;;  %v2887_v16 = vld [vmem:[%s3807_s3] ss:$0 sm:$0xff]  ;;  %v2744_v45 = vmov 3   ;;  %s2745_s19 = smov 32   ;;  %v2413_v56 = vld [vmem:[%s3804_s0 + $0x8] sm:$0xff]  ;;  %vm52_vm9 = vcmask 64512  }
   0x8   :  { %160 = vmatpush.msra.mxu2 %v2836_v6  ;;  %v2848_v8 = vld [vmem:[#allocation2] sm:$0xff]  ;;  %s2748_s12 = smov 8   ;;  %s2749_s13 = smov [#allocation6]  }
   0x9   :  { %2411 = vmatmul.msk.f32.vlgmr.msra.gmra.mxu2 %vm43_vm0, %v2848_v8  ;;  %270 = vmatpush.msra.mxu3 %v2836_v6  ;;  %s2393_s14 = sshll.u32 %s2749_s13, 4  ;;  %s2395_s17 = sshll.u32 %s3815_s11, 4  ;;  %s2394_s14 = int_to_ptr.vmem [resolvable:$true] %s2393_s14  ;;  %s2396_s17 = int_to_ptr.hbm [resolvable:$true] %s2395_s17 }
   0xa   :  { %600 = vmatpush.msrb.mxu2 %v2813_v0 }
   0xb   :  { %2483 = vset.pattern.permute.xlu0 %v2742_v9  ;;  %711 = vmatpush.msrb.mxu3 %v2813_v0 }
   0xc   :  { %127 = vperm.xlu0 %2483, %v2831_v5   ;;  %601 = vmatpush.msrb.mxu2 %v2818_v1 }
   0xd   :  { %712 = vmatpush.msrb.mxu3 %v2818_v1  ;;  %2485 = vset.pattern.permute.xlu1 %v2744_v45 }
   0xe   :  { %602 = vmatpush.msrb.mxu2 %v2824_v2 }
   0xf   :  { %713 = vmatpush.msrb.mxu3 %v2824_v2 }
  0x10   :  { %603 = vmatpush.msrb.mxu2 %v2836_v6 }
  0x11   :  { %714 = vmatpush.msrb.mxu3 %v2836_v6 }
  0x12   :  { %1044 = vmatpush.msra.mxu2 %v2813_v0 }
  0x14   :  { %1045 = vmatpush.msra.mxu2 %v2818_v1  ;;  %221 = vrot.lane.b32.xlu0 %v2848_v8, %s2743_s27 }
  0x15   :  { %2486 = vset.pattern.permute.xlu0 %v2740_v4 }
  0x16   :  { %1046 = vmatpush.msra.mxu2 %v2824_v2 }
  0x18   :  { %1047 = vmatpush.msra.mxu2 %v2836_v6 }
  0x1c   :  { %235 = vperm.xlu0 %2486, %v2413_v56  }
  0x75   :  { %v120_v13 = vpop.permute.xlu0 %119  ;;  %v135_v22 = vpop.permute.xlu1 %134 }
  0x76   :  { %v123_v15 = vmul.f32 %v2881_v14, %v120_v13  ;;  %v138_v24 = vmul.f32 %v2899_v21, %v135_v22 }
  0x78   :  { %v125_v19 = vadd.f32 %v2887_v16, %v123_v15 }
  0x7e   :  { %v128_v18 = vpop.permute.xlu0 %127 }
  0x7f   :  { %v131_v20 = vmul.f32 %v2892_v17, %v128_v18 }
  0x81   :  { %v132_v23 = vadd.f32 %v131_v20, %v125_v19 }
  0x83   :  { %v139_v25 = vadd.f32 %v138_v24, %v132_v23 }
  0x86   :  { %v222_v51 = vpop.permute.xlu0 %221 }
  0x8c   :  { %v162_v11 = vpop.f32.mrf.mxu2 }
  0x8d   :  { %v163_v12 = vadd.f32 %v2874_v10, %v162_v11 }
  0x8e   :  { %v236_v61 = vpop.permute.xlu0 %235 }
  0x8f   :  { %186 = vrot.lane.b32.xlu1 %v163_v12, %s2743_s27  ;;  %v165_v26 = vadd.f32 %v163_v12, %v139_v25  ;;  %v238_v62 = vmul.f32 %v2881_v14, %v236_v61 }
  0x91   :  { %v2412_v27 = vmul.f32 -1.442695, %v165_v26  ;;  %v239_v3 = vadd.f32 %v2887_v16, %v238_v62 }
  0x93   :  { %2549 = vpow2.f32 %v2412_v27 }
  0x99   :  { %v2550_v28 = vpop.eup %2549 }
  0x9a   :  { %v169_v29 = vadd.f32 1.0, %v2550_v28 }
  0x9c   :  { %2551 = vrcp.f32 %v169_v29  ;;  %v181_v35 = vand.u32 2147483648, %v169_v29  ;;  %vm175_vm2 = vweird.f32 %v169_v29  ;;  %v179_v36 = vand.u32 2147483647, %v169_v29 }
  0x9e   :  { %v182_v38 = vor.u32 1.1754944e-38, %v181_v35  ;;  %vm180_vm4 = vcmp.eq.f32.partialorder %v179_v36, 8.507059e+37 }
  0xa2   :  { %v2552_v30 = vpop.eup %2551 }
  0xa3   :  { %v171_v31 = vmul.f32 %v2552_v30, %v169_v29  ;;  %vm176_vm1 = vweird.f32 %v2552_v30 }
  0xa4   :  { %vm177_vm3 = vmor %vm175_vm2, %vm176_vm1 }
  0xa5   :  { %v172_v32 = vsub.f32 1.0, %v171_v31 }
  0xa7   :  { %v173_v33 = vmul.f32 %v2552_v30, %v172_v32 }
  0xa9   :  { %v174_v34 = vadd.f32 %v2552_v30, %v173_v33 }
  0xab   :  { %v178_v37 = vsel %vm177_vm3, %v2552_v30, %v174_v34 }
  0xac   :  { %v183_v40 = vsel %vm180_vm4, %v182_v38, %v178_v37  ;;  %v2943_v37 = vld [vmem:[%s3804_s0 + $0x10] sm:$0xff] }
 0x101   :  { %v187_v39 = vpop.permute.xlu1 %186 }
 0x102   :  { %v189_v41 = vmul.f32 %v187_v39, %v183_v40 }
 0x104   :  { %191 = vrot.lane.b32.xlu2 %v189_v41, %s2743_s27 }
 0x15e   :  { %v192_v42 = vpop.permute.xlu2 %191 }
 0x15f   :  { %v194_v43 = vadd.f32 %v192_v42, %v139_v25  ;;  %v47_v42 = vld [vmem:[%s3809_s5] sm:$0xff] }
 0x160   :  { %71 = vmatpush.msra.mxu0 %v47_v42 }
 0x161   :  { %2553 = vtanh.f32 %v194_v43  ;;  %v46_v43 = vld [vmem:[%s3808_s4] sm:$0xff] }
 0x162   :  { %2409 = vmatmul.msk.f32.vlgmr.msra.gmra.mxu0 %vm52_vm9, %v46_v43 }
 0x163   :  { %378 = vmatpush.msrb.mxu0 %v2813_v0 }
 0x165   :  { %379 = vmatpush.msrb.mxu0 %v2818_v1 }
 0x167   :  { %v2554_v44 = vpop.eup %2553  ;;  %380 = vmatpush.msrb.mxu0 %v2824_v2 }
 0x168   :  { %197 = vrot.lane.b32.xlu2 %v2554_v44, %s2743_s27 }
 0x169   :  { %381 = vmatpush.msrb.mxu0 %v2836_v6 }
 0x16b   :  { %822 = vmatpush.msra.mxu0 %v2813_v0 }
 0x16d   :  { %823 = vmatpush.msra.mxu0 %v2818_v1 }
 0x16f   :  { %824 = vmatpush.msra.mxu0 %v2824_v2 }
 0x171   :  { %825 = vmatpush.msra.mxu0 %v2836_v6 }
 0x1c2   :  { %v198_v46 = vpop.permute.xlu2 %197 }
 0x1c3   :  { %v200_v47 = vsub.f32 %v2848_v8, %v198_v46 }
 0x1c5   :  { %202 = vrot.lane.b32.xlu1 %v200_v47, %s2745_s19 }
 0x1cd   :  { %212 = vperm.xlu1 %2485, %v2831_v5  }
 0x1d5   :  { %2487 = vset.pattern.permute.xlu1 %v2742_v9 }
 0x1d6   :  { %241 = vperm.xlu1 %2487, %v2413_v56  }
 0x1de   :  { %2489 = vset.pattern.permute.xlu1 %v2744_v45 }
 0x237   :  { %v203_v48 = vpop.permute.xlu1 %202 }
 0x238   :  { %v205_v49 = vmul.f32 %v203_v48, %v183_v40 }
 0x23a   :  { %207 = vrot.lane.b32.xlu2 %v205_v49, %s2745_s19 }
 0x23f   :  { %v2913_v54 = vpop.permute.xlu1 %212 }
 0x248   :  { %v242_v63 = vpop.permute.xlu1 %241 }
 0x249   :  { %v244_v5 = vmul.f32 %v2892_v17, %v242_v63 }
 0x24b   :  { %v245_v11 = vadd.f32 %v244_v5, %v239_v3 }
 0x294   :  { %v208_v50 = vpop.permute.xlu2 %207 }
 0x295   :  { %v2910_v52 = vadd.f32 %v2554_v44, %v208_v50 }
 0x297   :  { %v224_v53 = vsub.f32 %v2910_v52, %v222_v51 }
 0x299   :  { %v225_v55 = vmul.f32 %v224_v53, %v2913_v54 }
 0x29b   :  { %227 = vrot.lane.b32.xlu2 %v225_v55, %s2743_s27  ;;  %v2547_v55 = vld [vmem:[%s3810_s6] ss:$0 sm:$0xff] }
 0x2a3   :  { %247 = vperm.xlu2 %2488, %v2413_v56  }
 0x2f5   :  { %v228_v57 = vpop.permute.xlu2 %227 }
 0x2f6   :  { %v2922_v58 = vadd.f32 %v228_v57, %v2848_v8 }
 0x2f8   :  { %2414 = vmatmul.msk.f32.vlgmr.msra.gmra.mxu3 %vm43_vm0, %v2922_v58 }
 0x2f9   :  { %1155 = vmatpush.msra.mxu3 %v2813_v0 }
 0x2fb   :  { %1156 = vmatpush.msra.mxu3 %v2818_v1 }
 0x2fd   :  { %1157 = vmatpush.msra.mxu3 %v2824_v2  ;;  %v248_v8 = vpop.permute.xlu2 %247 }
 0x2fe   :  { %v250_v12 = vmul.f32 %v2899_v21, %v248_v8 }
 0x2ff   :  { %1158 = vmatpush.msra.mxu3 %v2836_v6 }
 0x300   :  { %v251_v13 = vadd.f32 %v250_v12, %v245_v11 }
 0x37b   :  { %v272_v59 = vpop.f32.mrf.mxu3 }
 0x37c   :  { %v273_v60 = vadd.f32 %v2874_v10, %v272_v59  ;;  %v77_v59 = vld [vmem:[%s3811_s7] sm:$0xff] }
 0x37d   :  { %100 = vmatpush.msra.mxu1 %v77_v59 }
 0x37e   :  { %296 = vrot.lane.b32.xlu1 %v273_v60, %s2743_s27  ;;  %v275_v15 = vadd.f32 %v273_v60, %v251_v13 }
 0x37f   :  { %489 = vmatpush.msrb.mxu1 %v2813_v0 }
 0x380   :  { %v2415_v18 = vmul.f32 -1.442695, %v275_v15 }
 0x381   :  { %490 = vmatpush.msrb.mxu1 %v2818_v1 }
 0x382   :  { %2555 = vpow2.f32 %v2415_v18 }
 0x383   :  { %491 = vmatpush.msrb.mxu1 %v2824_v2 }
 0x385   :  { %492 = vmatpush.msrb.mxu1 %v2836_v6 }
 0x388   :  { %v2556_v19 = vpop.eup %2555 }
 0x389   :  { %v279_v20 = vadd.f32 1.0, %v2556_v19 }
 0x38b   :  { %2557 = vrcp.f32 %v279_v20  ;;  %v291_v27 = vand.u32 2147483648, %v279_v20  ;;  %vm285_vm6 = vweird.f32 %v279_v20  ;;  %v289_v28 = vand.u32 2147483647, %v279_v20 }
 0x38d   :  { %v292_v30 = vor.u32 1.1754944e-38, %v291_v27  ;;  %vm290_vm8 = vcmp.eq.f32.partialorder %v289_v28, 8.507059e+37 }
 0x391   :  { %v2558_v22 = vpop.eup %2557 }
 0x392   :  { %v281_v23 = vmul.f32 %v2558_v22, %v279_v20  ;;  %vm286_vm5 = vweird.f32 %v2558_v22 }
 0x393   :  { %vm287_vm7 = vmor %vm285_vm6, %vm286_vm5 }
 0x394   :  { %v282_v24 = vsub.f32 1.0, %v281_v23  ;;  %v2548_v23 = vld [vmem:[%s3813_s9] ss:$0 sm:$0xff]  ;;  %s2747_s9 = smov 128  }
 0x396   :  { %v283_v25 = vmul.f32 %v2558_v22, %v282_v24 }
 0x398   :  { %v284_v26 = vadd.f32 %v2558_v22, %v283_v25 }
 0x39a   :  { %v288_v29 = vsel %vm287_vm7, %v2558_v22, %v284_v26 }
 0x39b   :  { %v293_v31 = vsel %vm290_vm8, %v292_v30, %v288_v29 }
 0x3f0   :  { %v297_v32 = vpop.permute.xlu1 %296 }
 0x3f1   :  { %v299_v33 = vmul.f32 %v297_v32, %v293_v31 }
 0x3f3   :  { %301 = vrot.lane.b32.xlu2 %v299_v33, %s2743_s27 }
 0x44d   :  { %v302_v34 = vpop.permute.xlu2 %301 }
 0x44e   :  { %v304_v35 = vadd.f32 %v302_v34, %v251_v13 }
 0x450   :  { %2559 = vtanh.f32 %v304_v35 }
 0x456   :  { %v2560_v36 = vpop.eup %2559 }
 0x457   :  { %307 = vrot.lane.b32.xlu0 %v2560_v36, %s2743_s27 }
 0x45f   :  { %332 = vrot.lane.b32.xlu0 %v2922_v58, %s2743_s27 }
 0x467   :  { %346 = vperm.xlu0 %2486, %v2943_v37  }
 0x46f   :  { %2491 = vset.pattern.permute.xlu0 %v2744_v45 }
 0x4c9   :  { %v308_v38 = vpop.permute.xlu0 %307 }
 0x4ca   :  { %v310_v39 = vsub.f32 %v2922_v58, %v308_v38 }
 0x4cc   :  { %312 = vrot.lane.b32.xlu1 %v310_v39, %s2745_s19 }
 0x4d1   :  { %v333_v47 = vpop.permute.xlu0 %332 }
 0x4d4   :  { %322 = vperm.xlu1 %2489, %v2413_v56   ;;  %v73_v56 = vpop.f32.mrf.mxu0 }
 0x4d5   :  { %v74_v57 = vadd.f32 %v2547_v55, %v73_v56 }
 0x4d7   :  { %2561 = vtanh.f32 %v74_v57 }
 0x4d9   :  { %v347_v62 = vpop.permute.xlu0 %346 }
 0x4da   :  { %v349_v3 = vmul.f32 %v2881_v14, %v347_v62 }
 0x4dc   :  { %2490 = vset.pattern.permute.xlu1 %v2742_v9  ;;  %v350_v11 = vadd.f32 %v2887_v16, %v349_v3 }
 0x4dd   :  { %352 = vperm.xlu1 %2490, %v2943_v37  }
 0x53e   :  { %v313_v40 = vpop.permute.xlu1 %312 }
 0x53f   :  { %v315_v41 = vmul.f32 %v313_v40, %v293_v31 }
 0x541   :  { %317 = vrot.lane.b32.xlu2 %v315_v41, %s2745_s19 }
 0x546   :  { %v2970_v49 = vpop.permute.xlu1 %322 }
 0x54f   :  { %v353_v63 = vpop.permute.xlu1 %352 }
 0x550   :  { %v355_v8 = vmul.f32 %v2892_v17, %v353_v63 }
 0x552   :  { %v356_v13 = vadd.f32 %v355_v8, %v350_v11 }
 0x59b   :  { %v318_v44 = vpop.permute.xlu2 %317 }
 0x59c   :  { %v2967_v46 = vadd.f32 %v2560_v36, %v318_v44 }
 0x59e   :  { %v335_v48 = vsub.f32 %v2967_v46, %v333_v47 }
 0x5a0   :  { %v336_v50 = vmul.f32 %v335_v48, %v2970_v49  ;;  %v3021_v48 = vld [vmem:[%s3804_s0 + $0x18] sm:$0xff] }
 0x5a2   :  { %338 = vrot.lane.b32.xlu2 %v336_v50, %s2743_s27 }
 0x5aa   :  { %358 = vperm.xlu2 %2488, %v2943_v37  }
 0x5b2   :  { %2492 = vset.pattern.permute.xlu2 %v2740_v4 }
 0x5fc   :  { %v339_v51 = vpop.permute.xlu2 %338 }
 0x5fd   :  { %v2977_v53 = vadd.f32 %v339_v51, %v2922_v58  ;;  %v2562_v58 = vpop.eup %2561 }
 0x5fe   :  { %2410 = vmatmul.msk.f32.vlgmr.msra.gmra.mxu1 %vm52_vm9, %v2562_v58 }
 0x5ff   :  { %2417 = vmatmul.msk.f32.vlgmr.msrb.gmra.mxu0 %vm43_vm0, %v2977_v53  ;;  %933 = vmatpush.msra.mxu1 %v2813_v0 }
 0x600   :  { %1266 = vmatpush.msrb.mxu0 %v2813_v0 }
 0x601   :  { %934 = vmatpush.msra.mxu1 %v2818_v1 }
 0x602   :  { %1267 = vmatpush.msrb.mxu0 %v2818_v1 }
 0x603   :  { %935 = vmatpush.msra.mxu1 %v2824_v2 }
 0x604   :  { %1268 = vmatpush.msrb.mxu0 %v2824_v2  ;;  %v359_v5 = vpop.permute.xlu2 %358 }
 0x605   :  { %936 = vmatpush.msra.mxu1 %v2836_v6  ;;  %v361_v12 = vmul.f32 %v2899_v21, %v359_v5 }
 0x606   :  { %1269 = vmatpush.msrb.mxu0 %v2836_v6 }
 0x607   :  { %v362_v15 = vadd.f32 %v361_v12, %v356_v13 }
 0x67b   :  { %v102_v25 = vpop.f32.mrf.mxu1 }
 0x67c   :  { %v383_v60 = vpop.f32.mrf.mxu0  ;;  %v103_v26 = vadd.f32 %v2548_v23, %v102_v25 }
 0x67d   :  { %v384_v61 = vadd.f32 %v2874_v10, %v383_v60 }
 0x67e   :  { %105 = vst.msk [vmem:[#allocation3] sm:$0xff] %vm43_vm0, %v103_v26 }
 0x67f   :  { %407 = vrot.lane.b32.xlu0 %v384_v61, %s2743_s27  ;;  %v386_v18 = vadd.f32 %v384_v61, %v362_v15 }
 0x681   :  { %v2418_v19 = vmul.f32 -1.442695, %v386_v18 }
 0x683   :  { %2563 = vpow2.f32 %v2418_v19 }
 0x689   :  { %v2564_v20 = vpop.eup %2563 }
 0x68a   :  { %v390_v22 = vadd.f32 1.0, %v2564_v20 }
 0x68c   :  { %2565 = vrcp.f32 %v390_v22  ;;  %v402_v31 = vand.u32 2147483648, %v390_v22  ;;  %vm396_vm11 = vweird.f32 %v390_v22  ;;  %v400_v32 = vand.u32 2147483647, %v390_v22 }
 0x68e   :  { %v403_v34 = vor.u32 1.1754944e-38, %v402_v31  ;;  %vm401_vm13 = vcmp.eq.f32.partialorder %v400_v32, 8.507059e+37 }
 0x692   :  { %v2566_v24 = vpop.eup %2565 }
 0x693   :  { %v392_v27 = vmul.f32 %v2566_v24, %v390_v22  ;;  %vm397_vm10 = vweird.f32 %v2566_v24 }
 0x694   :  { %vm398_vm12 = vmor %vm396_vm11, %vm397_vm10 }
 0x695   :  { %v393_v28 = vsub.f32 1.0, %v392_v27 }
 0x697   :  { %v394_v29 = vmul.f32 %v2566_v24, %v393_v28 }
 0x699   :  { %v395_v30 = vadd.f32 %v2566_v24, %v394_v29 }
 0x69b   :  { %v399_v33 = vsel %vm398_vm12, %v2566_v24, %v395_v30 }
 0x69c   :  { %v404_v35 = vsel %vm401_vm13, %v403_v34, %v399_v33 }
 0x6f1   :  { %v408_v36 = vpop.permute.xlu0 %407 }
 0x6f2   :  { %v410_v38 = vmul.f32 %v408_v36, %v404_v35 }
 0x6f4   :  { %412 = vrot.lane.b32.xlu1 %v410_v38, %s2743_s27 }
 0x766   :  { %v413_v39 = vpop.permute.xlu1 %412 }
 0x767   :  { %v415_v40 = vadd.f32 %v413_v39, %v362_v15 }
 0x769   :  { %2567 = vtanh.f32 %v415_v40 }
 0x76f   :  { %v2568_v41 = vpop.eup %2567 }
 0x770   :  { %418 = vrot.lane.b32.xlu2 %v2568_v41, %s2743_s27 }
 0x778   :  { %443 = vrot.lane.b32.xlu2 %v2977_v53, %s2743_s27 }
 0x780   :  { %457 = vperm.xlu2 %2492, %v3021_v48  }
 0x788   :  { %2493 = vset.pattern.permute.xlu2 %v2741_v7 }
 0x789   :  { %469 = vperm.xlu2 %2493, %v3021_v48  }
 0x791   :  { %2494 = vset.pattern.permute.xlu2 %v2740_v4 }
 0x7ca   :  { %v419_v42 = vpop.permute.xlu2 %418 }
 0x7cb   :  { %v421_v43 = vsub.f32 %v2977_v53, %v419_v42 }
 0x7cd   :  { %423 = vrot.lane.b32.xlu0 %v421_v43, %s2745_s19 }
 0x7d5   :  { %433 = vperm.xlu0 %2491, %v2943_v37   ;;  %v444_v37 = vpop.permute.xlu2 %443 }
 0x7dd   :  { %v458_v62 = vpop.permute.xlu2 %457 }
 0x7e5   :  { %v470_v8 = vpop.permute.xlu2 %469 }
 0x7e6   :  { %v472_v12 = vmul.f32 %v2899_v21, %v470_v8 }
 0x83f   :  { %v424_v44 = vpop.permute.xlu0 %423 }
 0x840   :  { %v426_v47 = vmul.f32 %v424_v44, %v404_v35 }
 0x842   :  { %428 = vrot.lane.b32.xlu1 %v426_v47, %s2745_s19 }
 0x847   :  { %v3030_v56 = vpop.permute.xlu0 %433 }
 0x8b4   :  { %v429_v50 = vpop.permute.xlu1 %428 }
 0x8b5   :  { %v3027_v51 = vadd.f32 %v2568_v41, %v429_v50 }
 0x8b7   :  { %v446_v55 = vsub.f32 %v3027_v51, %v444_v37 }
 0x8b9   :  { %v447_v57 = vmul.f32 %v446_v55, %v3030_v56 }
 0x8bb   :  { %449 = vrot.lane.b32.xlu1 %v447_v57, %s2743_s27 }
 0x8c3   :  { %463 = vperm.xlu1 %2490, %v3021_v48  }
 0x8cb   :  { %2496 = vset.pattern.permute.xlu1 %v2741_v7 }
 0x92d   :  { %v450_v58 = vpop.permute.xlu1 %449 }
 0x92e   :  { %v3037_v59 = vadd.f32 %v450_v58, %v2977_v53  ;;  %v460_v53 = vmul.f32 %v2881_v14, %v458_v62 }
 0x930   :  { %2420 = vmatmul.msk.f32.vlgmr.msrb.gmra.mxu1 %vm43_vm0, %v3037_v59  ;;  %v461_v3 = vadd.f32 %v2887_v16, %v460_v53 }
 0x931   :  { %1377 = vmatpush.msrb.mxu1 %v2813_v0 }
 0x933   :  { %1378 = vmatpush.msrb.mxu1 %v2818_v1 }
 0x935   :  { %1379 = vmatpush.msrb.mxu1 %v2824_v2  ;;  %v464_v63 = vpop.permute.xlu1 %463 }
 0x936   :  { %v466_v5 = vmul.f32 %v2892_v17, %v464_v63 }
 0x937   :  { %1380 = vmatpush.msrb.mxu1 %v2836_v6 }
 0x938   :  { %v467_v11 = vadd.f32 %v466_v5, %v461_v3 }
 0x93a   :  { %v473_v13 = vadd.f32 %v472_v12, %v467_v11 }
 0x9ad   :  { %v494_v60 = vpop.f32.mrf.mxu1 }
 0x9ae   :  { %v495_v61 = vadd.f32 %v2874_v10, %v494_v60 }
 0x9b0   :  { %518 = vrot.lane.b32.xlu0 %v495_v61, %s2743_s27  ;;  %v497_v15 = vadd.f32 %v495_v61, %v473_v13 }
 0x9b2   :  { %v2421_v18 = vmul.f32 -1.442695, %v497_v15 }
 0x9b4   :  { %2569 = vpow2.f32 %v2421_v18 }
 0x9ba   :  { %v2570_v19 = vpop.eup %2569 }
 0x9bb   :  { %v501_v20 = vadd.f32 1.0, %v2570_v19 }
 0x9bd   :  { %2571 = vrcp.f32 %v501_v20  ;;  %v513_v27 = vand.u32 2147483648, %v501_v20  ;;  %vm507_vm15 = vweird.f32 %v501_v20  ;;  %v511_v28 = vand.u32 2147483647, %v501_v20 }
 0x9bf   :  { %v514_v30 = vor.u32 1.1754944e-38, %v513_v27  ;;  %vm512_vm2 = vcmp.eq.f32.partialorder %v511_v28, 8.507059e+37 }
 0x9c3   :  { %v2572_v22 = vpop.eup %2571 }
 0x9c4   :  { %v503_v23 = vmul.f32 %v2572_v22, %v501_v20  ;;  %vm508_vm14 = vweird.f32 %v2572_v22 }
 0x9c5   :  { %vm509_vm1 = vmor %vm507_vm15, %vm508_vm14 }
 0x9c6   :  { %v504_v24 = vsub.f32 1.0, %v503_v23 }
 0x9c8   :  { %v505_v25 = vmul.f32 %v2572_v22, %v504_v24 }
 0x9ca   :  { %v506_v26 = vadd.f32 %v2572_v22, %v505_v25 }
 0x9cc   :  { %v510_v29 = vsel %vm509_vm1, %v2572_v22, %v506_v26 }
 0x9cd   :  { %v515_v32 = vsel %vm512_vm2, %v514_v30, %v510_v29 }
 0xa22   :  { %v519_v31 = vpop.permute.xlu0 %518 }
 0xa23   :  { %v521_v33 = vmul.f32 %v519_v31, %v515_v32 }
 0xa25   :  { %523 = vrot.lane.b32.xlu1 %v521_v33, %s2743_s27 }
 0xa97   :  { %v524_v34 = vpop.permute.xlu1 %523 }
 0xa98   :  { %v526_v35 = vadd.f32 %v524_v34, %v473_v13 }
 0xa9a   :  { %2573 = vtanh.f32 %v526_v35  ;;  %v3094_v35 = vld [vmem:[%s3804_s0 + $0x28] sm:$0xff] }
 0xaa0   :  { %v2574_v36 = vpop.eup %2573 }
 0xaa1   :  { %529 = vrot.lane.b32.xlu2 %v2574_v36, %s2743_s27 }
 0xaa9   :  { %554 = vrot.lane.b32.xlu2 %v3037_v59, %s2743_s27 }
 0xafb   :  { %v530_v38 = vpop.permute.xlu2 %529 }
 0xafc   :  { %v532_v39 = vsub.f32 %v3037_v59, %v530_v38 }
 0xafe   :  { %534 = vrot.lane.b32.xlu0 %v532_v39, %s2745_s19 }
 0xb03   :  { %v555_v44 = vpop.permute.xlu2 %554 }
 0xb06   :  { %544 = vperm.xlu0 %2491, %v3021_v48   ;;  %v2422_v48 = vld [vmem:[%s3804_s0 + $0x20] sm:$0xff] }
 0xb07   :  { %568 = vperm.xlu2 %2494, %v2422_v48  }
 0xb0e   :  { %2495 = vset.pattern.permute.xlu0 %v2742_v9 }
 0xb0f   :  { %574 = vperm.xlu0 %2495, %v2422_v48  }
 0xb17   :  { %2497 = vset.pattern.permute.xlu0 %v2744_v45 }
 0xb61   :  { %v569_v61 = vpop.permute.xlu2 %568 }
 0xb70   :  { %v535_v40 = vpop.permute.xlu0 %534 }
 0xb71   :  { %v537_v41 = vmul.f32 %v535_v40, %v515_v32 }
 0xb73   :  { %539 = vrot.lane.b32.xlu1 %v537_v41, %s2745_s19 }
 0xb78   :  { %v3063_v50 = vpop.permute.xlu0 %544 }
 0xb81   :  { %v575_v62 = vpop.permute.xlu0 %574 }
 0xb82   :  { %v577_v63 = vmul.f32 %v2892_v17, %v575_v62 }
 0xbe5   :  { %v540_v42 = vpop.permute.xlu1 %539 }
 0xbe6   :  { %v3060_v43 = vadd.f32 %v2574_v36, %v540_v42 }
 0xbe8   :  { %v557_v47 = vsub.f32 %v3060_v43, %v555_v44 }
 0xbea   :  { %v558_v37 = vmul.f32 %v557_v47, %v3063_v50 }
 0xbec   :  { %560 = vrot.lane.b32.xlu1 %v558_v37, %s2743_s27 }
 0xbf4   :  { %580 = vperm.xlu1 %2496, %v2422_v48  }
 0xbfc   :  { %2498 = vset.pattern.permute.xlu1 %v2742_v9 }
 0xc5e   :  { %v561_v55 = vpop.permute.xlu1 %560 }
 0xc5f   :  { %v3073_v57 = vadd.f32 %v561_v55, %v3037_v59  ;;  %v571_v59 = vmul.f32 %v2881_v14, %v569_v61 }
 0xc61   :  { %2423 = vmatmul.msk.f32.vlgmr.msrb.gmra.mxu2 %vm43_vm0, %v3073_v57  ;;  %v572_v53 = vadd.f32 %v2887_v16, %v571_v59 }
 0xc62   :  { %1488 = vmatpush.msrb.mxu2 %v2813_v0 }
 0xc63   :  { %v578_v5 = vadd.f32 %v577_v63, %v572_v53 }
 0xc64   :  { %1489 = vmatpush.msrb.mxu2 %v2818_v1 }
 0xc66   :  { %1490 = vmatpush.msrb.mxu2 %v2824_v2  ;;  %v581_v3 = vpop.permute.xlu1 %580 }
 0xc67   :  { %v583_v8 = vmul.f32 %v2899_v21, %v581_v3 }
 0xc68   :  { %1491 = vmatpush.msrb.mxu2 %v2836_v6 }
 0xc69   :  { %v584_v11 = vadd.f32 %v583_v8, %v578_v5 }
 0xce4   :  { %v605_v58 = vpop.f32.mrf.mxu2 }
 0xce5   :  { %v606_v60 = vadd.f32 %v2874_v10, %v605_v58 }
 0xce7   :  { %629 = vrot.lane.b32.xlu2 %v606_v60, %s2743_s27  ;;  %v608_v12 = vadd.f32 %v606_v60, %v584_v11 }
 0xce9   :  { %v2424_v13 = vmul.f32 -1.442695, %v608_v12 }
 0xceb   :  { %2575 = vpow2.f32 %v2424_v13 }
 0xcf1   :  { %v2576_v15 = vpop.eup %2575 }
 0xcf2   :  { %v612_v18 = vadd.f32 1.0, %v2576_v15 }
 0xcf4   :  { %2577 = vrcp.f32 %v612_v18  ;;  %v624_v25 = vand.u32 2147483648, %v612_v18  ;;  %vm618_vm4 = vweird.f32 %v612_v18  ;;  %v622_v26 = vand.u32 2147483647, %v612_v18 }
 0xcf6   :  { %v625_v28 = vor.u32 1.1754944e-38, %v624_v25  ;;  %vm623_vm6 = vcmp.eq.f32.partialorder %v622_v26, 8.507059e+37 }
 0xcfa   :  { %v2578_v19 = vpop.eup %2577 }
 0xcfb   :  { %v614_v20 = vmul.f32 %v2578_v19, %v612_v18  ;;  %vm619_vm3 = vweird.f32 %v2578_v19 }
 0xcfc   :  { %vm620_vm5 = vmor %vm618_vm4, %vm619_vm3 }
 0xcfd   :  { %v615_v22 = vsub.f32 1.0, %v614_v20 }
 0xcff   :  { %v616_v23 = vmul.f32 %v2578_v19, %v615_v22 }
 0xd01   :  { %v617_v24 = vadd.f32 %v2578_v19, %v616_v23 }
 0xd03   :  { %v621_v27 = vsel %vm620_vm5, %v2578_v19, %v617_v24 }
 0xd04   :  { %v626_v29 = vsel %vm623_vm6, %v625_v28, %v621_v27 }
 0xd41   :  { %v630_v30 = vpop.permute.xlu2 %629 }
 0xd42   :  { %v632_v31 = vmul.f32 %v630_v30, %v626_v29 }
 0xd44   :  { %634 = vrot.lane.b32.xlu1 %v632_v31, %s2743_s27 }
 0xdb6   :  { %v635_v32 = vpop.permute.xlu1 %634 }
 0xdb7   :  { %v637_v33 = vadd.f32 %v635_v32, %v584_v11 }
 0xdb9   :  { %2579 = vtanh.f32 %v637_v33 }
 0xdbf   :  { %v2580_v34 = vpop.eup %2579 }
 0xdc0   :  { %640 = vrot.lane.b32.xlu2 %v2580_v34, %s2743_s27 }
 0xdc8   :  { %665 = vrot.lane.b32.xlu2 %v3073_v57, %s2743_s27 }
 0xdd0   :  { %679 = vperm.xlu2 %2494, %v3094_v35  }
 0xdd8   :  { %2499 = vset.pattern.permute.xlu2 %v2741_v7 }
 0xdd9   :  { %691 = vperm.xlu2 %2499, %v3094_v35  }
 0xde1   :  { %2500 = vset.pattern.permute.xlu2 %v2740_v4 }
 0xe1a   :  { %v641_v36 = vpop.permute.xlu2 %640 }
 0xe1b   :  { %v643_v38 = vsub.f32 %v3073_v57, %v641_v36 }
 0xe1d   :  { %645 = vrot.lane.b32.xlu0 %v643_v38, %s2745_s19 }
 0xe22   :  { %v666_v44 = vpop.permute.xlu2 %665 }
 0xe25   :  { %655 = vperm.xlu0 %2497, %v2422_v48  }
 0xe2a   :  { %v680_v59 = vpop.permute.xlu2 %679 }
 0xe33   :  { %v692_v63 = vpop.permute.xlu2 %691 }
 0xe34   :  { %v694_v8 = vmul.f32 %v2899_v21, %v692_v63 }
 0xe8f   :  { %v646_v39 = vpop.permute.xlu0 %645 }
 0xe90   :  { %v648_v40 = vmul.f32 %v646_v39, %v626_v29 }
 0xe92   :  { %650 = vrot.lane.b32.xlu1 %v648_v40, %s2745_s19 }
 0xe97   :  { %v3106_v37 = vpop.permute.xlu0 %655 }
 0xf04   :  { %v651_v41 = vpop.permute.xlu1 %650 }
 0xf05   :  { %v3103_v42 = vadd.f32 %v2580_v34, %v651_v41 }
 0xf07   :  { %v668_v47 = vsub.f32 %v3103_v42, %v666_v44 }
 0xf09   :  { %v669_v55 = vmul.f32 %v668_v47, %v3106_v37 }
 0xf0b   :  { %671 = vrot.lane.b32.xlu1 %v669_v55, %s2743_s27 }
 0xf13   :  { %685 = vperm.xlu1 %2498, %v3094_v35  }
 0xf1b   :  { %2502 = vset.pattern.permute.xlu1 %v2741_v7 }
 0xf7d   :  { %v672_v48 = vpop.permute.xlu1 %671 }
 0xf7e   :  { %v3113_v58 = vadd.f32 %v672_v48, %v3073_v57  ;;  %v682_v57 = vmul.f32 %v2881_v14, %v680_v59 }
 0xf80   :  { %2426 = vmatmul.msk.f32.vlgmr.msrb.gmra.mxu3 %vm43_vm0, %v3113_v58  ;;  %v683_v3 = vadd.f32 %v2887_v16, %v682_v57 }
 0xf81   :  { %1599 = vmatpush.msrb.mxu3 %v2813_v0 }
 0xf83   :  { %1600 = vmatpush.msrb.mxu3 %v2818_v1 }
 0xf85   :  { %1601 = vmatpush.msrb.mxu3 %v2824_v2  ;;  %v686_v62 = vpop.permute.xlu1 %685 }
 0xf86   :  { %v688_v53 = vmul.f32 %v2892_v17, %v686_v62 }
 0xf87   :  { %1602 = vmatpush.msrb.mxu3 %v2836_v6 }
 0xf88   :  { %v689_v5 = vadd.f32 %v688_v53, %v683_v3 }
 0xf8a   :  { %v695_v11 = vadd.f32 %v694_v8, %v689_v5 }
0x1003   :  { %v716_v60 = vpop.f32.mrf.mxu3 }
0x1004   :  { %v717_v61 = vadd.f32 %v2874_v10, %v716_v60 }
0x1006   :  { %740 = vrot.lane.b32.xlu0 %v717_v61, %s2743_s27  ;;  %v719_v12 = vadd.f32 %v717_v61, %v695_v11 }
0x1008   :  { %v2427_v13 = vmul.f32 -1.442695, %v719_v12 }
0x100a   :  { %2581 = vpow2.f32 %v2427_v13 }
0x1010   :  { %v2582_v15 = vpop.eup %2581 }
0x1011   :  { %v723_v18 = vadd.f32 1.0, %v2582_v15 }
0x1013   :  { %2583 = vrcp.f32 %v723_v18  ;;  %v735_v25 = vand.u32 2147483648, %v723_v18  ;;  %vm729_vm8 = vweird.f32 %v723_v18  ;;  %v733_v26 = vand.u32 2147483647, %v723_v18 }
0x1015   :  { %v736_v28 = vor.u32 1.1754944e-38, %v735_v25  ;;  %vm734_vm10 = vcmp.eq.f32.partialorder %v733_v26, 8.507059e+37 }
0x1019   :  { %v2584_v19 = vpop.eup %2583 }
0x101a   :  { %v725_v20 = vmul.f32 %v2584_v19, %v723_v18  ;;  %vm730_vm7 = vweird.f32 %v2584_v19 }
0x101b   :  { %vm731_vm9 = vmor %vm729_vm8, %vm730_vm7 }
0x101c   :  { %v726_v22 = vsub.f32 1.0, %v725_v20 }
0x101e   :  { %v727_v23 = vmul.f32 %v2584_v19, %v726_v22 }
0x1020   :  { %v728_v24 = vadd.f32 %v2584_v19, %v727_v23 }
0x1022   :  { %v732_v27 = vsel %vm731_vm9, %v2584_v19, %v728_v24 }
0x1023   :  { %v737_v30 = vsel %vm734_vm10, %v736_v28, %v732_v27  ;;  %v3170_v28 = vld [vmem:[%s3804_s0 + $0x38] sm:$0xff] }
0x1078   :  { %v741_v29 = vpop.permute.xlu0 %740 }
0x1079   :  { %v743_v31 = vmul.f32 %v741_v29, %v737_v30 }
0x107b   :  { %745 = vrot.lane.b32.xlu1 %v743_v31, %s2743_s27 }
0x10ed   :  { %v746_v32 = vpop.permute.xlu1 %745 }
0x10ee   :  { %v748_v33 = vadd.f32 %v746_v32, %v695_v11 }
0x10f0   :  { %2585 = vtanh.f32 %v748_v33 }
0x10f6   :  { %v2586_v34 = vpop.eup %2585 }
0x10f7   :  { %751 = vrot.lane.b32.xlu2 %v2586_v34, %s2743_s27 }
0x10ff   :  { %776 = vrot.lane.b32.xlu2 %v3113_v58, %s2743_s27 }
0x1151   :  { %v752_v36 = vpop.permute.xlu2 %751 }
0x1152   :  { %v754_v38 = vsub.f32 %v3113_v58, %v752_v36 }
0x1154   :  { %756 = vrot.lane.b32.xlu0 %v754_v38, %s2745_s19 }
0x1159   :  { %v777_v47 = vpop.permute.xlu2 %776 }
0x115c   :  { %766 = vperm.xlu0 %2497, %v3094_v35   ;;  %v2428_v35 = vld [vmem:[%s3804_s0 + $0x30] sm:$0xff] }
0x115d   :  { %790 = vperm.xlu2 %2500, %v2428_v35  }
0x1164   :  { %2501 = vset.pattern.permute.xlu0 %v2742_v9 }
0x1165   :  { %796 = vperm.xlu0 %2501, %v2428_v35  }
0x116d   :  { %2503 = vset.pattern.permute.xlu0 %v2744_v45 }
0x11b7   :  { %v791_v53 = vpop.permute.xlu2 %790 }
0x11c6   :  { %v757_v39 = vpop.permute.xlu0 %756 }
0x11c7   :  { %v759_v40 = vmul.f32 %v757_v39, %v737_v30 }
0x11c9   :  { %761 = vrot.lane.b32.xlu1 %v759_v40, %s2745_s19 }
0x11ce   :  { %v3139_v48 = vpop.permute.xlu0 %766 }
0x11d7   :  { %v797_v63 = vpop.permute.xlu0 %796 }
0x11d8   :  { %v799_v5 = vmul.f32 %v2892_v17, %v797_v63  ;;  %v3227_v63 = vld [vmem:[%s3805_s1] ss:$0 sm:$0xff] }
0x123b   :  { %v762_v41 = vpop.permute.xlu1 %761 }
0x123c   :  { %v3136_v44 = vadd.f32 %v2586_v34, %v762_v41 }
0x123e   :  { %v779_v55 = vsub.f32 %v3136_v44, %v777_v47 }
0x1240   :  { %v780_v60 = vmul.f32 %v779_v55, %v3139_v48  ;;  %v3196_v55 = vld [vmem:[%s3806_s2 + $0x18] sm:$0xff] }
0x1242   :  { %782 = vrot.lane.b32.xlu1 %v780_v60, %s2743_s27  ;;  %v3202_v60 = vld [vmem:[%s3806_s2 + $0x10] sm:$0xff] }
0x124a   :  { %802 = vperm.xlu1 %2502, %v2428_v35  }
0x1252   :  { %2504 = vset.pattern.permute.xlu1 %v2742_v9 }
0x12b4   :  { %v783_v61 = vpop.permute.xlu1 %782 }
0x12b5   :  { %v3149_v59 = vadd.f32 %v783_v61, %v3113_v58  ;;  %v793_v58 = vmul.f32 %v2881_v14, %v791_v53  ;;  %v3214_v61 = vld [vmem:[%s3806_s2] sm:$0xff] }
0x12b7   :  { %2429 = vmatmul.msk.f32.vlgmr.msra.gmra.mxu0 %vm43_vm0, %v3149_v59  ;;  %v794_v3 = vadd.f32 %v2887_v16, %v793_v58 }
0x12b8   :  { %1710 = vmatpush.msra.mxu0 %v2813_v0 }
0x12b9   :  { %v800_v8 = vadd.f32 %v799_v5, %v794_v3  ;;  %v3233_v5 = vld [vmem:[%s3805_s1 + $0x1] ss:$0 sm:$0xff] }
0x12ba   :  { %1711 = vmatpush.msra.mxu0 %v2818_v1 }
0x12bc   :  { %1712 = vmatpush.msra.mxu0 %v2824_v2  ;;  %v803_v0 = vpop.permute.xlu1 %802 }
0x12bd   :  { %v805_v1 = vmul.f32 %v2899_v21, %v803_v0 }
0x12be   :  { %1713 = vmatpush.msra.mxu0 %v2836_v6 }
0x12bf   :  { %v806_v2 = vadd.f32 %v805_v1, %v800_v8  ;;  %v3239_v1 = vld [vmem:[%s3807_s3] ss:$0 sm:$0xff] }
0x1334   :  { %v827_v62 = vpop.f32.mrf.mxu0 }
0x1335   :  { %v828_v57 = vadd.f32 %v2874_v10, %v827_v62  ;;  %v3220_v62 = vld [vmem:[%s3807_s3 + $0x1] ss:$0 sm:$0xff] }
0x1337   :  { %851 = vrot.lane.b32.xlu2 %v828_v57, %s2743_s27  ;;  %v830_v11 = vadd.f32 %v828_v57, %v806_v2 }
0x1339   :  { %v2430_v6 = vmul.f32 -1.442695, %v830_v11 }
0x133b   :  { %2587 = vpow2.f32 %v2430_v6  ;;  %v3245_v6 = vld [vmem:[%s3805_s1 + $0x2] ss:$0 sm:$0xff] }
0x1341   :  { %v2588_v12 = vpop.eup %2587 }
0x1342   :  { %v834_v10 = vadd.f32 1.0, %v2588_v12 }
0x1344   :  { %2589 = vrcp.f32 %v834_v10  ;;  %v846_v16 = vand.u32 2147483648, %v834_v10  ;;  %vm840_vm12 = vweird.f32 %v834_v10  ;;  %v844_v17 = vand.u32 2147483647, %v834_v10 }
0x1346   :  { %v847_v22 = vor.u32 1.1754944e-38, %v846_v16  ;;  %vm845_vm14 = vcmp.eq.f32.partialorder %v844_v17, 8.507059e+37 }
0x134a   :  { %v2590_v13 = vpop.eup %2589 }
0x134b   :  { %v836_v15 = vmul.f32 %v2590_v13, %v834_v10  ;;  %vm841_vm11 = vweird.f32 %v2590_v13 }
0x134c   :  { %vm842_vm13 = vmor %vm840_vm12, %vm841_vm11 }
0x134d   :  { %v837_v18 = vsub.f32 1.0, %v836_v15 }
0x134f   :  { %v838_v14 = vmul.f32 %v2590_v13, %v837_v18 }
0x1351   :  { %v839_v19 = vadd.f32 %v2590_v13, %v838_v14 }
0x1353   :  { %v843_v20 = vsel %vm842_vm13, %v2590_v13, %v839_v19 }
0x1354   :  { %v848_v21 = vsel %vm845_vm14, %v847_v22, %v843_v20 }
0x1391   :  { %v852_v23 = vpop.permute.xlu2 %851 }
0x1392   :  { %v854_v24 = vmul.f32 %v852_v23, %v848_v21 }
0x1394   :  { %856 = vrot.lane.b32.xlu1 %v854_v24, %s2743_s27 }
0x1406   :  { %v857_v25 = vpop.permute.xlu1 %856 }
0x1407   :  { %v859_v26 = vadd.f32 %v857_v25, %v806_v2 }
0x1409   :  { %2591 = vtanh.f32 %v859_v26 }
0x140f   :  { %v2592_v27 = vpop.eup %2591 }
0x1410   :  { %862 = vrot.lane.b32.xlu2 %v2592_v27, %s2743_s27 }
0x1418   :  { %887 = vrot.lane.b32.xlu2 %v3149_v59, %s2743_s27 }
0x1420   :  { %901 = vperm.xlu2 %2500, %v3170_v28  }
0x1428   :  { %2505 = vset.pattern.permute.xlu2 %v2741_v7 }
0x1429   :  { %913 = vperm.xlu2 %2505, %v3170_v28  }
0x1431   :  { %2506 = vset.pattern.permute.xlu2 %v2740_v4 }
0x146a   :  { %v863_v29 = vpop.permute.xlu2 %862 }
0x146b   :  { %v865_v30 = vsub.f32 %v3149_v59, %v863_v29 }
0x146d   :  { %867 = vrot.lane.b32.xlu0 %v865_v30, %s2745_s19 }
0x1472   :  { %v888_v36 = vpop.permute.xlu2 %887 }
0x1475   :  { %877 = vperm.xlu0 %2503, %v2428_v35   ;;  %v3208_v35 = vld [vmem:[%s3806_s2 + $0x8] sm:$0xff]  ;;  %s2381_s2 = sshll.u32 %s3814_s10, 4  ;;  %s2382_s2 = int_to_ptr.hbm [resolvable:$true] %s2381_s2 }
0x147a   :  { %v902_v53 = vpop.permute.xlu2 %901 }
0x147b   :  { %v904_v3 = vmul.f32 %v3227_v63, %v902_v53 }
0x147d   :  { %v905_v2 = vadd.f32 %v3239_v1, %v904_v3 }
0x1483   :  { %v914_v8 = vpop.permute.xlu2 %913 }
0x1484   :  { %v916_v12 = vmul.f32 %v3245_v6, %v914_v8 }
0x14df   :  { %v868_v31 = vpop.permute.xlu0 %867 }
0x14e0   :  { %v870_v32 = vmul.f32 %v868_v31, %v848_v21 }
0x14e2   :  { %872 = vrot.lane.b32.xlu1 %v870_v32, %s2745_s19 }
0x14e7   :  { %v3182_v39 = vpop.permute.xlu0 %877 }
0x1554   :  { %v873_v33 = vpop.permute.xlu1 %872 }
0x1555   :  { %v3179_v34 = vadd.f32 %v2592_v27, %v873_v33 }
0x1557   :  { %v890_v38 = vsub.f32 %v3179_v34, %v888_v36 }
0x1559   :  { %v891_v40 = vmul.f32 %v890_v38, %v3182_v39 }
0x155b   :  { %893 = vrot.lane.b32.xlu1 %v891_v40, %s2743_s27 }
0x1563   :  { %907 = vperm.xlu1 %2504, %v3170_v28  }
0x156b   :  { %2508 = vset.pattern.permute.xlu1 %v2741_v7 }
0x15cd   :  { %v894_v41 = vpop.permute.xlu1 %893 }
0x15ce   :  { %v3189_v47 = vadd.f32 %v894_v41, %v3149_v59 }
0x15d0   :  { %2432 = vmatmul.msk.f32.vlgmr.msra.gmra.mxu1 %vm43_vm0, %v3189_v47 }
0x15d1   :  { %1821 = vmatpush.msra.mxu1 %v3196_v55 }
0x15d3   :  { %1822 = vmatpush.msra.mxu1 %v3202_v60 }
0x15d5   :  { %1823 = vmatpush.msra.mxu1 %v3208_v35  ;;  %v908_v58 = vpop.permute.xlu1 %907 }
0x15d6   :  { %v910_v0 = vmul.f32 %v3233_v5, %v908_v58 }
0x15d7   :  { %1824 = vmatpush.msra.mxu1 %v3214_v61 }
0x15d8   :  { %v911_v11 = vadd.f32 %v910_v0, %v905_v2 }
0x15da   :  { %v917_v10 = vadd.f32 %v916_v12, %v911_v11 }
0x164d   :  { %v938_v59 = vpop.f32.mrf.mxu1 }
0x164e   :  { %v939_v57 = vadd.f32 %v3220_v62, %v938_v59 }
0x1650   :  { %962 = vrot.lane.b32.xlu0 %v939_v57, %s2743_s27  ;;  %v941_v13 = vadd.f32 %v939_v57, %v917_v10 }
0x1652   :  { %v2433_v15 = vmul.f32 -1.442695, %v941_v13 }
0x1654   :  { %2593 = vpow2.f32 %v2433_v15 }
0x165a   :  { %v2594_v18 = vpop.eup %2593 }
0x165b   :  { %v945_v14 = vadd.f32 1.0, %v2594_v18 }
0x165d   :  { %2595 = vrcp.f32 %v945_v14  ;;  %v957_v21 = vand.u32 2147483648, %v945_v14  ;;  %vm951_vm1 = vweird.f32 %v945_v14  ;;  %v955_v23 = vand.u32 2147483647, %v945_v14 }
0x165f   :  { %v958_v25 = vor.u32 1.1754944e-38, %v957_v21  ;;  %vm956_vm3 = vcmp.eq.f32.partialorder %v955_v23, 8.507059e+37 }
0x1663   :  { %v2596_v19 = vpop.eup %2595 }
0x1664   :  { %v947_v16 = vmul.f32 %v2596_v19, %v945_v14  ;;  %vm952_vm15 = vweird.f32 %v2596_v19 }
0x1665   :  { %vm953_vm2 = vmor %vm951_vm1, %vm952_vm15 }
0x1666   :  { %v948_v17 = vsub.f32 1.0, %v947_v16 }
0x1668   :  { %v949_v20 = vmul.f32 %v2596_v19, %v948_v17 }
0x166a   :  { %v950_v22 = vadd.f32 %v2596_v19, %v949_v20 }
0x166c   :  { %v954_v24 = vsel %vm953_vm2, %v2596_v19, %v950_v22 }
0x166d   :  { %v959_v27 = vsel %vm956_vm3, %v958_v25, %v954_v24 }
0x16c2   :  { %v963_v26 = vpop.permute.xlu0 %962 }
0x16c3   :  { %v965_v29 = vmul.f32 %v963_v26, %v959_v27 }
0x16c5   :  { %967 = vrot.lane.b32.xlu1 %v965_v29, %s2743_s27 }
0x1737   :  { %v968_v30 = vpop.permute.xlu1 %967 }
0x1738   :  { %v970_v31 = vadd.f32 %v968_v30, %v917_v10 }
0x173a   :  { %2597 = vtanh.f32 %v970_v31 }
0x1740   :  { %v2598_v32 = vpop.eup %2597 }
0x1741   :  { %973 = vrot.lane.b32.xlu2 %v2598_v32, %s2743_s27 }
0x1749   :  { %998 = vrot.lane.b32.xlu2 %v3189_v47, %s2743_s27 }
0x179b   :  { %v974_v33 = vpop.permute.xlu2 %973 }
0x179c   :  { %v976_v36 = vsub.f32 %v3189_v47, %v974_v33 }
0x179e   :  { %978 = vrot.lane.b32.xlu0 %v976_v36, %s2745_s19 }
0x17a3   :  { %v999_v57 = vpop.permute.xlu2 %998 }
0x17a6   :  { %988 = vperm.xlu0 %2503, %v3170_v28   ;;  %v2434_v28 = vld [vmem:[%s3804_s0 + $0x40] sm:$0xff] }
0x17a7   :  { %1012 = vperm.xlu2 %2506, %v2434_v28  }
0x17ae   :  { %2507 = vset.pattern.permute.xlu0 %v2742_v9 }
0x17af   :  { %1018 = vperm.xlu0 %2507, %v2434_v28  }
0x17b7   :  { %2509 = vset.pattern.permute.xlu0 %v2744_v45 }
0x1801   :  { %v1013_v12 = vpop.permute.xlu2 %1012 }
0x1810   :  { %v979_v38 = vpop.permute.xlu0 %978 }
0x1811   :  { %v981_v40 = vmul.f32 %v979_v38, %v959_v27 }
0x1813   :  { %983 = vrot.lane.b32.xlu1 %v981_v40, %s2745_s19 }
0x1818   :  { %v3260_v58 = vpop.permute.xlu0 %988 }
0x1821   :  { %v1019_v10 = vpop.permute.xlu0 %1018 }
0x1822   :  { %v1021_v15 = vmul.f32 %v3233_v5, %v1019_v10 }
0x1885   :  { %v984_v41 = vpop.permute.xlu1 %983 }
0x1886   :  { %v3257_v59 = vadd.f32 %v2598_v32, %v984_v41 }
0x1888   :  { %v1001_v53 = vsub.f32 %v3257_v59, %v999_v57 }
0x188a   :  { %v1002_v3 = vmul.f32 %v1001_v53, %v3260_v58  ;;  %v3291_v53 = vld [vmem:[%s3804_s0 + $0x48] sm:$0xff] }
0x188c   :  { %1004 = vrot.lane.b32.xlu1 %v1002_v3, %s2743_s27 }
0x1894   :  { %1024 = vperm.xlu1 %2508, %v2434_v28  }
0x189c   :  { %2510 = vset.pattern.permute.xlu1 %v2742_v9 }
0x18fe   :  { %v1005_v0 = vpop.permute.xlu1 %1004 }
0x18ff   :  { %v3270_v8 = vadd.f32 %v1005_v0, %v3189_v47  ;;  %v1015_v47 = vmul.f32 %v3227_v63, %v1013_v12 }
0x1901   :  { %2435 = vmatmul.msk.f32.vlgmr.msra.gmra.mxu2 %vm43_vm0, %v3270_v8  ;;  %v1016_v13 = vadd.f32 %v3239_v1, %v1015_v47 }
0x1902   :  { %1932 = vmatpush.msra.mxu2 %v3196_v55 }
0x1903   :  { %v1022_v14 = vadd.f32 %v1021_v15, %v1016_v13 }
0x1904   :  { %1933 = vmatpush.msra.mxu2 %v3202_v60 }
0x1906   :  { %1934 = vmatpush.msra.mxu2 %v3208_v35  ;;  %v1025_v18 = vpop.permute.xlu1 %1024 }
0x1907   :  { %v1027_v19 = vmul.f32 %v3245_v6, %v1025_v18 }
0x1908   :  { %1935 = vmatpush.msra.mxu2 %v3214_v61 }
0x1909   :  { %v1028_v16 = vadd.f32 %v1027_v19, %v1022_v14 }
0x1984   :  { %v1049_v2 = vpop.f32.mrf.mxu2 }
0x1985   :  { %v1050_v11 = vadd.f32 %v3220_v62, %v1049_v2 }
0x1987   :  { %1073 = vrot.lane.b32.xlu2 %v1050_v11, %s2743_s27  ;;  %v1052_v17 = vadd.f32 %v1050_v11, %v1028_v16 }
0x1989   :  { %v2436_v20 = vmul.f32 -1.442695, %v1052_v17 }
0x198b   :  { %2599 = vpow2.f32 %v2436_v20 }
0x1991   :  { %v2600_v22 = vpop.eup %2599 }
0x1992   :  { %v1056_v21 = vadd.f32 1.0, %v2600_v22 }
0x1994   :  { %2601 = vrcp.f32 %v1056_v21  ;;  %v1068_v29 = vand.u32 2147483648, %v1056_v21  ;;  %vm1062_vm5 = vweird.f32 %v1056_v21  ;;  %v1066_v30 = vand.u32 2147483647, %v1056_v21 }
0x1996   :  { %v1069_v32 = vor.u32 1.1754944e-38, %v1068_v29  ;;  %vm1067_vm7 = vcmp.eq.f32.partialorder %v1066_v30, 8.507059e+37 }
0x199a   :  { %v2602_v23 = vpop.eup %2601 }
0x199b   :  { %v1058_v24 = vmul.f32 %v2602_v23, %v1056_v21  ;;  %vm1063_vm4 = vweird.f32 %v2602_v23 }
0x199c   :  { %vm1064_vm6 = vmor %vm1062_vm5, %vm1063_vm4 }
0x199d   :  { %v1059_v25 = vsub.f32 1.0, %v1058_v24 }
0x199f   :  { %v1060_v26 = vmul.f32 %v2602_v23, %v1059_v25 }
0x19a1   :  { %v1061_v27 = vadd.f32 %v2602_v23, %v1060_v26 }
0x19a3   :  { %v1065_v31 = vsel %vm1064_vm6, %v2602_v23, %v1061_v27 }
0x19a4   :  { %v1070_v33 = vsel %vm1067_vm7, %v1069_v32, %v1065_v31 }
0x19e1   :  { %v1074_v36 = vpop.permute.xlu2 %1073 }
0x19e2   :  { %v1076_v38 = vmul.f32 %v1074_v36, %v1070_v33 }
0x19e4   :  { %1078 = vrot.lane.b32.xlu1 %v1076_v38, %s2743_s27 }
0x1a56   :  { %v1079_v40 = vpop.permute.xlu1 %1078 }
0x1a57   :  { %v1081_v41 = vadd.f32 %v1079_v40, %v1028_v16 }
0x1a59   :  { %2603 = vtanh.f32 %v1081_v41 }
0x1a5f   :  { %v2604_v57 = vpop.eup %2603 }
0x1a60   :  { %1084 = vrot.lane.b32.xlu2 %v2604_v57, %s2743_s27 }
0x1a68   :  { %1109 = vrot.lane.b32.xlu2 %v3270_v8, %s2743_s27 }
0x1a70   :  { %1123 = vperm.xlu2 %2506, %v3291_v53  }
0x1a78   :  { %2511 = vset.pattern.permute.xlu2 %v2741_v7 }
0x1a79   :  { %1135 = vperm.xlu2 %2511, %v3291_v53  }
0x1a81   :  { %2512 = vset.pattern.permute.xlu2 %v2740_v4 }
0x1aba   :  { %v1085_v3 = vpop.permute.xlu2 %1084 }
0x1abb   :  { %v1087_v0 = vsub.f32 %v3270_v8, %v1085_v3 }
0x1abd   :  { %1089 = vrot.lane.b32.xlu0 %v1087_v0, %s2745_s19 }
0x1ac2   :  { %v1110_v10 = vpop.permute.xlu2 %1109 }
0x1ac5   :  { %1099 = vperm.xlu0 %2509, %v2434_v28  }
0x1aca   :  { %v1124_v17 = vpop.permute.xlu2 %1123 }
0x1ad3   :  { %v1136_v21 = vpop.permute.xlu2 %1135 }
0x1ad4   :  { %v1138_v25 = vmul.f32 %v3245_v6, %v1136_v21 }
0x1b2f   :  { %v1090_v2 = vpop.permute.xlu0 %1089 }
0x1b30   :  { %v1092_v11 = vmul.f32 %v1090_v2, %v1070_v33 }
0x1b32   :  { %1094 = vrot.lane.b32.xlu1 %v1092_v11, %s2745_s19 }
0x1b37   :  { %v3303_v15 = vpop.permute.xlu0 %1099 }
0x1ba4   :  { %v1095_v12 = vpop.permute.xlu1 %1094 }
0x1ba5   :  { %v3300_v47 = vadd.f32 %v2604_v57, %v1095_v12 }
0x1ba7   :  { %v1112_v13 = vsub.f32 %v3300_v47, %v1110_v10 }
0x1ba9   :  { %v1113_v18 = vmul.f32 %v1112_v13, %v3303_v15 }
0x1bab   :  { %1115 = vrot.lane.b32.xlu1 %v1113_v18, %s2743_s27 }
0x1bb3   :  { %1129 = vperm.xlu1 %2510, %v3291_v53  }
0x1bbb   :  { %2514 = vset.pattern.permute.xlu1 %v2741_v7 }
0x1c1d   :  { %v1116_v28 = vpop.permute.xlu1 %1115 }
0x1c1e   :  { %v3310_v14 = vadd.f32 %v1116_v28, %v3270_v8  ;;  %v1126_v8 = vmul.f32 %v3227_v63, %v1124_v17 }
0x1c20   :  { %2438 = vmatmul.msk.f32.vlgmr.msra.gmra.mxu3 %vm43_vm0, %v3310_v14  ;;  %v1127_v23 = vadd.f32 %v3239_v1, %v1126_v8 }
0x1c21   :  { %2043 = vmatpush.msra.mxu3 %v3196_v55 }
0x1c23   :  { %2044 = vmatpush.msra.mxu3 %v3202_v60 }
0x1c25   :  { %2045 = vmatpush.msra.mxu3 %v3208_v35  ;;  %v1130_v20 = vpop.permute.xlu1 %1129 }
0x1c26   :  { %v1132_v22 = vmul.f32 %v3233_v5, %v1130_v20 }
0x1c27   :  { %2046 = vmatpush.msra.mxu3 %v3214_v61 }
0x1c28   :  { %v1133_v24 = vadd.f32 %v1132_v22, %v1127_v23 }
0x1c2a   :  { %v1139_v26 = vadd.f32 %v1138_v25, %v1133_v24 }
0x1ca3   :  { %v1160_v19 = vpop.f32.mrf.mxu3 }
0x1ca4   :  { %v1161_v16 = vadd.f32 %v3220_v62, %v1160_v19 }
0x1ca6   :  { %1184 = vrot.lane.b32.xlu0 %v1161_v16, %s2743_s27  ;;  %v1163_v27 = vadd.f32 %v1161_v16, %v1139_v26 }
0x1ca8   :  { %v2439_v29 = vmul.f32 -1.442695, %v1163_v27 }
0x1caa   :  { %2605 = vpow2.f32 %v2439_v29 }
0x1cb0   :  { %v2606_v30 = vpop.eup %2605 }
0x1cb1   :  { %v1167_v31 = vadd.f32 1.0, %v2606_v30 }
0x1cb3   :  { %2607 = vrcp.f32 %v1167_v31  ;;  %v1179_v41 = vand.u32 2147483648, %v1167_v31  ;;  %vm1173_vm9 = vweird.f32 %v1167_v31  ;;  %v1177_v57 = vand.u32 2147483647, %v1167_v31 }
0x1cb5   :  { %v1180_v0 = vor.u32 1.1754944e-38, %v1179_v41  ;;  %vm1178_vm11 = vcmp.eq.f32.partialorder %v1177_v57, 8.507059e+37 }
0x1cb9   :  { %v2608_v32 = vpop.eup %2607 }
0x1cba   :  { %v1169_v33 = vmul.f32 %v2608_v32, %v1167_v31  ;;  %vm1174_vm8 = vweird.f32 %v2608_v32 }
0x1cbb   :  { %vm1175_vm10 = vmor %vm1173_vm9, %vm1174_vm8 }
0x1cbc   :  { %v1170_v36 = vsub.f32 1.0, %v1169_v33 }
0x1cbe   :  { %v1171_v38 = vmul.f32 %v2608_v32, %v1170_v36 }
0x1cc0   :  { %v1172_v40 = vadd.f32 %v2608_v32, %v1171_v38 }
0x1cc2   :  { %v1176_v3 = vsel %vm1175_vm10, %v2608_v32, %v1172_v40 }
0x1cc3   :  { %v1181_v11 = vsel %vm1178_vm11, %v1180_v0, %v1176_v3 }
0x1d18   :  { %v1185_v2 = vpop.permute.xlu0 %1184 }
0x1d19   :  { %v1187_v12 = vmul.f32 %v1185_v2, %v1181_v11 }
0x1d1b   :  { %1189 = vrot.lane.b32.xlu1 %v1187_v12, %s2743_s27 }
0x1d8d   :  { %v1190_v10 = vpop.permute.xlu1 %1189 }
0x1d8e   :  { %v1192_v13 = vadd.f32 %v1190_v10, %v1139_v26 }
0x1d90   :  { %2609 = vtanh.f32 %v1192_v13 }
0x1d96   :  { %v2610_v18 = vpop.eup %2609 }
0x1d97   :  { %1195 = vrot.lane.b32.xlu2 %v2610_v18, %s2743_s27 }
0x1d9f   :  { %1220 = vrot.lane.b32.xlu2 %v3310_v14, %s2743_s27 }
0x1df1   :  { %v1196_v28 = vpop.permute.xlu2 %1195 }
0x1df2   :  { %v1198_v19 = vsub.f32 %v3310_v14, %v1196_v28 }
0x1df4   :  { %1200 = vrot.lane.b32.xlu0 %v1198_v19, %s2745_s19 }
0x1df9   :  { %v1221_v22 = vpop.permute.xlu2 %1220 }
0x1dfc   :  { %1210 = vperm.xlu0 %2509, %v3291_v53   ;;  %v2440_v53 = vld [vmem:[%s3804_s0 + $0x50] sm:$0xff] }
0x1dfd   :  { %1234 = vperm.xlu2 %2512, %v2440_v53  }
0x1e04   :  { %2513 = vset.pattern.permute.xlu0 %v2742_v9 }
0x1e05   :  { %1240 = vperm.xlu0 %2513, %v2440_v53  }
0x1e0d   :  { %2515 = vset.pattern.permute.xlu0 %v2744_v45 }
0x1e57   :  { %v1235_v30 = vpop.permute.xlu2 %1234 }
0x1e66   :  { %v1201_v16 = vpop.permute.xlu0 %1200 }
0x1e67   :  { %v1203_v17 = vmul.f32 %v1201_v16, %v1181_v11 }
0x1e69   :  { %1205 = vrot.lane.b32.xlu1 %v1203_v17, %s2745_s19 }
0x1e6e   :  { %v3336_v23 = vpop.permute.xlu0 %1210 }
0x1e77   :  { %v1241_v31 = vpop.permute.xlu0 %1240 }
0x1e78   :  { %v1243_v33 = vmul.f32 %v3233_v5, %v1241_v31 }
0x1edb   :  { %v1206_v20 = vpop.permute.xlu1 %1205 }
0x1edc   :  { %v3333_v8 = vadd.f32 %v2610_v18, %v1206_v20 }
0x1ede   :  { %v1223_v21 = vsub.f32 %v3333_v8, %v1221_v22 }
0x1ee0   :  { %v1224_v24 = vmul.f32 %v1223_v21, %v3336_v23 }
0x1ee2   :  { %1226 = vrot.lane.b32.xlu1 %v1224_v24, %s2743_s27 }
0x1eea   :  { %1246 = vperm.xlu1 %2514, %v2440_v53  }
0x1ef2   :  { %2516 = vset.pattern.permute.xlu1 %v2742_v9 }
0x1f54   :  { %v1227_v25 = vpop.permute.xlu1 %1226 }
0x1f55   :  { %v3346_v26 = vadd.f32 %v1227_v25, %v3310_v14  ;;  %v1237_v14 = vmul.f32 %v3227_v63, %v1235_v30 }
0x1f57   :  { %2441 = vmatmul.msk.f32.vlgmr.msrb.gmra.mxu0 %vm43_vm0, %v3346_v26  ;;  %v1238_v32 = vadd.f32 %v3239_v1, %v1237_v14 }
0x1f58   :  { %2154 = vmatpush.msrb.mxu0 %v3196_v55 }
0x1f59   :  { %v1244_v38 = vadd.f32 %v1243_v33, %v1238_v32 }
0x1f5a   :  { %2155 = vmatpush.msrb.mxu0 %v3202_v60 }
0x1f5c   :  { %2156 = vmatpush.msrb.mxu0 %v3208_v35  ;;  %v1247_v36 = vpop.permute.xlu1 %1246 }
0x1f5d   :  { %v1249_v40 = vmul.f32 %v3245_v6, %v1247_v36 }
0x1f5e   :  { %2157 = vmatpush.msrb.mxu0 %v3214_v61 }
0x1f5f   :  { %v1250_v41 = vadd.f32 %v1249_v40, %v1244_v38 }
0x1fd4   :  { %v1271_v27 = vpop.f32.mrf.mxu0 }
0x1fd5   :  { %v1272_v29 = vadd.f32 %v3220_v62, %v1271_v27 }
0x1fd7   :  { %1295 = vrot.lane.b32.xlu2 %v1272_v29, %s2743_s27  ;;  %v1274_v57 = vadd.f32 %v1272_v29, %v1250_v41  ;;  %v3367_v29 = vld [vmem:[%s3804_s0 + $0x58] sm:$0xff] }
0x1fd9   :  { %v2442_v3 = vmul.f32 -1.442695, %v1274_v57 }
0x1fdb   :  { %2611 = vpow2.f32 %v2442_v3 }
0x1fe1   :  { %v2612_v0 = vpop.eup %2611 }
0x1fe2   :  { %v1278_v2 = vadd.f32 1.0, %v2612_v0 }
0x1fe4   :  { %2613 = vrcp.f32 %v1278_v2  ;;  %v1290_v28 = vand.u32 2147483648, %v1278_v2  ;;  %vm1284_vm13 = vweird.f32 %v1278_v2  ;;  %v1288_v19 = vand.u32 2147483647, %v1278_v2 }
0x1fe6   :  { %v1291_v17 = vor.u32 1.1754944e-38, %v1290_v28  ;;  %vm1289_vm15 = vcmp.eq.f32.partialorder %v1288_v19, 8.507059e+37 }
0x1fea   :  { %v2614_v11 = vpop.eup %2613 }
0x1feb   :  { %v1280_v12 = vmul.f32 %v2614_v11, %v1278_v2  ;;  %vm1285_vm12 = vweird.f32 %v2614_v11 }
0x1fec   :  { %vm1286_vm14 = vmor %vm1284_vm13, %vm1285_vm12 }
0x1fed   :  { %v1281_v10 = vsub.f32 1.0, %v1280_v12 }
0x1fef   :  { %v1282_v13 = vmul.f32 %v2614_v11, %v1281_v10 }
0x1ff1   :  { %v1283_v18 = vadd.f32 %v2614_v11, %v1282_v13 }
0x1ff3   :  { %v1287_v16 = vsel %vm1286_vm14, %v2614_v11, %v1283_v18 }
0x1ff4   :  { %v1292_v20 = vsel %vm1289_vm15, %v1291_v17, %v1287_v16 }
0x2031   :  { %v1296_v22 = vpop.permute.xlu2 %1295 }
0x2032   :  { %v1298_v21 = vmul.f32 %v1296_v22, %v1292_v20 }
0x2034   :  { %1300 = vrot.lane.b32.xlu1 %v1298_v21, %s2743_s27 }
0x20a6   :  { %v1301_v24 = vpop.permute.xlu1 %1300 }
0x20a7   :  { %v1303_v25 = vadd.f32 %v1301_v24, %v1250_v41 }
0x20a9   :  { %2615 = vtanh.f32 %v1303_v25 }
0x20af   :  { %v2616_v27 = vpop.eup %2615 }
0x20b0   :  { %1306 = vrot.lane.b32.xlu2 %v2616_v27, %s2743_s27 }
0x20b8   :  { %1331 = vrot.lane.b32.xlu2 %v3346_v26, %s2743_s27 }
0x20c0   :  { %1345 = vperm.xlu2 %2512, %v3367_v29  }
0x20c8   :  { %2517 = vset.pattern.permute.xlu2 %v2741_v7 }
0x20c9   :  { %1357 = vperm.xlu2 %2517, %v3367_v29  }
0x20d1   :  { %2518 = vset.pattern.permute.xlu2 %v2740_v4 }
0x210a   :  { %v1307_v30 = vpop.permute.xlu2 %1306 }
0x210b   :  { %v1309_v14 = vsub.f32 %v3346_v26, %v1307_v30 }
0x210d   :  { %1311 = vrot.lane.b32.xlu0 %v1309_v14, %s2745_s19 }
0x2112   :  { %v1332_v38 = vpop.permute.xlu2 %1331 }
0x2115   :  { %1321 = vperm.xlu0 %2515, %v2440_v53  }
0x211a   :  { %v1346_v11 = vpop.permute.xlu2 %1345 }
0x2123   :  { %v1358_v13 = vpop.permute.xlu2 %1357 }
0x217f   :  { %v1312_v31 = vpop.permute.xlu0 %1311 }
0x2180   :  { %v1314_v32 = vmul.f32 %v1312_v31, %v1292_v20 }
0x2182   :  { %1316 = vrot.lane.b32.xlu1 %v1314_v32, %s2745_s19 }
0x2187   :  { %v3379_v41 = vpop.permute.xlu0 %1321 }
0x21f4   :  { %v1317_v33 = vpop.permute.xlu1 %1316 }
0x21f5   :  { %v3376_v36 = vadd.f32 %v2616_v27, %v1317_v33 }
0x21f7   :  { %v1334_v40 = vsub.f32 %v3376_v36, %v1332_v38 }
0x21f9   :  { %v1335_v57 = vmul.f32 %v1334_v40, %v3379_v41 }
0x21fb   :  { %1337 = vrot.lane.b32.xlu1 %v1335_v57, %s2743_s27 }
0x2203   :  { %1351 = vperm.xlu1 %2516, %v3367_v29  }
0x220b   :  { %2520 = vset.pattern.permute.xlu1 %v2741_v7 }
0x226d   :  { %v1338_v53 = vpop.permute.xlu1 %1337 }
0x226e   :  { %v3386_v3 = vadd.f32 %v1338_v53, %v3346_v26  ;;  %v1348_v26 = vmul.f32 %v3227_v63, %v1346_v11 }
0x2270   :  { %2444 = vmatmul.msk.f32.vlgmr.msrb.gmra.mxu1 %vm43_vm0, %v3386_v3 }
0x2271   :  { %2265 = vmatpush.msrb.mxu1 %v3196_v55  ;;  %v1349_v55 = vadd.f32 %v3239_v1, %v1348_v26 }
0x2273   :  { %2266 = vmatpush.msrb.mxu1 %v3202_v60  ;;  %v1360_v60 = vmul.f32 %v3245_v6, %v1358_v13 }
0x2275   :  { %2267 = vmatpush.msrb.mxu1 %v3208_v35  ;;  %v1352_v12 = vpop.permute.xlu1 %1351 }
0x2276   :  { %v1354_v10 = vmul.f32 %v3233_v5, %v1352_v12 }
0x2277   :  { %2268 = vmatpush.msrb.mxu1 %v3214_v61 }
0x2278   :  { %v1355_v18 = vadd.f32 %v1354_v10, %v1349_v55 }
0x227a   :  { %v1361_v35 = vadd.f32 %v1360_v60, %v1355_v18 }
0x22ed   :  { %v1382_v0 = vpop.f32.mrf.mxu1 }
0x22ee   :  { %v1383_v2 = vadd.f32 %v3220_v62, %v1382_v0 }
0x22f0   :  { %1406 = vrot.lane.b32.xlu0 %v1383_v2, %s2743_s27  ;;  %v1385_v28 = vadd.f32 %v1383_v2, %v1361_v35 }
0x22f2   :  { %v2445_v61 = vmul.f32 -1.442695, %v1385_v28 }
0x22f4   :  { %2617 = vpow2.f32 %v2445_v61 }
0x22fa   :  { %v2618_v19 = vpop.eup %2617 }
0x22fb   :  { %v1389_v16 = vadd.f32 1.0, %v2618_v19 }
0x22fd   :  { %2619 = vrcp.f32 %v1389_v16  ;;  %v1401_v25 = vand.u32 2147483648, %v1389_v16  ;;  %vm1395_vm2 = vweird.f32 %v1389_v16  ;;  %v1399_v27 = vand.u32 2147483647, %v1389_v16 }
0x22ff   :  { %v1402_v14 = vor.u32 1.1754944e-38, %v1401_v25  ;;  %vm1400_vm4 = vcmp.eq.f32.partialorder %v1399_v27, 8.507059e+37 }
0x2303   :  { %v2620_v17 = vpop.eup %2619 }
0x2304   :  { %v1391_v20 = vmul.f32 %v2620_v17, %v1389_v16  ;;  %vm1396_vm1 = vweird.f32 %v2620_v17 }
0x2305   :  { %vm1397_vm3 = vmor %vm1395_vm2, %vm1396_vm1 }
0x2306   :  { %v1392_v22 = vsub.f32 1.0, %v1391_v20 }
0x2308   :  { %v1393_v21 = vmul.f32 %v2620_v17, %v1392_v22 }
0x230a   :  { %v1394_v24 = vadd.f32 %v2620_v17, %v1393_v21 }
0x230c   :  { %v1398_v30 = vsel %vm1397_vm3, %v2620_v17, %v1394_v24 }
0x230d   :  { %v1403_v32 = vsel %vm1400_vm4, %v1402_v14, %v1398_v30 }
0x2362   :  { %v1407_v31 = vpop.permute.xlu0 %1406 }
0x2363   :  { %v1409_v33 = vmul.f32 %v1407_v31, %v1403_v32 }
0x2365   :  { %1411 = vrot.lane.b32.xlu1 %v1409_v33, %s2743_s27 }
0x23d7   :  { %v1412_v38 = vpop.permute.xlu1 %1411 }
0x23d8   :  { %v1414_v40 = vadd.f32 %v1412_v38, %v1361_v35 }
0x23da   :  { %2621 = vtanh.f32 %v1414_v40 }
0x23e0   :  { %v2622_v57 = vpop.eup %2621 }
0x23e1   :  { %1417 = vrot.lane.b32.xlu2 %v2622_v57, %s2743_s27 }
0x23e9   :  { %1442 = vrot.lane.b32.xlu2 %v3386_v3, %s2743_s27 }
0x243b   :  { %v1418_v53 = vpop.permute.xlu2 %1417 }
0x243c   :  { %v1420_v0 = vsub.f32 %v3386_v3, %v1418_v53 }
0x243e   :  { %1422 = vrot.lane.b32.xlu0 %v1420_v0, %s2745_s19 }
0x2443   :  { %v1443_v10 = vpop.permute.xlu2 %1442 }
0x2446   :  { %1432 = vperm.xlu0 %2515, %v3367_v29   ;;  %v2446_v29 = vld [vmem:[%s3804_s0 + $0x60] sm:$0xff] }
0x2447   :  { %1456 = vperm.xlu2 %2518, %v2446_v29  }
0x244e   :  { %2519 = vset.pattern.permute.xlu0 %v2742_v9 }
0x244f   :  { %1462 = vperm.xlu0 %2519, %v2446_v29  }
0x2457   :  { %2521 = vset.pattern.permute.xlu0 %v2744_v45 }
0x24a1   :  { %v1457_v19 = vpop.permute.xlu2 %1456 }
0x24a2   :  { %v1459_v16 = vmul.f32 %v3227_v63, %v1457_v19 }
0x24a4   :  { %v1460_v20 = vadd.f32 %v3239_v1, %v1459_v16 }
0x24b0   :  { %v1423_v2 = vpop.permute.xlu0 %1422 }
0x24b1   :  { %v1425_v11 = vmul.f32 %v1423_v2, %v1403_v32 }
0x24b3   :  { %1427 = vrot.lane.b32.xlu1 %v1425_v11, %s2745_s19 }
0x24b8   :  { %v3412_v55 = vpop.permute.xlu0 %1432 }
0x24c1   :  { %v1463_v17 = vpop.permute.xlu0 %1462 }
0x24c2   :  { %v1465_v22 = vmul.f32 %v3233_v5, %v1463_v17 }
0x24c4   :  { %v1466_v24 = vadd.f32 %v1465_v22, %v1460_v20 }
0x2525   :  { %v1428_v12 = vpop.permute.xlu1 %1427 }
0x2526   :  { %v3409_v26 = vadd.f32 %v2622_v57, %v1428_v12 }
0x2528   :  { %v1445_v13 = vsub.f32 %v3409_v26, %v1443_v10 }
0x252a   :  { %v1446_v18 = vmul.f32 %v1445_v13, %v3412_v55 }
0x252c   :  { %1448 = vrot.lane.b32.xlu1 %v1446_v18, %s2743_s27 }
0x2534   :  { %1468 = vperm.xlu1 %2520, %v2446_v29  }
0x253c   :  { %2522 = vset.pattern.permute.xlu1 %v2742_v9 }
0x259e   :  { %v1449_v60 = vpop.permute.xlu1 %1448 }
0x259f   :  { %v3422_v35 = vadd.f32 %v1449_v60, %v3386_v3 }
0x25a1   :  { %2447 = vmatmul.msk.f32.vlgmr.msrb.gmra.mxu2 %vm43_vm0, %v3422_v35 }
0x25a6   :  { %v1469_v21 = vpop.permute.xlu1 %1468 }
0x25a7   :  { %v1471_v3 = vmul.f32 %v3245_v6, %v1469_v21 }
0x25a9   :  { %v1472_v25 = vadd.f32 %v1471_v3, %v1466_v24 }
0x2624   :  { %v1493_v28 = vpop.f32.mrf.mxu2 }
0x2625   :  { %v1494_v61 = vadd.f32 %v3220_v62, %v1493_v28 }
0x2627   :  { %1517 = vrot.lane.b32.xlu2 %v1494_v61, %s2743_s27  ;;  %v1496_v27 = vadd.f32 %v1494_v61, %v1472_v25  ;;  %v3439_v61 = vld [vmem:[%s3804_s0 + $0x68] sm:$0xff] }
0x2629   :  { %v2448_v30 = vmul.f32 -1.442695, %v1496_v27 }
0x262b   :  { %2623 = vpow2.f32 %v2448_v30 }
0x2631   :  { %v2624_v14 = vpop.eup %2623 }
0x2632   :  { %v1500_v31 = vadd.f32 1.0, %v2624_v14 }
0x2634   :  { %2625 = vrcp.f32 %v1500_v31  ;;  %v1512_v53 = vand.u32 2147483648, %v1500_v31  ;;  %vm1506_vm6 = vweird.f32 %v1500_v31  ;;  %v1510_v0 = vand.u32 2147483647, %v1500_v31 }
0x2636   :  { %v1513_v11 = vor.u32 1.1754944e-38, %v1512_v53  ;;  %vm1511_vm8 = vcmp.eq.f32.partialorder %v1510_v0, 8.507059e+37 }
0x263a   :  { %v2626_v32 = vpop.eup %2625 }
0x263b   :  { %v1502_v33 = vmul.f32 %v2626_v32, %v1500_v31  ;;  %vm1507_vm5 = vweird.f32 %v2626_v32 }
0x263c   :  { %vm1508_vm7 = vmor %vm1506_vm6, %vm1507_vm5 }
0x263d   :  { %v1503_v38 = vsub.f32 1.0, %v1502_v33 }
0x263f   :  { %v1504_v40 = vmul.f32 %v2626_v32, %v1503_v38 }
0x2641   :  { %v1505_v57 = vadd.f32 %v2626_v32, %v1504_v40 }
0x2643   :  { %v1509_v2 = vsel %vm1508_vm7, %v2626_v32, %v1505_v57 }
0x2644   :  { %v1514_v12 = vsel %vm1511_vm8, %v1513_v11, %v1509_v2 }
0x2681   :  { %v1518_v10 = vpop.permute.xlu2 %1517 }
0x2682   :  { %v1520_v13 = vmul.f32 %v1518_v10, %v1514_v12 }
0x2684   :  { %1522 = vrot.lane.b32.xlu1 %v1520_v13, %s2743_s27 }
0x26f6   :  { %v1523_v18 = vpop.permute.xlu1 %1522 }
0x26f7   :  { %v1525_v60 = vadd.f32 %v1523_v18, %v1472_v25 }
0x26f9   :  { %2627 = vtanh.f32 %v1525_v60 }
0x26ff   :  { %v2628_v28 = vpop.eup %2627 }
0x2700   :  { %1528 = vrot.lane.b32.xlu2 %v2628_v28, %s2743_s27 }
0x2708   :  { %1553 = vrot.lane.b32.xlu2 %v3422_v35, %s2743_s27 }
0x2710   :  { %1567 = vperm.xlu2 %2518, %v3439_v61  }
0x2718   :  { %2523 = vset.pattern.permute.xlu2 %v2741_v7 }
0x2719   :  { %1579 = vperm.xlu2 %2523, %v3439_v61  }
0x2721   :  { %2524 = vset.pattern.permute.xlu2 %v2740_v4 }
0x275a   :  { %v1529_v19 = vpop.permute.xlu2 %1528 }
0x275b   :  { %v1531_v16 = vsub.f32 %v3422_v35, %v1529_v19 }
0x275d   :  { %1533 = vrot.lane.b32.xlu0 %v1531_v16, %s2745_s19 }
0x2762   :  { %v1554_v24 = vpop.permute.xlu2 %1553 }
0x2765   :  { %1543 = vperm.xlu0 %2521, %v2446_v29  }
0x276a   :  { %v1568_v32 = vpop.permute.xlu2 %1567 }
0x276b   :  { %v1570_v38 = vmul.f32 %v3227_v63, %v1568_v32 }
0x276d   :  { %v1571_v53 = vadd.f32 %v3239_v1, %v1570_v38 }
0x2773   :  { %v1580_v57 = vpop.permute.xlu2 %1579 }
0x27cf   :  { %v1534_v17 = vpop.permute.xlu0 %1533 }
0x27d0   :  { %v1536_v20 = vmul.f32 %v1534_v17, %v1514_v12 }
0x27d2   :  { %1538 = vrot.lane.b32.xlu1 %v1536_v20, %s2745_s19 }
0x27d7   :  { %v3451_v25 = vpop.permute.xlu0 %1543 }
0x2844   :  { %v1539_v22 = vpop.permute.xlu1 %1538 }
0x2845   :  { %v3448_v21 = vadd.f32 %v2628_v28, %v1539_v22 }
0x2847   :  { %v1556_v3 = vsub.f32 %v3448_v21, %v1554_v24 }
0x2849   :  { %v1557_v27 = vmul.f32 %v1556_v3, %v3451_v25 }
0x284b   :  { %1559 = vrot.lane.b32.xlu1 %v1557_v27, %s2743_s27 }
0x2853   :  { %1573 = vperm.xlu1 %2522, %v3439_v61  }
0x285b   :  { %2526 = vset.pattern.permute.xlu1 %v2741_v7 }
0x28bd   :  { %v1560_v29 = vpop.permute.xlu1 %1559 }
0x28be   :  { %v3458_v30 = vadd.f32 %v1560_v29, %v3422_v35  ;;  %v1582_v35 = vmul.f32 %v3245_v6, %v1580_v57 }
0x28c0   :  { %2450 = vmatmul.msk.f32.vlgmr.msrb.gmra.mxu3 %vm43_vm0, %v3458_v30 }
0x28c5   :  { %v1574_v33 = vpop.permute.xlu1 %1573 }
0x28c6   :  { %v1576_v40 = vmul.f32 %v3233_v5, %v1574_v33 }
0x28c8   :  { %v1577_v0 = vadd.f32 %v1576_v40, %v1571_v53 }
0x28ca   :  { %v1583_v2 = vadd.f32 %v1582_v35, %v1577_v0 }
0x2943   :  { %v1604_v14 = vpop.f32.mrf.mxu3 }
0x2944   :  { %v1605_v31 = vadd.f32 %v3220_v62, %v1604_v14 }
0x2946   :  { %1628 = vrot.lane.b32.xlu0 %v1605_v31, %s2743_s27  ;;  %v1607_v11 = vadd.f32 %v1605_v31, %v1583_v2 }
0x2948   :  { %v2451_v12 = vmul.f32 -1.442695, %v1607_v11 }
0x294a   :  { %2629 = vpow2.f32 %v2451_v12 }
0x2950   :  { %v2630_v10 = vpop.eup %2629 }
0x2951   :  { %v1611_v13 = vadd.f32 1.0, %v2630_v10 }
0x2953   :  { %2631 = vrcp.f32 %v1611_v13  ;;  %v1623_v17 = vand.u32 2147483648, %v1611_v13  ;;  %vm1617_vm10 = vweird.f32 %v1611_v13  ;;  %v1621_v20 = vand.u32 2147483647, %v1611_v13 }
0x2955   :  { %v1624_v24 = vor.u32 1.1754944e-38, %v1623_v17  ;;  %vm1622_vm12 = vcmp.eq.f32.partialorder %v1621_v20, 8.507059e+37 }
0x2959   :  { %v2632_v18 = vpop.eup %2631 }
0x295a   :  { %v1613_v60 = vmul.f32 %v2632_v18, %v1611_v13  ;;  %vm1618_vm9 = vweird.f32 %v2632_v18 }
0x295b   :  { %vm1619_vm11 = vmor %vm1617_vm10, %vm1618_vm9 }
0x295c   :  { %v1614_v28 = vsub.f32 1.0, %v1613_v60 }
0x295e   :  { %v1615_v19 = vmul.f32 %v2632_v18, %v1614_v28 }
0x2960   :  { %v1616_v16 = vadd.f32 %v2632_v18, %v1615_v19 }
0x2962   :  { %v1620_v22 = vsel %vm1619_vm11, %v2632_v18, %v1616_v16 }
0x2963   :  { %v1625_v27 = vsel %vm1622_vm12, %v1624_v24, %v1620_v22 }
0x29b8   :  { %v1629_v3 = vpop.permute.xlu0 %1628 }
0x29b9   :  { %v1631_v29 = vmul.f32 %v1629_v3, %v1625_v27 }
0x29bb   :  { %1633 = vrot.lane.b32.xlu1 %v1631_v29, %s2743_s27 }
0x2a2d   :  { %v1634_v14 = vpop.permute.xlu1 %1633 }
0x2a2e   :  { %v1636_v31 = vadd.f32 %v1634_v14, %v1583_v2 }
0x2a30   :  { %2633 = vtanh.f32 %v1636_v31 }
0x2a36   :  { %v2634_v32 = vpop.eup %2633 }
0x2a37   :  { %1639 = vrot.lane.b32.xlu2 %v2634_v32, %s2743_s27 }
0x2a3f   :  { %1664 = vrot.lane.b32.xlu2 %v3458_v30, %s2743_s27 }
0x2a91   :  { %v1640_v33 = vpop.permute.xlu2 %1639 }
0x2a92   :  { %v1642_v38 = vsub.f32 %v3458_v30, %v1640_v33 }
0x2a94   :  { %1644 = vrot.lane.b32.xlu0 %v1642_v38, %s2745_s19 }
0x2a99   :  { %v1665_v35 = vpop.permute.xlu2 %1664 }
0x2a9c   :  { %1654 = vperm.xlu0 %2521, %v3439_v61   ;;  %v2452_v61 = vld [vmem:[%s3804_s0 + $0x70] sm:$0xff] }
0x2a9d   :  { %1678 = vperm.xlu2 %2524, %v2452_v61  }
0x2aa4   :  { %2525 = vset.pattern.permute.xlu0 %v2742_v9 }
0x2aa5   :  { %1684 = vperm.xlu0 %2525, %v2452_v61  }
0x2aad   :  { %2527 = vset.pattern.permute.xlu0 %v2744_v45 }
0x2af7   :  { %v1679_v28 = vpop.permute.xlu2 %1678 }
0x2af8   :  { %v1681_v19 = vmul.f32 %v3227_v63, %v1679_v28 }
0x2afa   :  { %v1682_v17 = vadd.f32 %v3239_v1, %v1681_v19 }
0x2b06   :  { %v1645_v40 = vpop.permute.xlu0 %1644 }
0x2b07   :  { %v1647_v57 = vmul.f32 %v1645_v40, %v1625_v27 }
0x2b09   :  { %1649 = vrot.lane.b32.xlu1 %v1647_v57, %s2745_s19 }
0x2b0e   :  { %v3480_v11 = vpop.permute.xlu0 %1654 }
0x2b17   :  { %v1685_v16 = vpop.permute.xlu0 %1684 }
0x2b18   :  { %v1687_v20 = vmul.f32 %v3233_v5, %v1685_v16 }
0x2b1a   :  { %v1688_v24 = vadd.f32 %v1687_v20, %v1682_v17 }
0x2b7b   :  { %v1650_v53 = vpop.permute.xlu1 %1649 }
0x2b7c   :  { %v3477_v0 = vadd.f32 %v2634_v32, %v1650_v53 }
0x2b7e   :  { %v1667_v2 = vsub.f32 %v3477_v0, %v1665_v35 }
0x2b80   :  { %v1668_v12 = vmul.f32 %v1667_v2, %v3480_v11 }
0x2b82   :  { %1670 = vrot.lane.b32.xlu1 %v1668_v12, %s2743_s27 }
0x2b8a   :  { %1690 = vperm.xlu1 %2526, %v2452_v61  }
0x2b92   :  { %2528 = vset.pattern.permute.xlu1 %v2742_v9 }
0x2bf4   :  { %v1671_v10 = vpop.permute.xlu1 %1670 }
0x2bf5   :  { %v3490_v13 = vadd.f32 %v1671_v10, %v3458_v30 }
0x2bf7   :  { %2453 = vmatmul.msk.f32.vlgmr.msra.gmra.mxu0 %vm43_vm0, %v3490_v13 }
0x2bfc   :  { %v1691_v22 = vpop.permute.xlu1 %1690 }
0x2bfd   :  { %v1693_v30 = vmul.f32 %v3245_v6, %v1691_v22 }
0x2bff   :  { %v1694_v3 = vadd.f32 %v1693_v30, %v1688_v24 }
0x2c74   :  { %v1715_v18 = vpop.f32.mrf.mxu0 }
0x2c75   :  { %v1716_v60 = vadd.f32 %v3220_v62, %v1715_v18  ;;  %v3507_v18 = vld [vmem:[%s3804_s0 + $0x78] sm:$0xff] }
0x2c77   :  { %1739 = vrot.lane.b32.xlu2 %v1716_v60, %s2743_s27  ;;  %v1718_v27 = vadd.f32 %v1716_v60, %v1694_v3 }
0x2c79   :  { %v2454_v29 = vmul.f32 -1.442695, %v1718_v27 }
0x2c7b   :  { %2635 = vpow2.f32 %v2454_v29 }
0x2c81   :  { %v2636_v14 = vpop.eup %2635 }
0x2c82   :  { %v1722_v62 = vadd.f32 1.0, %v2636_v14  ;;  %v3533_v14 = vld [vmem:[%s3807_s3 + $0x1] ss:$0 sm:$0xff] }
0x2c84   :  { %2637 = vrcp.f32 %v1722_v62  ;;  %v1734_v1 = vand.u32 2147483648, %v1722_v62  ;;  %vm1728_vm14 = vweird.f32 %v1722_v62  ;;  %v1732_v5 = vand.u32 2147483647, %v1722_v62 }
0x2c86   :  { %v1735_v57 = vor.u32 1.1754944e-38, %v1734_v1  ;;  %vm1733_vm1 = vcmp.eq.f32.partialorder %v1732_v5, 8.507059e+37  ;;  %v3552_v5 = vld [vmem:[%s3807_s3] ss:$0 sm:$0xff] }
0x2c8a   :  { %v2638_v31 = vpop.eup %2637 }
0x2c8b   :  { %v1724_v32 = vmul.f32 %v2638_v31, %v1722_v62  ;;  %vm1729_vm13 = vweird.f32 %v2638_v31 }
0x2c8c   :  { %vm1730_vm15 = vmor %vm1728_vm14, %vm1729_vm13 }
0x2c8d   :  { %v1725_v33 = vsub.f32 1.0, %v1724_v32 }
0x2c8f   :  { %v1726_v63 = vmul.f32 %v2638_v31, %v1725_v33 }
0x2c91   :  { %v1727_v38 = vadd.f32 %v2638_v31, %v1726_v63  ;;  %v3546_v63 = vld [vmem:[%s3805_s1 + $0x1] ss:$0 sm:$0xff] }
0x2c93   :  { %v1731_v40 = vsel %vm1730_vm15, %v2638_v31, %v1727_v38 }
0x2c94   :  { %v1736_v6 = vsel %vm1733_vm1, %v1735_v57, %v1731_v40 }
0x2cd1   :  { %v1740_v53 = vpop.permute.xlu2 %1739 }
0x2cd2   :  { %v1742_v35 = vmul.f32 %v1740_v53, %v1736_v6 }
0x2cd4   :  { %1744 = vrot.lane.b32.xlu1 %v1742_v35, %s2743_s27 }
0x2d46   :  { %v1745_v2 = vpop.permute.xlu1 %1744 }
0x2d47   :  { %v1747_v12 = vadd.f32 %v1745_v2, %v1694_v3 }
0x2d49   :  { %2639 = vtanh.f32 %v1747_v12 }
0x2d4f   :  { %v2640_v10 = vpop.eup %2639 }
0x2d50   :  { %1750 = vrot.lane.b32.xlu2 %v2640_v10, %s2743_s27 }
0x2d58   :  { %1775 = vrot.lane.b32.xlu2 %v3490_v13, %s2743_s27 }
0x2d60   :  { %1789 = vperm.xlu2 %2524, %v3507_v18  }
0x2d68   :  { %2529 = vset.pattern.permute.xlu2 %v2741_v7 }
0x2d69   :  { %1801 = vperm.xlu2 %2529, %v3507_v18  }
0x2d71   :  { %2530 = vset.pattern.permute.xlu2 %v2740_v4 }
0x2daa   :  { %v1751_v60 = vpop.permute.xlu2 %1750 }
0x2dab   :  { %v1753_v28 = vsub.f32 %v3490_v13, %v1751_v60 }
0x2dad   :  { %1755 = vrot.lane.b32.xlu0 %v1753_v28, %s2745_s19 }
0x2db2   :  { %v1776_v22 = vpop.permute.xlu2 %1775 }
0x2db5   :  { %1765 = vperm.xlu0 %2527, %v2452_v61  }
0x2dba   :  { %v1790_v31 = vpop.permute.xlu2 %1789 }
0x2dc3   :  { %v1802_v1 = vpop.permute.xlu2 %1801 }
0x2e1f   :  { %v1756_v19 = vpop.permute.xlu0 %1755 }
0x2e20   :  { %v1758_v16 = vmul.f32 %v1756_v19, %v1736_v6  ;;  %v3558_v6 = vld [vmem:[%s3805_s1 + $0x2] ss:$0 sm:$0xff] }
0x2e21   :  { %v1804_v53 = vmul.f32 %v3558_v6, %v1802_v1 }
0x2e22   :  { %1760 = vrot.lane.b32.xlu1 %v1758_v16, %s2745_s19 }
0x2e27   :  { %v3519_v30 = vpop.permute.xlu0 %1765 }
0x2e94   :  { %v1761_v17 = vpop.permute.xlu1 %1760 }
0x2e95   :  { %v3516_v20 = vadd.f32 %v2640_v10, %v1761_v17 }
0x2e97   :  { %v1778_v24 = vsub.f32 %v3516_v20, %v1776_v22 }
0x2e99   :  { %v1779_v3 = vmul.f32 %v1778_v24, %v3519_v30 }
0x2e9b   :  { %1781 = vrot.lane.b32.xlu1 %v1779_v3, %s2743_s27 }
0x2ea3   :  { %1795 = vperm.xlu1 %2528, %v3507_v18  }
0x2eab   :  { %2532 = vset.pattern.permute.xlu1 %v2741_v7 }
0x2f0d   :  { %v1782_v61 = vpop.permute.xlu1 %1781 }
0x2f0e   :  { %v3526_v27 = vadd.f32 %v1782_v61, %v3490_v13  ;;  %v3540_v13 = vld [vmem:[%s3805_s1] ss:$0 sm:$0xff] }
0x2f0f   :  { %v1792_v33 = vmul.f32 %v3540_v13, %v1790_v31 }
0x2f10   :  { %2456 = vmatmul.msk.f32.vlgmr.msra.gmra.mxu1 %vm43_vm0, %v3526_v27 }
0x2f11   :  { %v1793_v40 = vadd.f32 %v3552_v5, %v1792_v33 }
0x2f15   :  { %v1796_v32 = vpop.permute.xlu1 %1795 }
0x2f16   :  { %v1798_v38 = vmul.f32 %v3546_v63, %v1796_v32 }
0x2f18   :  { %v1799_v57 = vadd.f32 %v1798_v38, %v1793_v40 }
0x2f1a   :  { %v1805_v35 = vadd.f32 %v1804_v53, %v1799_v57 }
0x2f8d   :  { %v1826_v29 = vpop.f32.mrf.mxu1 }
0x2f8e   :  { %v1827_v62 = vadd.f32 %v3533_v14, %v1826_v29 }
0x2f90   :  { %1850 = vrot.lane.b32.xlu0 %v1827_v62, %s2743_s27  ;;  %v1829_v2 = vadd.f32 %v1827_v62, %v1805_v35 }
0x2f92   :  { %v2457_v12 = vmul.f32 -1.442695, %v1829_v2 }
0x2f94   :  { %2641 = vpow2.f32 %v2457_v12 }
0x2f9a   :  { %v2642_v10 = vpop.eup %2641 }
0x2f9b   :  { %v1833_v60 = vadd.f32 1.0, %v2642_v10 }
0x2f9d   :  { %2643 = vrcp.f32 %v1833_v60  ;;  %v1845_v24 = vand.u32 2147483648, %v1833_v60  ;;  %vm1839_vm3 = vweird.f32 %v1833_v60  ;;  %v1843_v3 = vand.u32 2147483647, %v1833_v60 }
0x2f9f   :  { %v1846_v29 = vor.u32 1.1754944e-38, %v1845_v24  ;;  %vm1844_vm5 = vcmp.eq.f32.partialorder %v1843_v3, 8.507059e+37 }
0x2fa3   :  { %v2644_v28 = vpop.eup %2643 }
0x2fa4   :  { %v1835_v19 = vmul.f32 %v2644_v28, %v1833_v60  ;;  %vm1840_vm2 = vweird.f32 %v2644_v28 }
0x2fa5   :  { %vm1841_vm4 = vmor %vm1839_vm3, %vm1840_vm2 }
0x2fa6   :  { %v1836_v16 = vsub.f32 1.0, %v1835_v19 }
0x2fa8   :  { %v1837_v17 = vmul.f32 %v2644_v28, %v1836_v16 }
0x2faa   :  { %v1838_v22 = vadd.f32 %v2644_v28, %v1837_v17 }
0x2fac   :  { %v1842_v61 = vsel %vm1841_vm4, %v2644_v28, %v1838_v22 }
0x2fad   :  { %v1847_v62 = vsel %vm1844_vm5, %v1846_v29, %v1842_v61 }
0x3002   :  { %v1851_v31 = vpop.permute.xlu0 %1850 }
0x3003   :  { %v1853_v32 = vmul.f32 %v1851_v31, %v1847_v62 }
0x3005   :  { %1855 = vrot.lane.b32.xlu1 %v1853_v32, %s2743_s27 }
0x3077   :  { %v1856_v33 = vpop.permute.xlu1 %1855 }
0x3078   :  { %v1858_v38 = vadd.f32 %v1856_v33, %v1805_v35 }
0x307a   :  { %2645 = vtanh.f32 %v1858_v38 }
0x3080   :  { %v2646_v1 = vpop.eup %2645 }
0x3081   :  { %1861 = vrot.lane.b32.xlu2 %v2646_v1, %s2743_s27 }
0x3089   :  { %1886 = vrot.lane.b32.xlu2 %v3526_v27, %s2743_s27 }
0x30db   :  { %v1862_v40 = vpop.permute.xlu2 %1861 }
0x30dc   :  { %v1864_v57 = vsub.f32 %v3526_v27, %v1862_v40 }
0x30de   :  { %1866 = vrot.lane.b32.xlu0 %v1864_v57, %s2745_s19 }
0x30e3   :  { %v1887_v10 = vpop.permute.xlu2 %1886 }
0x30e6   :  { %1876 = vperm.xlu0 %2527, %v3507_v18   ;;  %v2458_v18 = vld [vmem:[%s3804_s0 + $0x80] sm:$0xff] }
0x30e7   :  { %1900 = vperm.xlu2 %2530, %v2458_v18  }
0x30ee   :  { %2531 = vset.pattern.permute.xlu0 %v2742_v9 }
0x30ef   :  { %1906 = vperm.xlu0 %2531, %v2458_v18  }
0x30f7   :  { %2533 = vset.pattern.permute.xlu0 %v2744_v45 }
0x3141   :  { %v1901_v3 = vpop.permute.xlu2 %1900 }
0x3142   :  { %v1903_v61 = vmul.f32 %v3540_v13, %v1901_v3 }
0x3144   :  { %v1904_v31 = vadd.f32 %v3552_v5, %v1903_v61 }
0x3150   :  { %v1867_v53 = vpop.permute.xlu0 %1866 }
0x3151   :  { %v1869_v2 = vmul.f32 %v1867_v53, %v1847_v62 }
0x3153   :  { %1871 = vrot.lane.b32.xlu1 %v1869_v2, %s2745_s19 }
0x3158   :  { %v3573_v28 = vpop.permute.xlu0 %1876 }
0x3161   :  { %v1907_v29 = vpop.permute.xlu0 %1906 }
0x3162   :  { %v1909_v62 = vmul.f32 %v3546_v63, %v1907_v29 }
0x3164   :  { %v1910_v33 = vadd.f32 %v1909_v62, %v1904_v31 }
0x31c5   :  { %v1872_v35 = vpop.permute.xlu1 %1871 }
0x31c6   :  { %v3570_v12 = vadd.f32 %v2646_v1, %v1872_v35 }
0x31c8   :  { %v1889_v60 = vsub.f32 %v3570_v12, %v1887_v10 }
0x31ca   :  { %v1890_v19 = vmul.f32 %v1889_v60, %v3573_v28 }
0x31cc   :  { %1892 = vrot.lane.b32.xlu1 %v1890_v19, %s2743_s27 }
0x31d4   :  { %1912 = vperm.xlu1 %2532, %v2458_v18  }
0x31dc   :  { %2534 = vset.pattern.permute.xlu1 %v2742_v9 }
0x323e   :  { %v1893_v16 = vpop.permute.xlu1 %1892 }
0x323f   :  { %v3583_v17 = vadd.f32 %v1893_v16, %v3526_v27 }
0x3241   :  { %2459 = vmatmul.msk.f32.vlgmr.msra.gmra.mxu2 %vm43_vm0, %v3583_v17 }
0x3246   :  { %v1913_v32 = vpop.permute.xlu1 %1912 }
0x3247   :  { %v1915_v27 = vmul.f32 %v3558_v6, %v1913_v32 }
0x3249   :  { %v1916_v38 = vadd.f32 %v1915_v27, %v1910_v33  ;;  %v3600_v27 = vld [vmem:[%s3804_s0 + $0x88] sm:$0xff] }
0x32c4   :  { %v1937_v22 = vpop.f32.mrf.mxu2 }
0x32c5   :  { %v1938_v24 = vadd.f32 %v3533_v14, %v1937_v22 }
0x32c7   :  { %1961 = vrot.lane.b32.xlu2 %v1938_v24, %s2743_s27  ;;  %v1940_v1 = vadd.f32 %v1938_v24, %v1916_v38 }
0x32c9   :  { %v2460_v40 = vmul.f32 -1.442695, %v1940_v1 }
0x32cb   :  { %2647 = vpow2.f32 %v2460_v40 }
0x32d1   :  { %v2648_v57 = vpop.eup %2647 }
0x32d2   :  { %v1944_v53 = vadd.f32 1.0, %v2648_v57 }
0x32d4   :  { %2649 = vrcp.f32 %v1944_v53  ;;  %v1956_v16 = vand.u32 2147483648, %v1944_v53  ;;  %vm1950_vm7 = vweird.f32 %v1944_v53  ;;  %v1954_v22 = vand.u32 2147483647, %v1944_v53 }
0x32d6   :  { %v1957_v61 = vor.u32 1.1754944e-38, %v1956_v16  ;;  %vm1955_vm9 = vcmp.eq.f32.partialorder %v1954_v22, 8.507059e+37 }
0x32da   :  { %v2650_v2 = vpop.eup %2649 }
0x32db   :  { %v1946_v35 = vmul.f32 %v2650_v2, %v1944_v53  ;;  %vm1951_vm6 = vweird.f32 %v2650_v2 }
0x32dc   :  { %vm1952_vm8 = vmor %vm1950_vm7, %vm1951_vm6 }
0x32dd   :  { %v1947_v10 = vsub.f32 1.0, %v1946_v35 }
0x32df   :  { %v1948_v60 = vmul.f32 %v2650_v2, %v1947_v10 }
0x32e1   :  { %v1949_v19 = vadd.f32 %v2650_v2, %v1948_v60 }
0x32e3   :  { %v1953_v3 = vsel %vm1952_vm8, %v2650_v2, %v1949_v19 }
0x32e4   :  { %v1958_v29 = vsel %vm1955_vm9, %v1957_v61, %v1953_v3 }
0x3321   :  { %v1962_v24 = vpop.permute.xlu2 %1961 }
0x3322   :  { %v1964_v31 = vmul.f32 %v1962_v24, %v1958_v29 }
0x3324   :  { %1966 = vrot.lane.b32.xlu1 %v1964_v31, %s2743_s27 }
0x3396   :  { %v1967_v62 = vpop.permute.xlu1 %1966 }
0x3397   :  { %v1969_v32 = vadd.f32 %v1967_v62, %v1916_v38 }
0x3399   :  { %2651 = vtanh.f32 %v1969_v32 }
0x339f   :  { %v2652_v33 = vpop.eup %2651 }
0x33a0   :  { %1972 = vrot.lane.b32.xlu2 %v2652_v33, %s2743_s27 }
0x33a8   :  { %1997 = vrot.lane.b32.xlu2 %v3583_v17, %s2743_s27 }
0x33b0   :  { %2011 = vperm.xlu2 %2530, %v3600_v27  }
0x33b8   :  { %2535 = vset.pattern.permute.xlu2 %v2741_v7 }
0x33b9   :  { %2023 = vperm.xlu2 %2535, %v3600_v27  }
0x33c1   :  { %2536 = vset.pattern.permute.xlu2 %v2740_v4 }
0x33fa   :  { %v1973_v38 = vpop.permute.xlu2 %1972 }
0x33fb   :  { %v1975_v1 = vsub.f32 %v3583_v17, %v1973_v38 }
0x33fd   :  { %1977 = vrot.lane.b32.xlu0 %v1975_v1, %s2745_s19 }
0x3402   :  { %v1998_v35 = vpop.permute.xlu2 %1997 }
0x3405   :  { %1987 = vperm.xlu0 %2533, %v2458_v18  }
0x340a   :  { %v2012_v3 = vpop.permute.xlu2 %2011 }
0x3413   :  { %v2024_v31 = vpop.permute.xlu2 %2023 }
0x346f   :  { %v1978_v40 = vpop.permute.xlu0 %1977 }
0x3470   :  { %v1980_v57 = vmul.f32 %v1978_v40, %v1958_v29  ;;  %v2014_v29 = vmul.f32 %v3540_v13, %v2012_v3 }
0x3472   :  { %1982 = vrot.lane.b32.xlu1 %v1980_v57, %s2745_s19  ;;  %v2015_v62 = vadd.f32 %v3552_v5, %v2014_v29 }
0x3477   :  { %v3612_v60 = vpop.permute.xlu0 %1987 }
0x34e4   :  { %v1983_v53 = vpop.permute.xlu1 %1982 }
0x34e5   :  { %v3609_v2 = vadd.f32 %v2652_v33, %v1983_v53 }
0x34e7   :  { %v2000_v10 = vsub.f32 %v3609_v2, %v1998_v35 }
0x34e9   :  { %v2001_v4 = vmul.f32 %v2000_v10, %v3612_v60 }
0x34eb   :  { %2003 = vrot.lane.b32.xlu1 %v2001_v4, %s2743_s27 }
0x34f3   :  { %2017 = vperm.xlu1 %2534, %v3600_v27  }
0x34fb   :  { %2538 = vset.pattern.permute.xlu1 %v2741_v7 }
0x355d   :  { %v2004_v18 = vpop.permute.xlu1 %2003 }
0x355e   :  { %v3619_v19 = vadd.f32 %v2004_v18, %v3583_v17  ;;  %v2026_v17 = vmul.f32 %v3558_v6, %v2024_v31 }
0x3560   :  { %2462 = vmatmul.msk.f32.vlgmr.msra.gmra.mxu3 %vm43_vm0, %v3619_v19 }
0x3565   :  { %v2018_v61 = vpop.permute.xlu1 %2017 }
0x3566   :  { %v2020_v24 = vmul.f32 %v3546_v63, %v2018_v61 }
0x3568   :  { %v2021_v32 = vadd.f32 %v2020_v24, %v2015_v62 }
0x356a   :  { %v2027_v33 = vadd.f32 %v2026_v17, %v2021_v32 }
0x35e3   :  { %v2048_v16 = vpop.f32.mrf.mxu3 }
0x35e4   :  { %v2049_v22 = vadd.f32 %v3533_v14, %v2048_v16 }
0x35e6   :  { %2072 = vrot.lane.b32.xlu0 %v2049_v22, %s2743_s27  ;;  %v2051_v38 = vadd.f32 %v2049_v22, %v2027_v33 }
0x35e8   :  { %v2463_v1 = vmul.f32 -1.442695, %v2051_v38 }
0x35ea   :  { %2653 = vpow2.f32 %v2463_v1 }
0x35f0   :  { %v2654_v40 = vpop.eup %2653 }
0x35f1   :  { %v2055_v57 = vadd.f32 1.0, %v2654_v40 }
0x35f3   :  { %2655 = vrcp.f32 %v2055_v57  ;;  %v2067_v16 = vand.u32 2147483648, %v2055_v57  ;;  %vm2061_vm11 = vweird.f32 %v2055_v57  ;;  %v2065_v3 = vand.u32 2147483647, %v2055_v57 }
0x35f5   :  { %v2068_v29 = vor.u32 1.1754944e-38, %v2067_v16  ;;  %vm2066_vm13 = vcmp.eq.f32.partialorder %v2065_v3, 8.507059e+37 }
0x35f9   :  { %v2656_v53 = vpop.eup %2655 }
0x35fa   :  { %v2057_v35 = vmul.f32 %v2656_v53, %v2055_v57  ;;  %vm2062_vm10 = vweird.f32 %v2656_v53 }
0x35fb   :  { %vm2063_vm12 = vmor %vm2061_vm11, %vm2062_vm10 }
0x35fc   :  { %v2058_v10 = vsub.f32 1.0, %v2057_v35 }
0x35fe   :  { %v2059_v4 = vmul.f32 %v2656_v53, %v2058_v10 }
0x3600   :  { %v2060_v18 = vadd.f32 %v2656_v53, %v2059_v4 }
0x3602   :  { %v2064_v61 = vsel %vm2063_vm12, %v2656_v53, %v2060_v18 }
0x3603   :  { %v2069_v22 = vsel %vm2066_vm13, %v2068_v29, %v2064_v61 }
0x3658   :  { %v2073_v24 = vpop.permute.xlu0 %2072 }
0x3659   :  { %v2075_v31 = vmul.f32 %v2073_v24, %v2069_v22 }
0x365b   :  { %2077 = vrot.lane.b32.xlu1 %v2075_v31, %s2743_s27 }
0x36cd   :  { %v2078_v62 = vpop.permute.xlu1 %2077 }
0x36ce   :  { %v2080_v32 = vadd.f32 %v2078_v62, %v2027_v33 }
0x36d0   :  { %2657 = vtanh.f32 %v2080_v32 }
0x36d6   :  { %v2658_v17 = vpop.eup %2657 }
0x36d7   :  { %2083 = vrot.lane.b32.xlu2 %v2658_v17, %s2743_s27 }
0x36df   :  { %2108 = vrot.lane.b32.xlu2 %v3619_v19, %s2743_s27 }
0x3731   :  { %v2084_v38 = vpop.permute.xlu2 %2083 }
0x3732   :  { %v2086_v1 = vsub.f32 %v3619_v19, %v2084_v38 }
0x3734   :  { %2088 = vrot.lane.b32.xlu0 %v2086_v1, %s2745_s19 }
0x3739   :  { %v2109_v35 = vpop.permute.xlu2 %2108 }
0x373c   :  { %2098 = vperm.xlu0 %2533, %v3600_v27   ;;  %v2464_v27 = vld [vmem:[%s3804_s0 + $0x90] sm:$0xff] }
0x373d   :  { %2122 = vperm.xlu2 %2536, %v2464_v27  }
0x3744   :  { %2537 = vset.pattern.permute.xlu0 %v2742_v9 }
0x3745   :  { %2128 = vperm.xlu0 %2537, %v2464_v27  }
0x374d   :  { %2539 = vset.pattern.permute.xlu0 %v2744_v45 }
0x3797   :  { %v2123_v24 = vpop.permute.xlu2 %2122 }
0x37a6   :  { %v2089_v40 = vpop.permute.xlu0 %2088 }
0x37a7   :  { %v2091_v57 = vmul.f32 %v2089_v40, %v2069_v22  ;;  %v2125_v22 = vmul.f32 %v3540_v13, %v2123_v24 }
0x37a9   :  { %2093 = vrot.lane.b32.xlu1 %v2091_v57, %s2745_s19  ;;  %v2126_v45 = vadd.f32 %v3552_v5, %v2125_v22 }
0x37ae   :  { %v3641_v4 = vpop.permute.xlu0 %2098 }
0x37b7   :  { %v2129_v31 = vpop.permute.xlu0 %2128 }
0x381b   :  { %v2094_v33 = vpop.permute.xlu1 %2093 }
0x381c   :  { %v3638_v53 = vadd.f32 %v2658_v17, %v2094_v33 }
0x381e   :  { %v2111_v10 = vsub.f32 %v3638_v53, %v2109_v35 }
0x3820   :  { %v2112_v18 = vmul.f32 %v2111_v10, %v3641_v4 }
0x3822   :  { %2114 = vrot.lane.b32.xlu1 %v2112_v18, %s2743_s27 }
0x382a   :  { %2134 = vperm.xlu1 %2538, %v2464_v27  }
0x3832   :  { %2540 = vset.pattern.permute.xlu1 %v2742_v9  ;;  %v2131_v9 = vmul.f32 %v3546_v63, %v2129_v31 }
0x3834   :  { %v2132_v32 = vadd.f32 %v2131_v9, %v2126_v45 }
0x3894   :  { %v2115_v16 = vpop.permute.xlu1 %2114 }
0x3895   :  { %v3651_v3 = vadd.f32 %v2115_v16, %v3619_v19 }
0x3897   :  { %2465 = vmatmul.msk.f32.vlgmr.msrb.gmra.mxu0 %vm43_vm0, %v3651_v3 }
0x389c   :  { %v2135_v62 = vpop.permute.xlu1 %2134 }
0x389d   :  { %v2137_v19 = vmul.f32 %v3558_v6, %v2135_v62 }
0x389f   :  { %v2138_v17 = vadd.f32 %v2137_v19, %v2132_v32 }
0x3914   :  { %v2159_v61 = vpop.f32.mrf.mxu0 }
0x3915   :  { %v2160_v29 = vadd.f32 %v3533_v14, %v2159_v61 }
0x3917   :  { %2183 = vrot.lane.b32.xlu2 %v2160_v29, %s2743_s27  ;;  %v2162_v38 = vadd.f32 %v2160_v29, %v2138_v17 }
0x3919   :  { %v2466_v1 = vmul.f32 -1.442695, %v2162_v38  ;;  %v3668_v38 = vld [vmem:[%s3804_s0 + $0x98] sm:$0xff] }
0x391b   :  { %2659 = vpow2.f32 %v2466_v1 }
0x3921   :  { %v2660_v40 = vpop.eup %2659 }
0x3922   :  { %v2166_v57 = vadd.f32 1.0, %v2660_v40 }
0x3924   :  { %2661 = vrcp.f32 %v2166_v57  ;;  %v2178_v61 = vand.u32 2147483648, %v2166_v57  ;;  %vm2172_vm15 = vweird.f32 %v2166_v57  ;;  %v2176_v24 = vand.u32 2147483647, %v2166_v57 }
0x3926   :  { %v2179_v31 = vor.u32 1.1754944e-38, %v2178_v61  ;;  %vm2177_vm2 = vcmp.eq.f32.partialorder %v2176_v24, 8.507059e+37 }
0x392a   :  { %v2662_v33 = vpop.eup %2661 }
0x392b   :  { %v2168_v35 = vmul.f32 %v2662_v33, %v2166_v57  ;;  %vm2173_vm14 = vweird.f32 %v2662_v33 }
0x392c   :  { %vm2174_vm1 = vmor %vm2172_vm15, %vm2173_vm14 }
0x392d   :  { %v2169_v10 = vsub.f32 1.0, %v2168_v35 }
0x392f   :  { %v2170_v18 = vmul.f32 %v2662_v33, %v2169_v10 }
0x3931   :  { %v2171_v16 = vadd.f32 %v2662_v33, %v2170_v18 }
0x3933   :  { %v2175_v22 = vsel %vm2174_vm1, %v2662_v33, %v2171_v16 }
0x3934   :  { %v2180_v45 = vsel %vm2177_vm2, %v2179_v31, %v2175_v22 }
0x3971   :  { %v2184_v29 = vpop.permute.xlu2 %2183 }
0x3972   :  { %v2186_v9 = vmul.f32 %v2184_v29, %v2180_v45 }
0x3974   :  { %2188 = vrot.lane.b32.xlu1 %v2186_v9, %s2743_s27 }
0x39e6   :  { %v2189_v62 = vpop.permute.xlu1 %2188 }
0x39e7   :  { %v2191_v32 = vadd.f32 %v2189_v62, %v2138_v17 }
0x39e9   :  { %2663 = vtanh.f32 %v2191_v32 }
0x39ef   :  { %v2664_v19 = vpop.eup %2663 }
0x39f0   :  { %2194 = vrot.lane.b32.xlu2 %v2664_v19, %s2743_s27 }
0x39f8   :  { %2219 = vrot.lane.b32.xlu2 %v3651_v3, %s2743_s27 }
0x3a00   :  { %2233 = vperm.xlu2 %2536, %v3668_v38  }
0x3a08   :  { %2541 = vset.pattern.permute.xlu2 %v2741_v7 }
0x3a09   :  { %2245 = vperm.xlu2 %2541, %v3668_v38  }
0x3a4a   :  { %v2195_v1 = vpop.permute.xlu2 %2194 }
0x3a4b   :  { %v2197_v17 = vsub.f32 %v3651_v3, %v2195_v1 }
0x3a4d   :  { %2199 = vrot.lane.b32.xlu0 %v2197_v17, %s2745_s19 }
0x3a52   :  { %v2220_v10 = vpop.permute.xlu2 %2219 }
0x3a55   :  { %2209 = vperm.xlu0 %2539, %v2464_v27  }
0x3a5a   :  { %v2234_v31 = vpop.permute.xlu2 %2233 }
0x3a5b   :  { %v2236_v29 = vmul.f32 %v3540_v13, %v2234_v31 }
0x3a5d   :  { %v2237_v32 = vadd.f32 %v3552_v5, %v2236_v29 }
0x3a63   :  { %v2246_v62 = vpop.permute.xlu2 %2245 }
0x3abf   :  { %v2200_v40 = vpop.permute.xlu0 %2199 }
0x3ac0   :  { %v2202_v57 = vmul.f32 %v2200_v40, %v2180_v45 }
0x3ac2   :  { %2204 = vrot.lane.b32.xlu1 %v2202_v57, %s2745_s19 }
0x3ac7   :  { %v2210_v16 = vpop.permute.xlu0 %2209 }
0x3b34   :  { %v2205_v33 = vpop.permute.xlu1 %2204 }
0x3b35   :  { %v3676_v35 = vadd.f32 %v2664_v19, %v2205_v33 }
0x3b37   :  { %v2222_v18 = vsub.f32 %v3676_v35, %v2220_v10 }
0x3b39   :  { %v2223_v7 = vmul.f32 %v2222_v18, %v2210_v16 }
0x3b3b   :  { %2225 = vrot.lane.b32.xlu1 %v2223_v7, %s2743_s27 }
0x3b43   :  { %2239 = vperm.xlu1 %2540, %v3668_v38  }
0x3bad   :  { %v2226_v61 = vpop.permute.xlu1 %2225 }
0x3bae   :  { %v3682_v24 = vadd.f32 %v2226_v61, %v3651_v3  ;;  %v2248_v3 = vmul.f32 %v3558_v6, %v2246_v62  ;;  %v215_v62 = vmul.f32 %v2913_v54, %v2910_v52  ;;  %v1546_v52 = vmul.f32 %v3451_v25, %v3448_v21 }
0x3baf   :  { %v1879_v54 = vmul.f32 %v3573_v28, %v3570_v12  ;;  %v658_v25 = vmul.f32 %v3106_v37, %v3103_v42  ;;  %v991_v28 = vmul.f32 %v3260_v58, %v3257_v59  ;;  %v1657_v37 = vmul.f32 %v3480_v11, %v3477_v0 }
0x3bb0   :  { %2468 = vmatmul.msk.f32.vlgmr.msrb.gmra.mxu1 %vm43_vm0, %v3682_v24  ;;  %v1990_v58 = vmul.f32 %v3612_v60, %v3609_v2 }
0x3bb5   :  { %v2240_v45 = vpop.permute.xlu1 %2239 }
0x3bb6   :  { %v2242_v9 = vmul.f32 %v3546_v63, %v2240_v45 }
0x3bb8   :  { %v2243_v19 = vadd.f32 %v2242_v9, %v2237_v32  ;;  %v547_v32 = vmul.f32 %v3063_v50, %v3060_v43  ;;  %v2212_v43 = vmul.f32 %v2210_v16, %v3676_v35 }
0x3bba   :  { %v2249_v1 = vadd.f32 %v2248_v3, %v2243_v19  ;;  %v880_v19 = vmul.f32 %v3182_v39, %v3179_v34  ;;  %v1213_v3 = vmul.f32 %v3336_v23, %v3333_v8  ;;  %v325_v23 = vmul.f32 %v2970_v49, %v2967_v46 }
0x3bbb   :  { %v1324_v49 = vmul.f32 %v3379_v41, %v3376_v36 }
0x3c2d   :  { %v2270_v27 = vpop.f32.mrf.mxu1 }
0x3c2e   :  { %v2271_v22 = vadd.f32 %v3533_v14, %v2270_v27 }
0x3c30   :  { %2294 = vrot.lane.b32.xlu0 %v2271_v22, %s2743_s27  ;;  %v2273_v17 = vadd.f32 %v2271_v22, %v2249_v1 }
0x3c32   :  { %v2469_v40 = vmul.f32 -1.442695, %v2273_v17 }
0x3c34   :  { %2665 = vpow2.f32 %v2469_v40 }
0x3c3a   :  { %v2666_v57 = vpop.eup %2665 }
0x3c3b   :  { %v2277_v14 = vadd.f32 1.0, %v2666_v57 }
0x3c3d   :  { %2667 = vrcp.f32 %v2277_v14  ;;  %v2289_v63 = vand.u32 2147483648, %v2277_v14  ;;  %vm2283_vm4 = vweird.f32 %v2277_v14  ;;  %v2287_v61 = vand.u32 2147483647, %v2277_v14 }
0x3c3f   :  { %v2290_v27 = vor.u32 1.1754944e-38, %v2289_v63  ;;  %vm2288_vm6 = vcmp.eq.f32.partialorder %v2287_v61, 8.507059e+37 }
0x3c43   :  { %v2668_v33 = vpop.eup %2667 }
0x3c44   :  { %v2279_v10 = vmul.f32 %v2668_v33, %v2277_v14  ;;  %vm2284_vm3 = vweird.f32 %v2668_v33 }
0x3c45   :  { %vm2285_vm5 = vmor %vm2283_vm4, %vm2284_vm3 }
0x3c46   :  { %v2280_v18 = vsub.f32 1.0, %v2279_v10  ;;  %v436_v10 = vmul.f32 %v3030_v56, %v3027_v51  ;;  %v1102_v51 = vmul.f32 %v3303_v15, %v3300_v47  ;;  %v1435_v56 = vmul.f32 %v3412_v55, %v3409_v26  ;;  %v2346_v47 = vld [vmem:[%s3812_s8 + $0x8] sm:$0xff]  ;;  %v2345_v15 = vld [vmem:[%s3812_s8] sm:$0xff] }
0x3c48   :  { %v2281_v7 = vmul.f32 %v2668_v33, %v2280_v18  ;;  %v769_v18 = vmul.f32 %v3139_v48, %v3136_v44  ;;  %v1768_v44 = vmul.f32 %v3519_v30, %v3516_v20  ;;  %v2101_v48 = vmul.f32 %v3641_v4, %v3638_v53 }
0x3c4a   :  { %v2282_v13 = vadd.f32 %v2668_v33, %v2281_v7  ;;  %v2348_v7 = vld [vmem:[%s3812_s8 + $0x18] sm:$0xff] }
0x3c4b   :  { %2364 = vmatpush.msrb.mxu2 %v2348_v7 }
0x3c4c   :  { %v2286_v5 = vsel %vm2285_vm5, %v2668_v33, %v2282_v13  ;;  %v2347_v13 = vld [vmem:[%s3812_s8 + $0x10] sm:$0xff]  ;;  %s2746_s8 = smov [#allocation4]  }
0x3c4d   :  { %v2291_v22 = vsel %vm2288_vm6, %v2290_v27, %v2286_v5  ;;  %2365 = vmatpush.msrb.mxu2 %v2347_v13  ;;  %v2344_v5 = vld [vmem:[#allocation3] sm:$0xff] }
0x3c4f   :  { %2366 = vmatpush.msrb.mxu2 %v2346_v47 }
0x3c51   :  { %2367 = vmatpush.msrb.mxu2 %v2345_v15 }
0x3ca2   :  { %v2295_v6 = vpop.permute.xlu0 %2294 }
0x3ca3   :  { %v2297_v31 = vmul.f32 %v2295_v6, %v2291_v22 }
0x3ca5   :  { %2299 = vrot.lane.b32.xlu1 %v2297_v31, %s2743_s27 }
0x3d17   :  { %v2300_v45 = vpop.permute.xlu1 %2299 }
0x3d18   :  { %v2302_v29 = vadd.f32 %v2300_v45, %v2249_v1 }
0x3d1a   :  { %2669 = vtanh.f32 %v2302_v29 }
0x3d20   :  { %v3693_v9 = vpop.eup %2669 }
0x3d21   :  { %2305 = vrot.lane.b32.xlu2 %v3693_v9, %s2743_s27 }
0x3d29   :  { %2330 = vrot.lane.b32.xlu2 %v3682_v24, %s2743_s27 }
0x3d31   :  { %217 = vrot.lane.b32.xlu2 %v215_v62, %s2743_s27 }
0x3d39   :  { %549 = vrot.lane.b32.xlu2 %v547_v32, %s2743_s27 }
0x3d41   :  { %882 = vrot.lane.b32.xlu2 %v880_v19, %s2743_s27 }
0x3d49   :  { %1215 = vrot.lane.b32.xlu2 %v1213_v3, %s2743_s27 }
0x3d51   :  { %1548 = vrot.lane.b32.xlu2 %v1546_v52, %s2743_s27 }
0x3d59   :  { %1881 = vrot.lane.b32.xlu2 %v1879_v54, %s2743_s27 }
0x3d61   :  { %2214 = vrot.lane.b32.xlu2 %v2212_v43, %s2743_s27 }
0x3d7b   :  { %v2306_v50 = vpop.permute.xlu2 %2305 }
0x3d7c   :  { %v2308_v34 = vsub.f32 %v3682_v24, %v2306_v50 }
0x3d7e   :  { %2310 = vrot.lane.b32.xlu0 %v2308_v34, %s2745_s19 }
0x3d83   :  { %v2331_v39 = vpop.permute.xlu2 %2330 }
0x3d86   :  { %2320 = vperm.xlu0 %2539, %v3668_v38  }
0x3d8b   :  { %v218_v8 = vpop.permute.xlu2 %217 }
0x3d8c   :  { %220 = vst.msk [vmem:[#allocation4] sm:$0xff] %vm43_vm0, %v218_v8 }
0x3d8e   :  { %327 = vrot.lane.b32.xlu0 %v325_v23, %s2743_s27 }
0x3d93   :  { %v550_v21 = vpop.permute.xlu2 %549 }
0x3d94   :  { %553 = vst.msk [vmem:[#allocation4 + $0x18] sm:$0xff] %vm43_vm0, %v550_v21 }
0x3d96   :  { %660 = vrot.lane.b32.xlu0 %v658_v25, %s2743_s27 }
0x3d9b   :  { %v883_v12 = vpop.permute.xlu2 %882 }
0x3d9c   :  { %886 = vst.msk [vmem:[#allocation4 + $0x30] sm:$0xff] %vm43_vm0, %v883_v12 }
0x3d9e   :  { %993 = vrot.lane.b32.xlu0 %v991_v28, %s2743_s27 }
0x3da3   :  { %v1216_v46 = vpop.permute.xlu2 %1215 }
0x3da4   :  { %1219 = vst.msk [vmem:[#allocation4 + $0x48] sm:$0xff] %vm43_vm0, %v1216_v46 }
0x3da6   :  { %1326 = vrot.lane.b32.xlu0 %v1324_v49, %s2743_s27 }
0x3dab   :  { %v1549_v42 = vpop.permute.xlu2 %1548 }
0x3dac   :  { %1552 = vst.msk [vmem:[#allocation4 + $0x60] sm:$0xff] %vm43_vm0, %v1549_v42 }
0x3dae   :  { %1659 = vrot.lane.b32.xlu0 %v1657_v37, %s2743_s27 }
0x3db3   :  { %v1882_v59 = vpop.permute.xlu2 %1881 }
0x3db4   :  { %1885 = vst.msk [vmem:[#allocation4 + $0x78] sm:$0xff] %vm43_vm0, %v1882_v59 }
0x3db6   :  { %1992 = vrot.lane.b32.xlu0 %v1990_v58, %s2743_s27 }
0x3dbb   :  { %v2215_v36 = vpop.permute.xlu2 %2214 }
0x3dbc   :  { %2218 = vst.msk [vmem:[#allocation4 + $0x90] sm:$0xff] %vm43_vm0, %v2215_v36 }
0x3df0   :  { %v2311_v41 = vpop.permute.xlu0 %2310 }
0x3df1   :  { %v2313_v38 = vmul.f32 %v2311_v41, %v2291_v22 }
0x3df3   :  { %2315 = vrot.lane.b32.xlu1 %v2313_v38, %s2745_s19 }
0x3df8   :  { %v2321_v0 = vpop.permute.xlu0 %2320 }
0x3e00   :  { %v328_v11 = vpop.permute.xlu0 %327 }
0x3e01   :  { %331 = vst.msk [vmem:[#allocation4 + $0x8] sm:$0xff] %vm43_vm0, %v328_v11 }
0x3e08   :  { %v661_v35 = vpop.permute.xlu0 %660 }
0x3e09   :  { %664 = vst.msk [vmem:[#allocation4 + $0x20] sm:$0xff] %vm43_vm0, %v661_v35 }
0x3e10   :  { %v994_v16 = vpop.permute.xlu0 %993 }
0x3e11   :  { %997 = vst.msk [vmem:[#allocation4 + $0x38] sm:$0xff] %vm43_vm0, %v994_v16 }
0x3e18   :  { %v1327_v2 = vpop.permute.xlu0 %1326 }
0x3e19   :  { %1330 = vst.msk [vmem:[#allocation4 + $0x50] sm:$0xff] %vm43_vm0, %v1327_v2 }
0x3e20   :  { %v1660_v60 = vpop.permute.xlu0 %1659 }
0x3e21   :  { %1663 = vst.msk [vmem:[#allocation4 + $0x68] sm:$0xff] %vm43_vm0, %v1660_v60 }
0x3e28   :  { %v1993_v1 = vpop.permute.xlu0 %1992 }
0x3e29   :  { %1996 = vst.msk [vmem:[#allocation4 + $0x80] sm:$0xff] %vm43_vm0, %v1993_v1 }
0x3e65   :  { %v2316_v17 = vpop.permute.xlu1 %2315 }
0x3e66   :  { %v2318_v40 = vadd.f32 %v3693_v9, %v2316_v17 }
0x3e68   :  { %v2323_v57 = vmul.f32 %v2321_v0, %v2318_v40  ;;  %v2333_v14 = vsub.f32 %v2318_v40, %v2331_v39 }
0x3e6a   :  { %v2334_v33 = vmul.f32 %v2333_v14, %v2321_v0  ;;  %2325 = vrot.lane.b32.xlu0 %v2323_v57, %s2743_s27 }
0x3e6c   :  { %2336 = vrot.lane.b32.xlu1 %v2334_v33, %s2743_s27 }
0x3e74   :  { %438 = vrot.lane.b32.xlu1 %v436_v10, %s2743_s27 }
0x3e7c   :  { %771 = vrot.lane.b32.xlu1 %v769_v18, %s2743_s27 }
0x3e84   :  { %1104 = vrot.lane.b32.xlu1 %v1102_v51, %s2743_s27 }
0x3e8c   :  { %1437 = vrot.lane.b32.xlu1 %v1435_v56, %s2743_s27 }
0x3e94   :  { %1770 = vrot.lane.b32.xlu1 %v1768_v44, %s2743_s27 }
0x3e9c   :  { %2103 = vrot.lane.b32.xlu1 %v2101_v48, %s2743_s27  ;;  %s2379_s27 = sshll.u32 %s2746_s8, 4  ;;  %s2380_s27 = int_to_ptr.vmem [resolvable:$true] %s2379_s27 }
0x3edc   :  { %v2326_v26 = vpop.permute.xlu0 %2325 }
0x3edd   :  { %2329 = vst.msk [vmem:[#allocation4 + $0x98] sm:$0xff] %vm43_vm0, %v2326_v26 }
0x3ede   :  { %v2337_v55 = vpop.permute.xlu1 %2336 }
0x3edf   :  { %v2339_v20 = vadd.f32 %v2337_v55, %v3682_v24 }
0x3ee1   :  { %2340 = vst.msk [vmem:[#allocation2] sm:$0xff] %vm43_vm0, %v2339_v20  ;;  %2470 = vmatmul.msk.f32.vlgmr.msrb.gmra.mxu2 %vm43_vm0, %v2339_v20 }
0x3ee6   :  { %v439_v30 = vpop.permute.xlu1 %438 }
0x3ee7   :  { %442 = vst.msk [vmem:[#allocation4 + $0x10] sm:$0xff] %vm43_vm0, %v439_v30 }
0x3eee   :  { %v772_v53 = vpop.permute.xlu1 %771 }
0x3eef   :  { %775 = vst.msk [vmem:[#allocation4 + $0x28] sm:$0xff] %vm43_vm0, %v772_v53 }
0x3ef6   :  { %v1105_v4 = vpop.permute.xlu1 %1104 }
0x3ef7   :  { %1108 = vst.msk [vmem:[#allocation4 + $0x40] sm:$0xff] %vm43_vm0, %v1105_v4 }
0x3efe   :  { %v1438_v63 = vpop.permute.xlu1 %1437 }
0x3eff   :  { %1441 = vst.msk [vmem:[#allocation4 + $0x58] sm:$0xff] %vm43_vm0, %v1438_v63 }
0x3f06   :  { %v1771_v61 = vpop.permute.xlu1 %1770 }
0x3f07   :  { %1774 = vst.msk [vmem:[#allocation4 + $0x70] sm:$0xff] %vm43_vm0, %v1771_v61 }
0x3f0e   :  { %v2104_v24 = vpop.permute.xlu1 %2103 }
0x3f0f   :  { %2107 = vst.msk [vmem:[#allocation4 + $0x88] sm:$0xff] %vm43_vm0, %v2104_v24 }
0x3f10   :  { %2387 = dma.vmem_to_hbm [thread:$0]  %s2380_s27, 2560, %s2382_s2, [#allocation5], %s2747_s9, %s2747_s9, %s2748_s12  }
0x3f64   :  { %v2369_v27 = vpop.f32.mrf.mxu2 }
0x3f65   :  { %v2372_v6 = vadd.f32 %v2369_v27, %v2344_v5 }
0x3f67   :  { %2671 = vtanh.f32 %v2372_v6 }
0x3f6d   :  { %v2672_v22 = vpop.eup %2671 }
0x3f6e   :  { %2374 = vst.msk [vmem:[#allocation6] sm:$0xff] %vm43_vm0, %v2672_v22 }
0x3f6f   :  { %2398 = dma.vmem_to_hbm [thread:$0]  %s2394_s14, 128, %s2396_s17, [#allocation7]  }
0x3f70   :  { %2735 = dma.done.wait [#allocation5], 2560  }
0x3f71   :  { %2736 = vsyncadd [#allocation5], 4294964736 }
0x3f72   :  { %2737 = dma.done.wait [#allocation7], 128  }
0x3f73   :  { %2738 = vsyncadd [#allocation7], 4294967168 }
0x3f74   :  { %2407 = vsyncpa [#allocation5], 1 }
0x3f75   :  { %2408 = vsyncpa [#allocation7], 1 }

</bundles_post_ra>
